<compile_context>
chip_gen: v7x
topology: tpu7x:2x2x1
jax: 0.10.0
libtpu: 0.0.40
codegen_flags: <defaults>
</compile_context>

<pallas_src>
import functools
import math

import jax
import jax.numpy as jnp
from jax.experimental import pallas as pl
from jax.experimental.pallas import tpu as pltpu


def _round_up(v, m):
    return (v + m - 1) // m * m


def _lcm(a, b):
    return a * b // math.gcd(a, b)


# --------------------------------------------------------------------------
# Kernel 1: layer-1 neighbor aggregation in the projected (Hp-wide) space,
# ReLU, and both layer-2 projections of h:
#   agg = (A_counts @ q) * invdeg          (k-reduction, f32 acc)
#   h   = relu(agg + root1)                (root1 = x @ Wr1 + b1, precomputed)
#   p   = h @ Wl2        (bf16 out)        (layer-2 neighbor projection)
#   r2  = h @ Wr2 + b2   (f32 out)         (layer-2 root term, fused here)
# grid = (row blocks i, reduction blocks k over A's columns)
# --------------------------------------------------------------------------
def sage_layer1_kernel(a_ref, qk_ref, root1_ref, invdeg_ref, wl2_ref, wr2_ref,
                       b2_ref, p_ref, r2_ref, acc_ref):
    k = pl.program_id(1)

    @pl.when(k == 0)
    def _():
        acc_ref[...] = jnp.zeros_like(acc_ref)

    # neighbor-count aggregation in projected space: acc += A_counts[i,k] @ q[k]
    acc_ref[...] += jnp.dot(a_ref[...], qk_ref[...],
                            preferred_element_type=jnp.float32)

    @pl.when(k == pl.num_programs(1) - 1)
    def _():
        h = jnp.maximum(acc_ref[...] * invdeg_ref[...] + root1_ref[...], 0.0)
        # TODO(synk): F.dropout(training=True) not modeled; eval-mode identity used.
        h_bf = h.astype(jnp.bfloat16)
        p_ref[...] = jnp.dot(h_bf, wl2_ref[...],
                             preferred_element_type=jnp.float32).astype(jnp.bfloat16)
        r2_ref[...] = (jnp.dot(h_bf, wr2_ref[...],
                               preferred_element_type=jnp.float32) + b2_ref[...])


# --------------------------------------------------------------------------
# Kernel 2: layer-2 aggregation A @ p, add precomputed root term r2,
# log_softmax over the real (masked) class columns.
# --------------------------------------------------------------------------
def sage_layer2_kernel(a_ref, pk_ref, ri_ref, invdeg_ref, out_ref, acc_ref, *,
                       num_classes):
    k = pl.program_id(1)

    @pl.when(k == 0)
    def _():
        acc_ref[...] = jnp.zeros_like(acc_ref)

    acc_ref[...] += jnp.dot(a_ref[...], pk_ref[...],
                            preferred_element_type=jnp.float32)

    @pl.when(k == pl.num_programs(1) - 1)
    def _():
        z = acc_ref[...] * invdeg_ref[...] + ri_ref[...]
        # log_softmax over the real class columns only (padded lanes masked)
        col = jax.lax.broadcasted_iota(jnp.int32, z.shape, 1)
        valid = col < num_classes
        z = jnp.where(valid, z, -jnp.inf)
        m = jnp.max(z, axis=1, keepdims=True)
        e = jnp.where(valid, jnp.exp(z - m), 0.0)
        lse = jnp.log(jnp.sum(e, axis=1, keepdims=True)) + m
        out_ref[...] = z - lse


# --------------------------------------------------------------------------
# Wrapper: O(E) degree + bf16 count-adjacency, tiny dense projections in XLA,
# two tiled pallas_calls for the O(N^2) work, slice the result.
# --------------------------------------------------------------------------
@functools.partial(jax.jit, static_argnames=("tm", "tk"))
def sage_conv_net(x, edge_index, params, *, tm=256, tk=512):
    N, F = x.shape
    H = params["wl1"].shape[1]
    C = params["wl2"].shape[1]

    Np = _round_up(N, _lcm(tm, tk))
    Hp = _round_up(H, 128)
    Cp = _round_up(C, 128)

    # ---- O(E) glue: bf16 edge-count adjacency + f32 inverse degree ----
    src, dst = edge_index[0], edge_index[1]
    deg = jnp.zeros((Np,), jnp.float32).at[dst].add(1.0)
    inv_deg = (1.0 / jnp.maximum(deg, 1.0))[:, None]             # [Np, 1] f32
    adj = jnp.zeros((Np, Np), jnp.bfloat16).at[dst, src].add(
        jnp.ones(dst.shape, jnp.bfloat16))                       # counts exact in bf16

    # ---- tiny O(N*F*H) projections in f32 (reassociated layer-1) ----
    x32 = x.astype(jnp.float32)
    q = (x32 @ params["wl1"]).astype(jnp.bfloat16)               # neighbor projection
    root1 = x32 @ params["wr1"] + params["bl1"]                  # root term + bias (f32)

    qp = jnp.zeros((Np, Hp), jnp.bfloat16).at[:N, :H].set(q)
    root1p = jnp.zeros((Np, Hp), jnp.float32).at[:N, :H].set(root1)
    wl2 = jnp.zeros((Hp, Cp), jnp.bfloat16).at[:H, :C].set(params["wl2"].astype(jnp.bfloat16))
    wr2 = jnp.zeros((Hp, Cp), jnp.bfloat16).at[:H, :C].set(params["wr2"].astype(jnp.bfloat16))
    b2 = jnp.zeros((1, Cp), jnp.float32).at[:, :C].set(params["bl2"])

    grid = (Np // tm, Np // tk)
    cparams = pltpu.CompilerParams(
        dimension_semantics=("parallel", "arbitrary"),
        vmem_limit_bytes=48 * 1024 * 1024,
    )

    cost1 = pl.CostEstimate(
        flops=2 * Np * Np * Hp + 2 * 2 * Np * Hp * Cp,
        transcendentals=0,
        bytes_accessed=Np * Np * 2 + Np * Hp * 6 + Np * Cp * 6 + 2 * Hp * Cp * 2,
    )
    cost2 = pl.CostEstimate(
        flops=2 * Np * Np * Cp,
        transcendentals=Np * Cp,
        bytes_accessed=Np * Np * 2 + Np * Cp * 10,
    )

    p, r2 = pl.pallas_call(
        sage_layer1_kernel,
        out_shape=(jax.ShapeDtypeStruct((Np, Cp), jnp.bfloat16),
                   jax.ShapeDtypeStruct((Np, Cp), jnp.float32)),
        grid_spec=pltpu.PrefetchScalarGridSpec(
            num_scalar_prefetch=0,
            grid=grid,
            in_specs=[
                pl.BlockSpec((tm, tk), lambda i, k: (i, k)),     # A counts tile
                pl.BlockSpec((tk, Hp), lambda i, k: (k, 0)),     # q rows (k-block)
                pl.BlockSpec((tm, Hp), lambda i, k: (i, 0)),     # root1 rows (i-block)
                pl.BlockSpec((tm, 1), lambda i, k: (i, 0)),      # inv degree
                pl.BlockSpec((Hp, Cp), lambda i, k: (0, 0)),     # Wl2
                pl.BlockSpec((Hp, Cp), lambda i, k: (0, 0)),     # Wr2
                pl.BlockSpec((1, Cp), lambda i, k: (0, 0)),      # b2
            ],
            out_specs=[
                pl.BlockSpec((tm, Cp), lambda i, k: (i, 0)),     # p  = h @ Wl2
                pl.BlockSpec((tm, Cp), lambda i, k: (i, 0)),     # r2 = h @ Wr2 + b2
            ],
            scratch_shapes=[pltpu.VMEM((tm, Hp), jnp.float32)],
        ),
        compiler_params=cparams,
        cost_estimate=cost1,
    )(adj, qp, root1p, inv_deg, wl2, wr2, b2)

    out_padded = pl.pallas_call(
        functools.partial(sage_layer2_kernel, num_classes=C),
        out_shape=jax.ShapeDtypeStruct((Np, Cp), jnp.float32),
        grid_spec=pltpu.PrefetchScalarGridSpec(
            num_scalar_prefetch=0,
            grid=grid,
            in_specs=[
                pl.BlockSpec((tm, tk), lambda i, k: (i, k)),     # A counts tile
                pl.BlockSpec((tk, Cp), lambda i, k: (k, 0)),     # p rows (k-block)
                pl.BlockSpec((tm, Cp), lambda i, k: (i, 0)),     # r2 rows (i-block)
                pl.BlockSpec((tm, 1), lambda i, k: (i, 0)),      # inv degree
            ],
            out_specs=pl.BlockSpec((tm, Cp), lambda i, k: (i, 0)),
            scratch_shapes=[pltpu.VMEM((tm, Cp), jnp.float32)],
        ),
        compiler_params=cparams,
        cost_estimate=cost2,
    )(adj, p, r2, inv_deg)

    return out_padded[:N, :C]


# --------------------------------------------------------------------------
# Parameter init (matches PyG SAGEConv Linear defaults in spirit)
# --------------------------------------------------------------------------
def init_params(key, num_node_features, hidden, num_classes):
    ks = jax.random.split(key, 6)
    s1 = 1.0 / jnp.sqrt(num_node_features)
    s2 = 1.0 / jnp.sqrt(hidden)
    return dict(
        wl1=jax.random.uniform(ks[0], (num_node_features, hidden), jnp.float32, -s1, s1),
        bl1=jax.random.uniform(ks[1], (1, hidden), jnp.float32, -s1, s1),
        wr1=jax.random.uniform(ks[2], (num_node_features, hidden), jnp.float32, -s1, s1),
        wl2=jax.random.uniform(ks[3], (hidden, num_classes), jnp.float32, -s2, s2),
        bl2=jax.random.uniform(ks[4], (1, num_classes), jnp.float32, -s2, s2),
        wr2=jax.random.uniform(ks[5], (hidden, num_classes), jnp.float32, -s2, s2),
    )


def reference_forward(x, edge_index, params):
    """Pure-JAX f32 reference of the same forward pass (eval-mode dropout)."""
    N = x.shape[0]
    src, dst = edge_index[0], edge_index[1]
    adj = jnp.zeros((N, N), jnp.float32).at[dst, src].add(1.0)
    A = adj / jnp.maximum(adj.sum(axis=1, keepdims=True), 1.0)
    h = jnp.maximum(A @ x @ params["wl1"] + x @ params["wr1"] + params["bl1"], 0.0)
    z = A @ h @ params["wl2"] + h @ params["wr2"] + params["bl2"]
    return jax.nn.log_softmax(z, axis=1)


if __name__ == "__main__":
    num_nodes = 16
    num_node_features = 8
    hidden = 32
    num_classes = 4
    num_edges = 40

    key = jax.random.PRNGKey(0)
    kx, ke, kp = jax.random.split(key, 3)

    x = jax.random.normal(kx, (num_nodes, num_node_features), jnp.float32)
    edge_index = jax.random.randint(ke, (2, num_edges), 0, num_nodes, jnp.int32)
    params = init_params(kp, num_node_features, hidden, num_classes)

    out = sage_conv_net(x, edge_index, params)
    jax.block_until_ready(out)

    assert out.shape == (num_nodes, num_classes)
    # rows of log_softmax must sum (in prob space) to 1
    assert bool(jnp.allclose(jnp.exp(out).sum(axis=1), 1.0, atol=1e-4))
    # agree with pure-f32 reference up to bf16 matmul precision
    ref = reference_forward(x, edge_index, params)
    assert bool(jnp.allclose(out, ref, atol=1e-1)), (out, ref)
    print("KERNEL_OK")
</pallas_src>

<mosaic_0001>
module attributes {stable_mosaic.version = 11 : i64} {
  func.func @sage_layer1_kernel(%arg0: i32, %arg1: i32, %arg2: memref<256x512xbf16, #tpu.memory_space<vmem>>, %arg3: memref<512x128xbf16, #tpu.memory_space<vmem>>, %arg4: memref<256x128xf32, #tpu.memory_space<vmem>>, %arg5: memref<256x1xf32, #tpu.memory_space<vmem>>, %arg6: memref<128x128xbf16, #tpu.memory_space<vmem>>, %arg7: memref<128x128xbf16, #tpu.memory_space<vmem>>, %arg8: memref<1x128xf32, #tpu.memory_space<vmem>>, %arg9: memref<256x128xbf16, #tpu.memory_space<vmem>>, %arg10: memref<256x128xf32, #tpu.memory_space<vmem>>, %arg11: memref<256x128xf32, #tpu.memory_space<vmem>>) attributes {dimension_semantics = [#tpu.dimension_semantics<parallel>, #tpu.dimension_semantics<arbitrary>], iteration_bounds = array<i64: 2, 1>, scalar_prefetch = 0 : i64, scratch_operands = 1 : i64, tpu.core_type = #tpu.core_type<tc>, window_params = [{transform_indices = @transform_0, window_bounds = array<i64: 256, 512>}, {transform_indices = @transform_1, window_bounds = array<i64: 512, 128>}, {transform_indices = @transform_2, window_bounds = array<i64: 256, 128>}, {transform_indices = @transform_3, window_bounds = array<i64: 256, 1>}, {pipeline_mode = #tpu.pipeline_mode<synchronous>, transform_indices = @transform_4, window_bounds = array<i64: 128, 128>}, {pipeline_mode = #tpu.pipeline_mode<synchronous>, transform_indices = @transform_5, window_bounds = array<i64: 128, 128>}, {pipeline_mode = #tpu.pipeline_mode<synchronous>, transform_indices = @transform_6, window_bounds = array<i64: 1, 128>}, {transform_indices = @transform_7, window_bounds = array<i64: 256, 128>}, {transform_indices = @transform_8, window_bounds = array<i64: 256, 128>}]} {
    %c0_i32 = arith.constant 0 : i32
    %0 = arith.cmpi eq, %arg1, %c0_i32 : i32
    %1 = arith.extui %0 : i1 to i32
    %c0_i32_0 = arith.constant 0 : i32
    %2 = arith.cmpi ne, %1, %c0_i32_0 : i32
    scf.if %2 {
      %cst_10 = arith.constant 0.000000e+00 : f32
      %12 = vector.broadcast %cst_10 : f32 to vector<256x128xf32>
      %c0_11 = arith.constant 0 : index
      %c0_12 = arith.constant 0 : index
      %13 = vector.load %arg11[%c0_11, %c0_12] : memref<256x128xf32, #tpu.memory_space<vmem>>, vector<256x128xf32>
      tpu.vector_store %arg11[%c0_11, %c0_12], %12 {strides = array<i32>} : memref<256x128xf32, #tpu.memory_space<vmem>>, vector<256x128xf32>,
    } else {
    }
    %c0 = arith.constant 0 : index
    %c0_1 = arith.constant 0 : index
    %3 = vector.load %arg11[%c0, %c0_1] : memref<256x128xf32, #tpu.memory_space<vmem>>, vector<256x128xf32>
    %c0_2 = arith.constant 0 : index
    %c0_3 = arith.constant 0 : index
    %4 = vector.load %arg2[%c0_2, %c0_3] : memref<256x512xbf16, #tpu.memory_space<vmem>>, vector<256x512xbf16>
    %c0_4 = arith.constant 0 : index
    %c0_5 = arith.constant 0 : index
    %5 = vector.load %arg3[%c0_4, %c0_5] : memref<512x128xbf16, #tpu.memory_space<vmem>>, vector<512x128xbf16>
    %cst = arith.constant dense<0.000000e+00> : vector<256x128xf32>
    %6 = tpu.matmul %4, %5, %cst {dimension_numbers = #tpu.dot_dimension_numbers<[1], [0], [0], [1], [0, 0, 1, 1], [], []>} : vector<256x512xbf16>, vector<512x128xbf16>, vector<256x128xf32> -> vector<256x128xf32>
    %7 = arith.addf %3, %6 : vector<256x128xf32>
    %c0_6 = arith.constant 0 : index
    %c0_7 = arith.constant 0 : index
    %8 = vector.load %arg11[%c0_6, %c0_7] : memref<256x128xf32, #tpu.memory_space<vmem>>, vector<256x128xf32>
    tpu.vector_store %arg11[%c0_6, %c0_7], %7 {strides = array<i32>} : memref<256x128xf32, #tpu.memory_space<vmem>>, vector<256x128xf32>,
    %c0_i32_8 = arith.constant 0 : i32
    %9 = arith.cmpi eq, %arg1, %c0_i32_8 : i32
    %10 = arith.extui %9 : i1 to i32
    %c0_i32_9 = arith.constant 0 : i32
    %11 = arith.cmpi ne, %10, %c0_i32_9 : i32
    scf.if %11 {
      %c0_10 = arith.constant 0 : index
      %c0_11 = arith.constant 0 : index
      %12 = vector.load %arg11[%c0_10, %c0_11] : memref<256x128xf32, #tpu.memory_space<vmem>>, vector<256x128xf32>
      %c0_12 = arith.constant 0 : index
      %c0_13 = arith.constant 0 : index
      %13 = vector.load %arg5[%c0_12, %c0_13] : memref<256x1xf32, #tpu.memory_space<vmem>>, vector<256x1xf32>
      %14 = vector.broadcast %13 : vector<256x1xf32> to vector<256x128xf32>
      %15 = arith.mulf %12, %14 : vector<256x128xf32>
      %c0_14 = arith.constant 0 : index
      %c0_15 = arith.constant 0 : index
      %16 = vector.load %arg4[%c0_14, %c0_15] : memref<256x128xf32, #tpu.memory_space<vmem>>, vector<256x128xf32>
      %17 = arith.addf %15, %16 : vector<256x128xf32>
      %cst_16 = arith.constant 0.000000e+00 : f32
      %18 = vector.broadcast %cst_16 : f32 to vector<256x128xf32>
      %19 = arith.maximumf %17, %18 : vector<256x128xf32>
      %20 = arith.truncf %19 : vector<256x128xf32> to vector<256x128xbf16>
      %c0_17 = arith.constant 0 : index
      %c0_18 = arith.constant 0 : index
      %21 = vector.load %arg6[%c0_17, %c0_18] : memref<128x128xbf16, #tpu.memory_space<vmem>>, vector<128x128xbf16>
      %cst_19 = arith.constant dense<0.000000e+00> : vector<256x128xf32>
      %22 = tpu.matmul %20, %21, %cst_19 {dimension_numbers = #tpu.dot_dimension_numbers<[1], [0], [0], [1], [0, 0, 1, 1], [], []>} : vector<256x128xbf16>, vector<128x128xbf16>, vector<256x128xf32> -> vector<256x128xf32>
      %23 = arith.truncf %22 : vector<256x128xf32> to vector<256x128xbf16>
      %c0_20 = arith.constant 0 : index
      %c0_21 = arith.constant 0 : index
      %24 = vector.load %arg9[%c0_20, %c0_21] : memref<256x128xbf16, #tpu.memory_space<vmem>>, vector<256x128xbf16>
      tpu.vector_store %arg9[%c0_20, %c0_21], %23 {strides = array<i32>} : memref<256x128xbf16, #tpu.memory_space<vmem>>, vector<256x128xbf16>,
      %c0_22 = arith.constant 0 : index
      %c0_23 = arith.constant 0 : index
      %25 = vector.load %arg7[%c0_22, %c0_23] : memref<128x128xbf16, #tpu.memory_space<vmem>>, vector<128x128xbf16>
      %cst_24 = arith.constant dense<0.000000e+00> : vector<256x128xf32>
      %26 = tpu.matmul %20, %25, %cst_24 {dimension_numbers = #tpu.dot_dimension_numbers<[1], [0], [0], [1], [0, 0, 1, 1], [], []>} : vector<256x128xbf16>, vector<128x128xbf16>, vector<256x128xf32> -> vector<256x128xf32>
      %c0_25 = arith.constant 0 : index
      %c0_26 = arith.constant 0 : index
      %27 = vector.load %arg8[%c0_25, %c0_26] : memref<1x128xf32, #tpu.memory_space<vmem>>, vector<1x128xf32>
      %28 = vector.broadcast %27 : vector<1x128xf32> to vector<256x128xf32>
      %29 = arith.addf %26, %28 : vector<256x128xf32>
      %c0_27 = arith.constant 0 : index
      %c0_28 = arith.constant 0 : index
      %30 = vector.load %arg10[%c0_27, %c0_28] : memref<256x128xf32, #tpu.memory_space<vmem>>, vector<256x128xf32>
      tpu.vector_store %arg10[%c0_27, %c0_28], %29 {strides = array<i32>} : memref<256x128xf32, #tpu.memory_space<vmem>>, vector<256x128xf32>,
    } else {
    }
    return
  }
  func.func @transform_0(%arg0: i32, %arg1: i32) -> (i32, i32) {
    %c0_i32 = arith.constant 0 : i32
    return %arg0, %arg1 : i32, i32
  }
  func.func @transform_1(%arg0: i32, %arg1: i32) -> (i32, i32) {
    %c0_i32 = arith.constant 0 : i32
    %c0_i32_0 = arith.constant 0 : i32
    return %arg1, %c0_i32 : i32, i32
  }
  func.func @transform_2(%arg0: i32, %arg1: i32) -> (i32, i32) {
    %c0_i32 = arith.constant 0 : i32
    %c0_i32_0 = arith.constant 0 : i32
    return %arg0, %c0_i32 : i32, i32
  }
  func.func @transform_3(%arg0: i32, %arg1: i32) -> (i32, i32) {
    %c0_i32 = arith.constant 0 : i32
    %c0_i32_0 = arith.constant 0 : i32
    return %arg0, %c0_i32 : i32, i32
  }
  func.func @transform_4(%arg0: i32, %arg1: i32) -> (i32, i32) {
    %c0_i32 = arith.constant 0 : i32
    %c0_i32_0 = arith.constant 0 : i32
    %c0_i32_1 = arith.constant 0 : i32
    return %c0_i32, %c0_i32_0 : i32, i32
  }
  func.func @transform_5(%arg0: i32, %arg1: i32) -> (i32, i32) {
    %c0_i32 = arith.constant 0 : i32
    %c0_i32_0 = arith.constant 0 : i32
    %c0_i32_1 = arith.constant 0 : i32
    return %c0_i32, %c0_i32_0 : i32, i32
  }
  func.func @transform_6(%arg0: i32, %arg1: i32) -> (i32, i32) {
    %c0_i32 = arith.constant 0 : i32
    %c0_i32_0 = arith.constant 0 : i32
    %c0_i32_1 = arith.constant 0 : i32
    return %c0_i32, %c0_i32_0 : i32, i32
  }
  func.func @transform_7(%arg0: i32, %arg1: i32) -> (i32, i32) {
    %c0_i32 = arith.constant 0 : i32
    %c0_i32_0 = arith.constant 0 : i32
    return %arg0, %c0_i32 : i32, i32
  }
  func.func @transform_8(%arg0: i32, %arg1: i32) -> (i32, i32) {
    %c0_i32 = arith.constant 0 : i32
    %c0_i32_0 = arith.constant 0 : i32
    return %arg0, %c0_i32 : i32, i32
  }
}

module attributes {stable_mosaic.version = 11 : i64} {
  func.func @sage_layer2_kernel(%arg0: i32, %arg1: i32, %arg2: memref<256x512xbf16, #tpu.memory_space<vmem>>, %arg3: memref<512x128xbf16, #tpu.memory_space<vmem>>, %arg4: memref<256x128xf32, #tpu.memory_space<vmem>>, %arg5: memref<256x1xf32, #tpu.memory_space<vmem>>, %arg6: memref<256x128xf32, #tpu.memory_space<vmem>>, %arg7: memref<256x128xf32, #tpu.memory_space<vmem>>) attributes {dimension_semantics = [#tpu.dimension_semantics<parallel>, #tpu.dimension_semantics<arbitrary>], iteration_bounds = array<i64: 2, 1>, scalar_prefetch = 0 : i64, scratch_operands = 1 : i64, tpu.core_type = #tpu.core_type<tc>, window_params = [{transform_indices = @transform_0, window_bounds = array<i64: 256, 512>}, {transform_indices = @transform_1, window_bounds = array<i64: 512, 128>}, {transform_indices = @transform_2, window_bounds = array<i64: 256, 128>}, {transform_indices = @transform_3, window_bounds = array<i64: 256, 1>}, {transform_indices = @transform_4, window_bounds = array<i64: 256, 128>}]} {
    %c0_i32 = arith.constant 0 : i32
    %0 = arith.cmpi eq, %arg1, %c0_i32 : i32
    %1 = arith.extui %0 : i1 to i32
    %c0_i32_0 = arith.constant 0 : i32
    %2 = arith.cmpi ne, %1, %c0_i32_0 : i32
    scf.if %2 {
      %cst_10 = arith.constant 0.000000e+00 : f32
      %12 = vector.broadcast %cst_10 : f32 to vector<256x128xf32>
      %c0_11 = arith.constant 0 : index
      %c0_12 = arith.constant 0 : index
      %13 = vector.load %arg7[%c0_11, %c0_12] : memref<256x128xf32, #tpu.memory_space<vmem>>, vector<256x128xf32>
      tpu.vector_store %arg7[%c0_11, %c0_12], %12 {strides = array<i32>} : memref<256x128xf32, #tpu.memory_space<vmem>>, vector<256x128xf32>,
    } else {
    }
    %c0 = arith.constant 0 : index
    %c0_1 = arith.constant 0 : index
    %3 = vector.load %arg7[%c0, %c0_1] : memref<256x128xf32, #tpu.memory_space<vmem>>, vector<256x128xf32>
    %c0_2 = arith.constant 0 : index
    %c0_3 = arith.constant 0 : index
    %4 = vector.load %arg2[%c0_2, %c0_3] : memref<256x512xbf16, #tpu.memory_space<vmem>>, vector<256x512xbf16>
    %c0_4 = arith.constant 0 : index
    %c0_5 = arith.constant 0 : index
    %5 = vector.load %arg3[%c0_4, %c0_5] : memref<512x128xbf16, #tpu.memory_space<vmem>>, vector<512x128xbf16>
    %cst = arith.constant dense<0.000000e+00> : vector<256x128xf32>
    %6 = tpu.matmul %4, %5, %cst {dimension_numbers = #tpu.dot_dimension_numbers<[1], [0], [0], [1], [0, 0, 1, 1], [], []>} : vector<256x512xbf16>, vector<512x128xbf16>, vector<256x128xf32> -> vector<256x128xf32>
    %7 = arith.addf %3, %6 : vector<256x128xf32>
    %c0_6 = arith.constant 0 : index
    %c0_7 = arith.constant 0 : index
    %8 = vector.load %arg7[%c0_6, %c0_7] : memref<256x128xf32, #tpu.memory_space<vmem>>, vector<256x128xf32>
    tpu.vector_store %arg7[%c0_6, %c0_7], %7 {strides = array<i32>} : memref<256x128xf32, #tpu.memory_space<vmem>>, vector<256x128xf32>,
    %c0_i32_8 = arith.constant 0 : i32
    %9 = arith.cmpi eq, %arg1, %c0_i32_8 : i32
    %10 = arith.extui %9 : i1 to i32
    %c0_i32_9 = arith.constant 0 : i32
    %11 = arith.cmpi ne, %10, %c0_i32_9 : i32
    scf.if %11 {
      %c0_10 = arith.constant 0 : index
      %c0_11 = arith.constant 0 : index
      %12 = vector.load %arg7[%c0_10, %c0_11] : memref<256x128xf32, #tpu.memory_space<vmem>>, vector<256x128xf32>
      %c0_12 = arith.constant 0 : index
      %c0_13 = arith.constant 0 : index
      %13 = vector.load %arg5[%c0_12, %c0_13] : memref<256x1xf32, #tpu.memory_space<vmem>>, vector<256x1xf32>
      %14 = vector.broadcast %13 : vector<256x1xf32> to vector<256x128xf32>
      %15 = arith.mulf %12, %14 : vector<256x128xf32>
      %c0_14 = arith.constant 0 : index
      %c0_15 = arith.constant 0 : index
      %16 = vector.load %arg4[%c0_14, %c0_15] : memref<256x128xf32, #tpu.memory_space<vmem>>, vector<256x128xf32>
      %17 = arith.addf %15, %16 : vector<256x128xf32>
      %18 = tpu.iota {dimensions = array<i32: 1>} : vector<256x128xi32>
      %c4_i32 = arith.constant 4 : i32
      %19 = vector.broadcast %c4_i32 : i32 to vector<256x128xi32>
      %20 = arith.cmpi slt, %18, %19 : vector<256x128xi32>
      %cst_16 = arith.constant 0xFF800000 : f32
      %21 = vector.broadcast %cst_16 : f32 to vector<256x128xf32>
      %22 = arith.select %20, %17, %21 : vector<256x128xi1>, vector<256x128xf32>
      %cst_17 = arith.constant dense<0xFF800000> : vector<256xf32>
      %23 = vector.multi_reduction <maximumf>, %22, %cst_17 [1] : vector<256x128xf32> to vector<256xf32>
      %24 = vector.shape_cast %23 : vector<256xf32> to vector<256x1xf32>
      %25 = vector.broadcast %24 : vector<256x1xf32> to vector<256x128xf32>
      %26 = arith.subf %22, %25 : vector<256x128xf32>
      %27 = math.exp %26 : vector<256x128xf32>
      %cst_18 = arith.constant 0.000000e+00 : f32
      %28 = vector.broadcast %cst_18 : f32 to vector<256x128xf32>
      %29 = arith.select %20, %27, %28 : vector<256x128xi1>, vector<256x128xf32>
      %cst_19 = arith.constant dense<0.000000e+00> : vector<256xf32>
      %30 = vector.multi_reduction <add>, %29, %cst_19 [1] : vector<256x128xf32> to vector<256xf32>
      %31 = vector.shape_cast %30 : vector<256xf32> to vector<256x1xf32>
      %32 = math.log %31 : vector<256x1xf32>
      %33 = arith.addf %32, %24 : vector<256x1xf32>
      %34 = vector.broadcast %33 : vector<256x1xf32> to vector<256x128xf32>
      %35 = arith.subf %22, %34 : vector<256x128xf32>
      %c0_20 = arith.constant 0 : index
      %c0_21 = arith.constant 0 : index
      %36 = vector.load %arg6[%c0_20, %c0_21] : memref<256x128xf32, #tpu.memory_space<vmem>>, vector<256x128xf32>
      tpu.vector_store %arg6[%c0_20, %c0_21], %35 {strides = array<i32>} : memref<256x128xf32, #tpu.memory_space<vmem>>, vector<256x128xf32>,
    } else {
    }
    return
  }
  func.func @transform_0(%arg0: i32, %arg1: i32) -> (i32, i32) {
    %c0_i32 = arith.constant 0 : i32
    return %arg0, %arg1 : i32, i32
  }
  func.func @transform_1(%arg0: i32, %arg1: i32) -> (i32, i32) {
    %c0_i32 = arith.constant 0 : i32
    %c0_i32_0 = arith.constant 0 : i32
    return %arg1, %c0_i32 : i32, i32
  }
  func.func @transform_2(%arg0: i32, %arg1: i32) -> (i32, i32) {
    %c0_i32 = arith.constant 0 : i32
    %c0_i32_0 = arith.constant 0 : i32
    return %arg0, %c0_i32 : i32, i32
  }
  func.func @transform_3(%arg0: i32, %arg1: i32) -> (i32, i32) {
    %c0_i32 = arith.constant 0 : i32
    %c0_i32_0 = arith.constant 0 : i32
    return %arg0, %c0_i32 : i32, i32
  }
  func.func @transform_4(%arg0: i32, %arg1: i32) -> (i32, i32) {
    %c0_i32 = arith.constant 0 : i32
    %c0_i32_0 = arith.constant 0 : i32
    return %arg0, %c0_i32 : i32, i32
  }
}

</mosaic_0001>

<bundles_post_ra>
// kernel: sage_conv_net.3
= control target key start
LH: loop header
LB: loop body
LE: loop exit
PB: predicated region body
PF: predicated region fallthrough
CT: control target
= control target key end

     0   :  { %s2948_s15 = smov 0   ;;  %s2950_s16 = smov 0   ;;  %s3682_s0 = inlined_call_operand.vmem [shape: bf16[512,512], index: 0, kind: input, shape index: {}]   ;;  %s3683_s1 = inlined_call_operand.vmem [shape: bf16[512,128], index: 1, kind: input, shape index: {}]   ;;  %s3684_s2 = inlined_call_operand.vmem [shape: f32[512,128], index: 2, kind: input, shape index: {}]   ;;  %s3685_s3 = inlined_call_operand.vmem [shape: f32[512,1], index: 3, kind: input, shape index: {}]   ;;  %s3686_s4 = inlined_call_operand.vmem [shape: f32[512,128], index: 4, kind: output, shape index: {}]  }
   0x1   :  { %s2952_s17 = smov 0  }
   0x2 LB: > { %s26_s18 = sadd.s32 1, %s2916_s16  ;;  %p2282_p0 = scmp.ge.s32.totalorder %s2920_s17, 1  ;;  %s2920_s17 = sphi %s2952_s17, %s14_s17   ;;  %s2916_s16 = sphi %s2950_s16, %s3727_s16   ;;  %s2912_s15 = sphi %s2948_s15, %s3726_s15  }
   0x3   : > { %p28_p1 = scmp.ge.s32.totalorder %s26_s18, 2  ;;  %p216_p2 = scmp.lt.s32.totalorder %s2920_s17, 3 }
   0x5   : > { %s3729_s18 = smov (%p28_p1, %s26_s18), 0  ;;  %p217_p3 = pnand %p2282_p0, %p216_p2 }
   0x7   : > { %220 = sbr.rel (%p217_p3) target bundleno = 711 (0x2c7), region = 36 }
   0xe   : > { %v2642_v0 = vld [vmem:[%s3683_s1 + $0x40] sm:$0xff]   ;;  %v2922_v4 = vmov 0   ;;  %v2646_v5 = vld [vmem:[%s3683_s1 + $0x48] sm:$0xff]   ;;  %v2650_v9 = vld [vmem:[%s3683_s1 + $0x50] sm:$0xff]   ;;  %s2283_s29 = sshll.u32 %s2912_s15, 5 }
   0xf   : > { %v2643_v1 = vld [vmem:[%s3683_s1 + $0xc0] sm:$0xff]   ;;  %2391 = vmatprep.subr.bf16.mxu0 %v2642_v0  ;;  %2640 = vset.pattern.permute.xlu0 %v2922_v4  ;;  %v2647_v6 = vld [vmem:[%s3683_s1 + $0xc8] sm:$0xff]   ;;  %v2651_v10 = vld [vmem:[%s3683_s1 + $0xd0] sm:$0xff]   ;;  %p264_p4 = scmp.lt.s32.totalorder %s2283_s29, 63 }
  0x10   : > { %v2644_v2 = vld [vmem:[%s3683_s1] sm:$0xff]   ;;  %2503 = vmatprep.subr.bf16.mxu1 %v2643_v1  ;;  %2641 = vset.pattern.permute.xlu1 %v2922_v4  ;;  %v2648_v7 = vld [vmem:[%s3683_s1 + $0x8] sm:$0xff]   ;;  %v2652_v11 = vld [vmem:[%s3683_s1 + $0x10] sm:$0xff]  }
  0x11   : > { %v2645_v3 = vld [vmem:[%s3683_s1 + $0x80] sm:$0xff]   ;;  %2392 = vmatpush3.bf16.msra.mxu0 %v2644_v2  ;;  %v2649_v8 = vld [vmem:[%s3683_s1 + $0x88] sm:$0xff]   ;;  %v2653_v12 = vld [vmem:[%s3683_s1 + $0x90] sm:$0xff]   ;;  %s3731_s29 = smov (!%p264_p4, %s2283_s29), 63 }
  0x12   : > { %2504 = vmatpush3.bf16.msra.mxu1 %v2645_v3  ;;  %2393 = vmatprep.subr.bf16.mxu0 %v2646_v5  ;;  %v2654_v13 = vld [vmem:[%s3683_s1 + $0x58] sm:$0xff]   ;;  %v2658_v17 = vld [vmem:[%s3683_s1 + $0x60] sm:$0xff]   ;;  %v2662_v21 = vld [vmem:[%s3683_s1 + $0x68] sm:$0xff]   ;;  %s2390_s30 = sshll.u32 %s3731_s29, 4  ;;  %s3089_s21 = sshll.u32 %s3731_s29, 3 }
  0x13   : > { %2505 = vmatprep.subr.bf16.mxu1 %v2647_v6  ;;  %v2655_v14 = vld [vmem:[%s3683_s1 + $0xd8] sm:$0xff]   ;;  %v2659_v18 = vld [vmem:[%s3683_s1 + $0xe0] sm:$0xff]   ;;  %v2663_v22 = vld [vmem:[%s3683_s1 + $0xe8] sm:$0xff]   ;;  %s3065_s12 = scalar_lea.vmem %s3682_s0, %s2390_s30  ;;  %s3098_s24 = scalar_lea.vmem %s3685_s3, %s3089_s21 }
  0x14   : > { %v2656_v15 = vld [vmem:[%s3683_s1 + $0x18] sm:$0xff]   ;;  %v2660_v19 = vld [vmem:[%s3683_s1 + $0x20] sm:$0xff]   ;;  %v2664_v23 = vld [vmem:[%s3683_s1 + $0x28] sm:$0xff]   ;;  %s3182_s26 = scalar_lea.vmem %s3684_s2, %s3089_s21  ;;  %s3576_s30 = scalar_lea.vmem %s3686_s4, %s3089_s21 }
  0x15   : > { %2394 = vmatpush3.bf16.msra.mxu0 %v2648_v7  ;;  %v2657_v16 = vld [vmem:[%s3683_s1 + $0x98] sm:$0xff]   ;;  %v2661_v20 = vld [vmem:[%s3683_s1 + $0xa0] sm:$0xff]   ;;  %v2665_v24 = vld [vmem:[%s3683_s1 + $0xa8] sm:$0xff]  }
  0x16   : > { %2506 = vmatpush3.bf16.msra.mxu1 %v2649_v8  ;;  %2395 = vmatprep.subr.bf16.mxu0 %v2650_v9  ;;  %v2666_v25 = vld [vmem:[%s3683_s1 + $0x70] sm:$0xff]   ;;  %v2670_v29 = vld [vmem:[%s3683_s1 + $0x78] sm:$0xff]   ;;  %v1428_v51 = vld [vmem:[%s3098_s24] sm:$0xff] }
  0x17   : > { %2507 = vmatprep.subr.bf16.mxu1 %v2651_v10  ;;  %v2667_v26 = vld [vmem:[%s3683_s1 + $0xf0] sm:$0xff]   ;;  %v2671_v30 = vld [vmem:[%s3683_s1 + $0xf8] sm:$0xff]   ;;  %1462 = vperm.xlu0 %2640, %v1428_v51   ;;  %v1429_v54 = vld [vmem:[%s3098_s24 + $0x8] sm:$0xff] }
  0x18   : > { %v2668_v27 = vld [vmem:[%s3683_s1 + $0x30] sm:$0xff]   ;;  %v2672_v31 = vld [vmem:[%s3683_s1 + $0x38] sm:$0xff]   ;;  %v1432_v59 = vld [vmem:[%s3098_s24 + $0x20] sm:$0xff] }
  0x19   : > { %2396 = vmatpush3.bf16.msra.mxu0 %v2652_v11  ;;  %v2669_v28 = vld [vmem:[%s3683_s1 + $0xb0] sm:$0xff]   ;;  %v2673_v32 = vld [vmem:[%s3683_s1 + $0xb8] sm:$0xff]   ;;  %v1433_v60 = vld [vmem:[%s3098_s24 + $0x28] sm:$0xff] }
  0x1a   : > { %2508 = vmatpush3.bf16.msra.mxu1 %v2653_v12  ;;  %2397 = vmatprep.subr.bf16.mxu0 %v2654_v13  ;;  %v2674_v33 = vld [vmem:[%s3065_s12] ss:$16 sps:$4 sm:$0xff]   ;;  %v2676_v34 = vld [vmem:[%s3065_s12 + $0x4] ss:$16 sps:$4 sm:$0xff]   ;;  %v2677_v35 = vld [vmem:[%s3065_s12 + $0x8] ss:$16 sps:$4 sm:$0xff]  }
  0x1b   : > { %2509 = vmatprep.subr.bf16.mxu1 %v2655_v14  ;;  %v2679_v36 = vld [vmem:[%s3065_s12 + $0xc] ss:$16 sps:$4 sm:$0xff]   ;;  %1039 = vmatprep.mubr.bf16.mxu0 %v2676_v34  ;;  %v2680_v37 = vld [vmem:[%s3065_s12 + $0x24] ss:$16 sps:$4 sm:$0xff]   ;;  %v2684_v39 = vld [vmem:[%s3065_s12 + $0x20] ss:$16 sps:$4 sm:$0xff]  }
  0x1c   : > { %1200 = vmatprep.mubr.bf16.mxu1 %v2679_v36  ;;  %v2682_v38 = vld [vmem:[%s3065_s12 + $0x2c] ss:$16 sps:$4 sm:$0xff]   ;;  %v2685_v40 = vld [vmem:[%s3065_s12 + $0x28] ss:$16 sps:$4 sm:$0xff]   ;;  %v2686_v41 = vld [vmem:[%s3065_s12 + $0x44] ss:$16 sps:$4 sm:$0xff]   ;;  %1467 = vperm.xlu0 %2640, %v1429_v54  }
  0x1d   : > { %2398 = vmatpush3.bf16.msra.mxu0 %v2656_v15  ;;  %v2688_v42 = vld [vmem:[%s3065_s12 + $0x4c] ss:$16 sps:$4 sm:$0xff]   ;;  %v2690_v43 = vld [vmem:[%s3065_s12 + $0x40] ss:$16 sps:$4 sm:$0xff]   ;;  %v2691_v44 = vld [vmem:[%s3065_s12 + $0x48] ss:$16 sps:$4 sm:$0xff]  }
  0x1e   : > { %2510 = vmatpush3.bf16.msra.mxu1 %v2657_v16  ;;  %2399 = vmatprep.subr.bf16.mxu0 %v2658_v17  ;;  %v2692_v45 = vld [vmem:[%s3065_s12 + $0x64] ss:$16 sps:$4 sm:$0xff]   ;;  %v2694_v46 = vld [vmem:[%s3065_s12 + $0x6c] ss:$16 sps:$4 sm:$0xff]   ;;  %v2696_v47 = vld [vmem:[%s3065_s12 + $0x60] ss:$16 sps:$4 sm:$0xff]  }
  0x1f   : > { %2511 = vmatprep.subr.bf16.mxu1 %v2659_v18  ;;  %v2697_v48 = vld [vmem:[%s3065_s12 + $0x68] ss:$16 sps:$4 sm:$0xff]   ;;  %v2698_v49 = vld [vmem:[%s3065_s12 + $0x84] ss:$16 sps:$4 sm:$0xff]   ;;  %v2700_v50 = vld [vmem:[%s3065_s12 + $0x8c] ss:$16 sps:$4 sm:$0xff]  }
  0x20   : > { %v2702_v52 = vld [vmem:[%s3065_s12 + $0x80] ss:$16 sps:$4 sm:$0xff]   ;;  %v2703_v55 = vld [vmem:[%s3065_s12 + $0x88] ss:$16 sps:$4 sm:$0xff]   ;;  %v2704_v56 = vld [vmem:[%s3065_s12 + $0xa4] ss:$16 sps:$4 sm:$0xff]   ;;  %1482 = vperm.xlu0 %2640, %v1432_v59  }
  0x21   : > { %2400 = vmatpush3.bf16.msra.mxu0 %v2660_v19  ;;  %v1430_v53 = vld [vmem:[%s3098_s24 + $0x10] sm:$0xff]  ;;  %v2706_v57 = vld [vmem:[%s3065_s12 + $0xac] ss:$16 sps:$4 sm:$0xff]   ;;  %v2709_v63 = vld [vmem:[%s3065_s12 + $0xa8] ss:$16 sps:$4 sm:$0xff]  }
  0x22   : > { %2512 = vmatpush3.bf16.msra.mxu1 %v2661_v20  ;;  %2401 = vmatprep.subr.bf16.mxu0 %v2662_v21  ;;  %v1431_v58 = vld [vmem:[%s3098_s24 + $0x18] sm:$0xff]  ;;  %v2708_v61 = vld [vmem:[%s3065_s12 + $0xa0] ss:$16 sps:$4 sm:$0xff]   ;;  %v2710_v0 = vld [vmem:[%s3065_s12 + $0xc4] ss:$16 sps:$4 sm:$0xff]  }
  0x23   : > { %2513 = vmatprep.subr.bf16.mxu1 %v2663_v22  ;;  %1472 = vperm.xlu1 %2641, %v1430_v53   ;;  %v1434_v62 = vld [vmem:[%s3098_s24 + $0x30] sm:$0xff]  ;;  %v2712_v1 = vld [vmem:[%s3065_s12 + $0xcc] ss:$16 sps:$4 sm:$0xff]   ;;  %v1436_v3 = vld [vmem:[%s3098_s24 + $0x40] sm:$0xff] }
  0x24   : > { %1492 = vperm.xlu0 %2640, %v1434_v62   ;;  %v1435_v2 = vld [vmem:[%s3098_s24 + $0x38] sm:$0xff]  ;;  %v1437_v4 = vld [vmem:[%s3098_s24 + $0x48] sm:$0xff]  ;;  %v2714_v5 = vld [vmem:[%s3065_s12 + $0xc0] ss:$16 sps:$4 sm:$0xff]  }
  0x25   : > { %2402 = vmatpush3.bf16.msra.mxu0 %v2664_v23  ;;  %v1438_v6 = vld [vmem:[%s3098_s24 + $0x50] sm:$0xff]  ;;  %v2715_v7 = vld [vmem:[%s3065_s12 + $0xc8] ss:$16 sps:$4 sm:$0xff]   ;;  %v2718_v9 = vld [vmem:[%s3065_s12 + $0xec] ss:$16 sps:$4 sm:$0xff]  }
  0x26   : > { %2514 = vmatpush3.bf16.msra.mxu1 %v2665_v24  ;;  %2403 = vmatprep.subr.bf16.mxu0 %v2666_v25  ;;  %v2716_v8 = vld [vmem:[%s3065_s12 + $0xe4] ss:$16 sps:$4 sm:$0xff]   ;;  %v1439_v10 = vld [vmem:[%s3098_s24 + $0x58] sm:$0xff]  ;;  %v1441_v12 = vld [vmem:[%s3098_s24 + $0x68] sm:$0xff] }
  0x27   : > { %2515 = vmatprep.subr.bf16.mxu1 %v2667_v26  ;;  %1477 = vperm.xlu1 %2641, %v1431_v58   ;;  %v1440_v11 = vld [vmem:[%s3098_s24 + $0x60] sm:$0xff]  ;;  %v1442_v14 = vld [vmem:[%s3098_s24 + $0x70] sm:$0xff]  ;;  %v2721_v15 = vld [vmem:[%s3065_s12 + $0xe8] ss:$16 sps:$4 sm:$0xff]  }
  0x28   : > { %1502 = vperm.xlu0 %2640, %v1436_v3   ;;  %v2720_v13 = vld [vmem:[%s3065_s12 + $0xe0] ss:$16 sps:$4 sm:$0xff]   ;;  %v2722_v16 = vld [vmem:[%s3065_s12 + $0x104] ss:$16 sps:$4 sm:$0xff]   ;;  %v2724_v17 = vld [vmem:[%s3065_s12 + $0x10c] ss:$16 sps:$4 sm:$0xff]   ;;  %v1716_v3 = vlaneseq }
  0x29   : > { %2404 = vmatpush3.bf16.msra.mxu0 %v2668_v27  ;;  %v1443_v18 = vld [vmem:[%s3098_s24 + $0x78] sm:$0xff]  ;;  %v1444_v19 = vld [vmem:[%s3098_s24 + $0x80] sm:$0xff]  ;;  %v1445_v20 = vld [vmem:[%s3098_s24 + $0x88] sm:$0xff] }
  0x2a   : > { %2516 = vmatpush3.bf16.msra.mxu1 %v2669_v28  ;;  %2405 = vmatprep.subr.bf16.mxu0 %v2670_v29  ;;  %v2726_v21 = vld [vmem:[%s3065_s12 + $0x100] ss:$16 sps:$4 sm:$0xff]   ;;  %v2727_v23 = vld [vmem:[%s3065_s12 + $0x108] ss:$16 sps:$4 sm:$0xff]   ;;  %v2728_v24 = vld [vmem:[%s3065_s12 + $0x124] ss:$16 sps:$4 sm:$0xff]  }
  0x2b   : > { %2517 = vmatprep.subr.bf16.mxu1 %v2671_v30  ;;  %1487 = vperm.xlu1 %2641, %v1433_v60   ;;  %v1446_v22 = vld [vmem:[%s3098_s24 + $0x90] sm:$0xff]  ;;  %v2730_v25 = vld [vmem:[%s3065_s12 + $0x12c] ss:$16 sps:$4 sm:$0xff]   ;;  %v1448_v27 = vld [vmem:[%s3098_s24 + $0xa0] sm:$0xff] }
  0x2c   : > { %1512 = vperm.xlu0 %2640, %v1438_v6   ;;  %v1447_v26 = vld [vmem:[%s3098_s24 + $0x98] sm:$0xff]  ;;  %v1449_v28 = vld [vmem:[%s3098_s24 + $0xa8] sm:$0xff]  ;;  %v2732_v29 = vld [vmem:[%s3065_s12 + $0x120] ss:$16 sps:$4 sm:$0xff]  }
  0x2d   : > { %2406 = vmatpush3.bf16.msra.mxu0 %v2672_v31  ;;  %v1450_v30 = vld [vmem:[%s3098_s24 + $0xb0] sm:$0xff]  ;;  %v2733_v31 = vld [vmem:[%s3065_s12 + $0x128] ss:$16 sps:$4 sm:$0xff]   ;;  %v2754_v54 = vld [vmem:[%s3065_s12 + $0x1ac] ss:$16 sps:$4 sm:$0xff]  }
  0x2e   : > { %2518 = vmatpush3.bf16.msra.mxu1 %v2673_v32  ;;  %v2734_v32 = vld [vmem:[%s3065_s12 + $0x144] ss:$16 sps:$4 sm:$0xff]   ;;  %v1451_v34 = vld [vmem:[%s3098_s24 + $0xb8] sm:$0xff]  ;;  %v1453_v36 = vld [vmem:[%s3098_s24 + $0xc8] sm:$0xff] }
  0x2f   : > { %1497 = vperm.xlu1 %2641, %v1435_v2   ;;  %v2750_v51 = vld [vmem:[%s3065_s12 + $0x180] ss:$16 sps:$4 sm:$0xff]   ;;  %v2752_v53 = vld [vmem:[%s3065_s12 + $0x1a4] ss:$16 sps:$4 sm:$0xff]   ;;  %v2760_v58 = vld [vmem:[%s3065_s12 + $0x1cc] ss:$16 sps:$4 sm:$0xff]  }
  0x30   : > { %1040 = vmatmul.mubr.bf16.vlgmr.msra.gmra.mrb[0].mxu0 %v2674_v33  ;;  %1522 = vperm.xlu0 %2640, %v1440_v11   ;;  %v2736_v33 = vld [vmem:[%s3065_s12 + $0x14c] ss:$16 sps:$4 sm:$0xff]   ;;  %v2762_v59 = vld [vmem:[%s3065_s12 + $0x1c0] ss:$16 sps:$4 sm:$0xff]   ;;  %v2763_v60 = vld [vmem:[%s3065_s12 + $0x1c8] ss:$16 sps:$4 sm:$0xff]  }
  0x31   : > { %1201 = vmatmul.mubr.bf16.vlgmr.msra.gmra.mrb[0].mxu1 %v2677_v35  ;;  %1047 = vmatprep.mubr.bf16.mxu0 %v2680_v37  ;;  %v1452_v35 = vld [vmem:[%s3098_s24 + $0xc0] sm:$0xff]  ;;  %v2766_v62 = vld [vmem:[%s3065_s12 + $0x1ec] ss:$16 sps:$4 sm:$0xff]  }
  0x32   : > { %1208 = vmatprep.mubr.bf16.mxu1 %v2682_v38  ;;  %v2738_v37 = vld [vmem:[%s3065_s12 + $0x140] ss:$16 sps:$4 sm:$0xff]  }
  0x33   : > { %1507 = vperm.xlu1 %2641, %v1437_v4   ;;  %v1454_v38 = vld [vmem:[%s3098_s24 + $0xd0] sm:$0xff] }
  0x34   : > { %1532 = vperm.xlu0 %2640, %v1442_v14   ;;  %v3184_v14 = vand.u32 127, %v1716_v3 }
  0x36   : > { %vm1718_vm0 = vcmp.lt.s32.totalorder %v3184_v14, 4 }
  0x37   : > { %1517 = vperm.xlu1 %2641, %v1439_v10  }
  0x38   : > { %1048 = vmatmul.mubr.bf16.gmra.mrb[4].mxu0 %v2684_v39  ;;  %1542 = vperm.xlu0 %2640, %v1444_v19   ;;  %v2739_v39 = vld [vmem:[%s3065_s12 + $0x148] ss:$16 sps:$4 sm:$0xff]  }
  0x39   : > { %1209 = vmatmul.mubr.bf16.gmra.mrb[4].mxu1 %v2685_v40  ;;  %1055 = vmatprep.mubr.bf16.mxu0 %v2686_v41  ;;  %v2740_v40 = vld [vmem:[%s3065_s12 + $0x164] ss:$16 sps:$4 sm:$0xff]   ;;  %v2742_v41 = vld [vmem:[%s3065_s12 + $0x16c] ss:$16 sps:$4 sm:$0xff]  }
  0x3a   : > { %1216 = vmatprep.mubr.bf16.mxu1 %v2688_v42  ;;  %v1455_v42 = vld [vmem:[%s3098_s24 + $0xd8] sm:$0xff] }
  0x3b   : > { %1527 = vperm.xlu1 %2641, %v1441_v12  }
  0x3c   : > { %1552 = vperm.xlu0 %2640, %v1446_v22   ;;  %v1653_v22 = vld [vmem:[%s3182_s26 + $0x8] sm:$0xff] }
  0x3f   : > { %1537 = vperm.xlu1 %2641, %v1443_v18  }
  0x40   : > { %1056 = vmatmul.mubr.bf16.gmra.mrb[8].mxu0 %v2690_v43  ;;  %1562 = vperm.xlu0 %2640, %v1448_v27   ;;  %v1456_v43 = vld [vmem:[%s3098_s24 + $0xe0] sm:$0xff] }
  0x41   : > { %1217 = vmatmul.mubr.bf16.gmra.mrb[8].mxu1 %v2691_v44  ;;  %1063 = vmatprep.mubr.bf16.mxu0 %v2692_v45  ;;  %v1457_v44 = vld [vmem:[%s3098_s24 + $0xe8] sm:$0xff]  ;;  %v2744_v45 = vld [vmem:[%s3065_s12 + $0x160] ss:$16 sps:$4 sm:$0xff]  }
  0x42   : > { %1224 = vmatprep.mubr.bf16.mxu1 %v2694_v46  ;;  %v1458_v46 = vld [vmem:[%s3098_s24 + $0xf0] sm:$0xff] }
  0x43   : > { %1547 = vperm.xlu1 %2641, %v1445_v20  }
  0x44   : > { %1572 = vperm.xlu0 %2640, %v1450_v30  }
  0x47   : > { %1557 = vperm.xlu1 %2641, %v1447_v26  }
  0x48   : > { %1064 = vmatmul.mubr.bf16.gmra.mrb[12].mxu0 %v2696_v47  ;;  %1582 = vperm.xlu0 %2640, %v1452_v35   ;;  %v2745_v47 = vld [vmem:[%s3065_s12 + $0x168] ss:$16 sps:$4 sm:$0xff]  }
  0x49   : > { %1225 = vmatmul.mubr.bf16.gmra.mrb[12].mxu1 %v2697_v48  ;;  %1071 = vmatprep.mubr.bf16.mxu0 %v2698_v49  ;;  %v2746_v48 = vld [vmem:[%s3065_s12 + $0x184] ss:$16 sps:$4 sm:$0xff]   ;;  %v2748_v49 = vld [vmem:[%s3065_s12 + $0x18c] ss:$16 sps:$4 sm:$0xff]  }
  0x4a   : > { %1232 = vmatprep.mubr.bf16.mxu1 %v2700_v50  ;;  %v1459_v50 = vld [vmem:[%s3098_s24 + $0xf8] sm:$0xff] }
  0x4b   : > { %1567 = vperm.xlu1 %2641, %v1449_v28  }
  0x4c   : > { %1592 = vperm.xlu0 %2640, %v1454_v38  }
  0x4f   : > { %1577 = vperm.xlu1 %2641, %v1451_v34  }
  0x50   : > { %1072 = vmatmul.mubr.bf16.gmra.mrb[16].mxu0 %v2702_v52  ;;  %1602 = vperm.xlu0 %2640, %v1456_v43   ;;  %v2751_v52 = vld [vmem:[%s3065_s12 + $0x188] ss:$16 sps:$4 sm:$0xff]  }
  0x51   : > { %1233 = vmatmul.mubr.bf16.gmra.mrb[16].mxu1 %v2703_v55  ;;  %1079 = vmatprep.mubr.bf16.mxu0 %v2704_v56  ;;  %v2756_v55 = vld [vmem:[%s3065_s12 + $0x1a0] ss:$16 sps:$4 sm:$0xff]   ;;  %v2757_v56 = vld [vmem:[%s3065_s12 + $0x1a8] ss:$16 sps:$4 sm:$0xff]  }
  0x52   : > { %1240 = vmatprep.mubr.bf16.mxu1 %v2706_v57  ;;  %v2758_v57 = vld [vmem:[%s3065_s12 + $0x1c4] ss:$16 sps:$4 sm:$0xff]  }
  0x53   : > { %1587 = vperm.xlu1 %2641, %v1453_v36  }
  0x54   : > { %1612 = vperm.xlu0 %2640, %v1458_v46   ;;  %v1655_v46 = vld [vmem:[%s3182_s26 + $0x18] sm:$0xff] }
  0x57   : > { %1597 = vperm.xlu1 %2641, %v1455_v42  }
  0x58   : > { %1080 = vmatmul.mubr.bf16.gmra.mrb[20].mxu0 %v2708_v61  ;;  %v2764_v61 = vld [vmem:[%s3065_s12 + $0x1e4] ss:$16 sps:$4 sm:$0xff]  }
  0x59   : > { %1241 = vmatmul.mubr.bf16.gmra.mrb[20].mxu1 %v2709_v63  ;;  %1087 = vmatprep.mubr.bf16.mxu0 %v2710_v0  ;;  %v2768_v63 = vld [vmem:[%s3065_s12 + $0x1e0] ss:$16 sps:$4 sm:$0xff]   ;;  %v2769_v0 = vld [vmem:[%s3065_s12 + $0x1e8] ss:$16 sps:$4 sm:$0xff]  }
  0x5a   : > { %1248 = vmatprep.mubr.bf16.mxu1 %v2712_v1 }
  0x5b   : > { %1607 = vperm.xlu1 %2641, %v1457_v44  }
  0x5f   : > { %1617 = vperm.xlu1 %2641, %v1459_v50  }
  0x60   : > { %1088 = vmatmul.mubr.bf16.gmra.mrb[24].mxu0 %v2714_v5 }
  0x61   : > { %1249 = vmatmul.mubr.bf16.gmra.mrb[24].mxu1 %v2715_v7  ;;  %1095 = vmatprep.mubr.bf16.mxu0 %v2716_v8 }
  0x62   : > { %1256 = vmatprep.mubr.bf16.mxu1 %v2718_v9 }
  0x68   : > { %1096 = vmatmul.mubr.bf16.gmra.mrb[28].mxu0 %v2720_v13 }
  0x69   : > { %1257 = vmatmul.mubr.bf16.gmra.mrb[28].mxu1 %v2721_v15  ;;  %1103 = vmatprep.mubr.bf16.mxu0 %v2722_v16 }
  0x6a   : > { %1264 = vmatprep.mubr.bf16.mxu1 %v2724_v17  ;;  %v1652_v17 = vld [vmem:[%s3182_s26] sm:$0xff] }
  0x70   : > { %1104 = vmatmul.mubr.bf16.gmra.mrb[32].mxu0 %v2726_v21 }
  0x71   : > { %1265 = vmatmul.mubr.bf16.gmra.mrb[32].mxu1 %v2727_v23  ;;  %1111 = vmatprep.mubr.bf16.mxu0 %v2728_v24 }
  0x72   : > { %1272 = vmatprep.mubr.bf16.mxu1 %v2730_v25 }
  0x78   : > { %1112 = vmatmul.mubr.bf16.gmra.mrb[36].mxu0 %v2732_v29 }
  0x79   : > { %1273 = vmatmul.mubr.bf16.gmra.mrb[36].mxu1 %v2733_v31  ;;  %1119 = vmatprep.mubr.bf16.mxu0 %v2734_v32 }
  0x7a   : > { %1280 = vmatprep.mubr.bf16.mxu1 %v2736_v33 }
  0x80   : > { %1120 = vmatmul.mubr.bf16.gmra.mrb[40].mxu0 %v2738_v37 }
  0x81   : > { %1281 = vmatmul.mubr.bf16.gmra.mrb[40].mxu1 %v2739_v39  ;;  %1127 = vmatprep.mubr.bf16.mxu0 %v2740_v40 }
  0x82   : > { %1288 = vmatprep.mubr.bf16.mxu1 %v2742_v41  ;;  %v1654_v41 = vld [vmem:[%s3182_s26 + $0x10] sm:$0xff] }
  0x88   : > { %1128 = vmatmul.mubr.bf16.gmra.mrb[44].mxu0 %v2744_v45 }
  0x89   : > { %1289 = vmatmul.mubr.bf16.gmra.mrb[44].mxu1 %v2745_v47  ;;  %1135 = vmatprep.mubr.bf16.mxu0 %v2746_v48 }
  0x8a   : > { %1296 = vmatprep.mubr.bf16.mxu1 %v2748_v49 }
  0x90   : > { %1136 = vmatmul.mubr.bf16.gmra.mrb[48].mxu0 %v2750_v51 }
  0x91   : > { %1297 = vmatmul.mubr.bf16.gmra.mrb[48].mxu1 %v2751_v52  ;;  %1143 = vmatprep.mubr.bf16.mxu0 %v2752_v53 }
  0x92   : > { %1304 = vmatprep.mubr.bf16.mxu1 %v2754_v54 }
  0x96   : > { %v1463_v2 = vpop.permute.xlu0 %1462 }
  0x98   : > { %1144 = vmatmul.mubr.bf16.gmra.mrb[52].mxu0 %v2756_v55 }
  0x99   : > { %1305 = vmatmul.mubr.bf16.gmra.mrb[52].mxu1 %v2757_v56  ;;  %1151 = vmatprep.mubr.bf16.mxu0 %v2758_v57 }
  0x9a   : > { %1312 = vmatprep.mubr.bf16.mxu1 %v2760_v58 }
  0x9b   : > { %v1468_v18 = vpop.permute.xlu0 %1467 }
  0xa0   : > { %1152 = vmatmul.mubr.bf16.gmra.mrb[56].mxu0 %v2762_v59 }
  0xa1   : > { %1313 = vmatmul.mubr.bf16.gmra.mrb[56].mxu1 %v2763_v60  ;;  %1159 = vmatprep.mubr.bf16.mxu0 %v2764_v61 }
  0xa2   : > { %1320 = vmatprep.mubr.bf16.mxu1 %v2766_v62  ;;  %v1473_v21 = vpop.permute.xlu1 %1472 }
  0xa6   : > { %v1478_v44 = vpop.permute.xlu1 %1477 }
  0xa8   : > { %1160 = vmatmul.mubr.bf16.gmra.mrb[60].mxu0 %v2768_v63  ;;  %v1483_v63 = vpop.permute.xlu0 %1482 }
  0xa9   : > { %1321 = vmatmul.mubr.bf16.gmra.mrb[60].mxu1 %v2769_v0  ;;  %v1656_v0 = vld [vmem:[%s3182_s26 + $0x20] sm:$0xff] }
 0x103   : > { %v2407_v1 = vpop.f32.mrb[0].mxu0 }
 0x104   : > { %v2519_v4 = vpop.f32.mrb[0].mxu1  ;;  %v2408_v5 = vpop.f32.mrb[1].mxu0 }
 0x105   : > { %v2409_v6 = vadd.f32 %v2408_v5, %v2407_v1  ;;  %v2520_v7 = vpop.f32.mrb[1].mxu1  ;;  %v2410_v8 = vpop.f32.mrb[2].mxu0 }
 0x106   : > { %v2521_v9 = vadd.f32 %v2520_v7, %v2519_v4  ;;  %v2522_v10 = vpop.f32.mrb[2].mxu1  ;;  %v2411_v11 = vpop.f32.mrb[3].mxu0 }
 0x107   : > { %v2412_v12 = vadd.f32 %v2411_v11, %v2410_v8  ;;  %v2523_v13 = vpop.f32.mrb[3].mxu1  ;;  %v1488_v4 = vpop.permute.xlu1 %1487 }
 0x108   : > { %v1203_v15 = vadd.f32 %v2521_v9, %v2409_v6  ;;  %v2524_v16 = vadd.f32 %v2523_v13, %v2522_v10  ;;  %v1657_v6 = vld [vmem:[%s3182_s26 + $0x28] sm:$0xff] }
 0x10a   : > { %v1620_v19 = vmul.f32 %v1463_v2, %v1203_v15  ;;  %v1206_v20 = vadd.f32 %v2524_v16, %v2412_v12 }
 0x10b   : > { %v2413_v23 = vpop.f32.mrb[4].mxu0 }
 0x10c   : > { %v1684_v24 = vadd.f32 %v1652_v17, %v1620_v19  ;;  %v1621_v25 = vmul.f32 %v1468_v18, %v1206_v20  ;;  %v2525_v26 = vpop.f32.mrb[4].mxu1  ;;  %v2414_v27 = vpop.f32.mrb[5].mxu0 }
 0x10d   : > { %v2415_v28 = vadd.f32 %v2414_v27, %v2413_v23  ;;  %v2526_v29 = vpop.f32.mrb[5].mxu1  ;;  %v2416_v30 = vpop.f32.mrb[6].mxu0 }
 0x10e   : > { %v1685_v31 = vadd.f32 %v1653_v22, %v1621_v25  ;;  %v2527_v32 = vadd.f32 %v2526_v29, %v2525_v26  ;;  %v2528_v33 = vpop.f32.mrb[6].mxu1  ;;  %v2417_v34 = vpop.f32.mrb[7].mxu0  ;;  %v3191_v35 = vsel %vm1718_vm0, %v1684_v24, -inf  ;;  %v1658_v26 = vld [vmem:[%s3182_s26 + $0x30] sm:$0xff] }
 0x10f   : > { %v2418_v36 = vadd.f32 %v2417_v34, %v2416_v30  ;;  %v2529_v37 = vpop.f32.mrb[7].mxu1  ;;  %1751 = vmax.xlane.f32.xlu0 %v3191_v35  ;;  %v1493_v25 = vpop.permute.xlu0 %1492 }
 0x110   : > { %v1211_v38 = vadd.f32 %v2527_v32, %v2415_v28  ;;  %v2530_v39 = vadd.f32 %v2529_v37, %v2528_v33  ;;  %v3196_v40 = vsel %vm1718_vm0, %v1685_v31, -inf  ;;  %v1498_v29 = vpop.permute.xlu1 %1497  ;;  %v1659_v31 = vld [vmem:[%s3182_s26 + $0x38] sm:$0xff] }
 0x111   : > { %1753 = vmax.xlane.f32.xlu1 %v3196_v40 }
 0x112   : > { %v1622_v42 = vmul.f32 %v1473_v21, %v1211_v38  ;;  %v1214_v43 = vadd.f32 %v2530_v39, %v2418_v36 }
 0x113   : > { %v2419_v45 = vpop.f32.mrb[8].mxu0 }
 0x114   : > { %v1623_v47 = vmul.f32 %v1478_v44, %v1214_v43  ;;  %v2531_v48 = vpop.f32.mrb[8].mxu1  ;;  %v2420_v49 = vpop.f32.mrb[9].mxu0  ;;  %v1686_v50 = vadd.f32 %v1654_v41, %v1622_v42 }
 0x115   : > { %v2421_v51 = vadd.f32 %v2420_v49, %v2419_v45  ;;  %v2532_v52 = vpop.f32.mrb[9].mxu1  ;;  %v2422_v53 = vpop.f32.mrb[10].mxu0 }
 0x116   : > { %v2533_v54 = vadd.f32 %v2532_v52, %v2531_v48  ;;  %v2534_v55 = vpop.f32.mrb[10].mxu1  ;;  %v2423_v56 = vpop.f32.mrb[11].mxu0  ;;  %v3203_v57 = vsel %vm1718_vm0, %v1686_v50, -inf  ;;  %v1687_v58 = vadd.f32 %v1655_v46, %v1623_v47  ;;  %v1660_v52 = vld [vmem:[%s3182_s26 + $0x40] sm:$0xff] }
 0x117   : > { %v2424_v59 = vadd.f32 %v2423_v56, %v2422_v53  ;;  %v2535_v60 = vpop.f32.mrb[11].mxu1  ;;  %1755 = vmax.xlane.f32.xlu0 %v3203_v57 }
 0x118   : > { %v1219_v61 = vadd.f32 %v2533_v54, %v2421_v51  ;;  %v2536_v62 = vadd.f32 %v2535_v60, %v2534_v55  ;;  %v3209_v3 = vsel %vm1718_vm0, %v1687_v58, -inf  ;;  %v1503_v51 = vpop.permute.xlu0 %1502  ;;  %v1508_v55 = vpop.permute.xlu1 %1507  ;;  %v1661_v58 = vld [vmem:[%s3182_s26 + $0x48] sm:$0xff] }
 0x11a   : > { %v1624_v1 = vmul.f32 %v1483_v63, %v1219_v61  ;;  %v1222_v2 = vadd.f32 %v2536_v62, %v2424_v59 }
 0x11b   : > { %1757 = vmax.xlane.f32.xlu0 %v3209_v3  ;;  %v2425_v5 = vpop.f32.mrb[12].mxu0 }
 0x11c   : > { %v1625_v7 = vmul.f32 %v1488_v4, %v1222_v2  ;;  %v2537_v8 = vpop.f32.mrb[12].mxu1  ;;  %v2426_v9 = vpop.f32.mrb[13].mxu0  ;;  %v1688_v10 = vadd.f32 %v1656_v0, %v1624_v1 }
 0x11d   : > { %v2427_v11 = vadd.f32 %v2426_v9, %v2425_v5  ;;  %v2538_v12 = vpop.f32.mrb[13].mxu1  ;;  %v2428_v13 = vpop.f32.mrb[14].mxu0 }
 0x11e   : > { %v2539_v15 = vadd.f32 %v2538_v12, %v2537_v8  ;;  %v2540_v16 = vpop.f32.mrb[14].mxu1  ;;  %v2429_v17 = vpop.f32.mrb[15].mxu0  ;;  %v3215_v18 = vsel %vm1718_vm0, %v1688_v10, -inf  ;;  %v1689_v19 = vadd.f32 %v1657_v6, %v1625_v7 }
 0x11f   : > { %v2430_v20 = vadd.f32 %v2429_v17, %v2428_v13  ;;  %v2541_v21 = vpop.f32.mrb[15].mxu1  ;;  %1759 = vmax.xlane.f32.xlu1 %v3215_v18  ;;  %v1513_v13 = vpop.permute.xlu0 %1512 }
 0x120   : > { %v1227_v22 = vadd.f32 %v2539_v15, %v2427_v11  ;;  %v2542_v23 = vadd.f32 %v2541_v21, %v2540_v16  ;;  %v3220_v24 = vsel %vm1718_vm0, %v1689_v19, -inf  ;;  %v1662_v15 = vld [vmem:[%s3182_s26 + $0x50] sm:$0xff]  ;;  %v1518_v19 = vpop.permute.xlu1 %1517  ;;  %v1663_v21 = vld [vmem:[%s3182_s26 + $0x58] sm:$0xff] }
 0x121   : > { %1761 = vmax.xlane.f32.xlu0 %v3220_v24 }
 0x122   : > { %v1626_v27 = vmul.f32 %v1493_v25, %v1227_v22  ;;  %v1230_v28 = vadd.f32 %v2542_v23, %v2430_v20 }
 0x123   : > { %v2431_v30 = vpop.f32.mrb[16].mxu0 }
 0x124   : > { %v1627_v32 = vmul.f32 %v1498_v29, %v1230_v28  ;;  %v2543_v33 = vpop.f32.mrb[16].mxu1  ;;  %v2432_v34 = vpop.f32.mrb[17].mxu0  ;;  %v1690_v36 = vadd.f32 %v1658_v26, %v1626_v27 }
 0x125   : > { %v2433_v37 = vadd.f32 %v2432_v34, %v2431_v30  ;;  %v2544_v38 = vpop.f32.mrb[17].mxu1  ;;  %v2434_v39 = vpop.f32.mrb[18].mxu0 }
 0x126   : > { %v2545_v41 = vadd.f32 %v2544_v38, %v2543_v33  ;;  %v2546_v42 = vpop.f32.mrb[18].mxu1  ;;  %v2435_v43 = vpop.f32.mrb[19].mxu0  ;;  %v3227_v44 = vsel %vm1718_vm0, %v1690_v36, -inf  ;;  %v1691_v45 = vadd.f32 %v1659_v31, %v1627_v32 }
 0x127   : > { %v2436_v46 = vadd.f32 %v2435_v43, %v2434_v39  ;;  %v2547_v47 = vpop.f32.mrb[19].mxu1  ;;  %1763 = vmax.xlane.f32.xlu1 %v3227_v44  ;;  %v1664_v43 = vld [vmem:[%s3182_s26 + $0x60] sm:$0xff] }
 0x128   : > { %v1235_v48 = vadd.f32 %v2545_v41, %v2433_v37  ;;  %v2548_v49 = vadd.f32 %v2547_v47, %v2546_v42  ;;  %v3232_v50 = vsel %vm1718_vm0, %v1691_v45, -inf  ;;  %v1523_v42 = vpop.permute.xlu0 %1522  ;;  %v1528_v47 = vpop.permute.xlu1 %1527 }
 0x129   : > { %1765 = vmax.xlane.f32.xlu0 %v3232_v50 }
 0x12a   : > { %v1628_v53 = vmul.f32 %v1503_v51, %v1235_v48  ;;  %v1238_v54 = vadd.f32 %v2548_v49, %v2436_v46  ;;  %v1665_v49 = vld [vmem:[%s3182_s26 + $0x68] sm:$0xff] }
 0x12b   : > { %v2437_v56 = vpop.f32.mrb[20].mxu0 }
 0x12c   : > { %v1629_v59 = vmul.f32 %v1508_v55, %v1238_v54  ;;  %v2549_v60 = vpop.f32.mrb[20].mxu1  ;;  %v2438_v61 = vpop.f32.mrb[21].mxu0  ;;  %v1692_v62 = vadd.f32 %v1660_v52, %v1628_v53 }
 0x12d   : > { %v2439_v63 = vadd.f32 %v2438_v61, %v2437_v56  ;;  %v2550_v0 = vpop.f32.mrb[21].mxu1  ;;  %v2440_v1 = vpop.f32.mrb[22].mxu0 }
 0x12e   : > { %v2551_v2 = vadd.f32 %v2550_v0, %v2549_v60  ;;  %v2552_v4 = vpop.f32.mrb[22].mxu1  ;;  %v2441_v5 = vpop.f32.mrb[23].mxu0  ;;  %v3239_v6 = vsel %vm1718_vm0, %v1692_v62, -inf  ;;  %v1693_v7 = vadd.f32 %v1661_v58, %v1629_v59 }
 0x12f   : > { %v2442_v8 = vadd.f32 %v2441_v5, %v2440_v1  ;;  %v2553_v9 = vpop.f32.mrb[23].mxu1  ;;  %1767 = vmax.xlane.f32.xlu1 %v3239_v6 }
 0x130   : > { %v1243_v10 = vadd.f32 %v2551_v2, %v2439_v63  ;;  %v2554_v11 = vadd.f32 %v2553_v9, %v2552_v4  ;;  %v3244_v12 = vsel %vm1718_vm0, %v1693_v7, -inf  ;;  %v1533_v7 = vpop.permute.xlu0 %1532 }
 0x131   : > { %1769 = vmax.xlane.f32.xlu0 %v3244_v12 }
 0x132   : > { %v1630_v16 = vmul.f32 %v1513_v13, %v1243_v10  ;;  %v1246_v17 = vadd.f32 %v2554_v11, %v2442_v8  ;;  %v1666_v8 = vld [vmem:[%s3182_s26 + $0x70] sm:$0xff]  ;;  %v1538_v11 = vpop.permute.xlu1 %1537 }
 0x133   : > { %v2443_v20 = vpop.f32.mrb[24].mxu0 }
 0x134   : > { %v1631_v22 = vmul.f32 %v1518_v19, %v1246_v17  ;;  %v2555_v23 = vpop.f32.mrb[24].mxu1  ;;  %v2444_v25 = vpop.f32.mrb[25].mxu0  ;;  %v1694_v26 = vadd.f32 %v1662_v15, %v1630_v16  ;;  %v1667_v15 = vld [vmem:[%s3182_s26 + $0x78] sm:$0xff] }
 0x135   : > { %v2445_v27 = vadd.f32 %v2444_v25, %v2443_v20  ;;  %v2556_v28 = vpop.f32.mrb[25].mxu1  ;;  %v2446_v29 = vpop.f32.mrb[26].mxu0 }
 0x136   : > { %v2557_v30 = vadd.f32 %v2556_v28, %v2555_v23  ;;  %v2558_v31 = vpop.f32.mrb[26].mxu1  ;;  %v2447_v32 = vpop.f32.mrb[27].mxu0  ;;  %v3251_v33 = vsel %vm1718_vm0, %v1694_v26, -inf  ;;  %v1695_v34 = vadd.f32 %v1663_v21, %v1631_v22 }
 0x137   : > { %v2448_v36 = vadd.f32 %v2447_v32, %v2446_v29  ;;  %v2559_v37 = vpop.f32.mrb[27].mxu1  ;;  %1771 = vmax.xlane.f32.xlu1 %v3251_v33 }
 0x138   : > { %v1251_v38 = vadd.f32 %v2557_v30, %v2445_v27  ;;  %v2560_v39 = vadd.f32 %v2559_v37, %v2558_v31  ;;  %v3256_v41 = vsel %vm1718_vm0, %v1695_v34, -inf  ;;  %v1543_v37 = vpop.permute.xlu0 %1542 }
 0x139   : > { %1773 = vmax.xlane.f32.xlu0 %v3256_v41 }
 0x13a   : > { %v1632_v45 = vmul.f32 %v1523_v42, %v1251_v38  ;;  %v1254_v46 = vadd.f32 %v2560_v39, %v2448_v36  ;;  %v1668_v38 = vld [vmem:[%s3182_s26 + $0x80] sm:$0xff] }
 0x13b   : > { %v2449_v48 = vpop.f32.mrb[28].mxu0 }
 0x13c   : > { %v1633_v51 = vmul.f32 %v1528_v47, %v1254_v46  ;;  %v2561_v52 = vpop.f32.mrb[28].mxu1  ;;  %v2450_v53 = vpop.f32.mrb[29].mxu0  ;;  %v1696_v54 = vadd.f32 %v1664_v43, %v1632_v45  ;;  %v1669_v46 = vld [vmem:[%s3182_s26 + $0x88] sm:$0xff] }
 0x13d   : > { %v2451_v55 = vadd.f32 %v2450_v53, %v2449_v48  ;;  %v2562_v56 = vpop.f32.mrb[29].mxu1  ;;  %v2452_v58 = vpop.f32.mrb[30].mxu0 }
 0x13e   : > { %v2563_v59 = vadd.f32 %v2562_v56, %v2561_v52  ;;  %v2564_v60 = vpop.f32.mrb[30].mxu1  ;;  %v2453_v61 = vpop.f32.mrb[31].mxu0  ;;  %v3263_v62 = vsel %vm1718_vm0, %v1696_v54, -inf  ;;  %v1697_v63 = vadd.f32 %v1665_v49, %v1633_v51 }
 0x13f   : > { %v2454_v0 = vadd.f32 %v2453_v61, %v2452_v58  ;;  %v2565_v1 = vpop.f32.mrb[31].mxu1  ;;  %1775 = vmax.xlane.f32.xlu1 %v3263_v62  ;;  %v1548_v43 = vpop.permute.xlu1 %1547 }
 0x140   : > { %v1259_v2 = vadd.f32 %v2563_v59, %v2451_v55  ;;  %v2566_v4 = vadd.f32 %v2565_v1, %v2564_v60  ;;  %v3268_v5 = vsel %vm1718_vm0, %v1697_v63, -inf }
 0x141   : > { %1777 = vmax.xlane.f32.xlu0 %v3268_v5 }
 0x142   : > { %v1634_v9 = vmul.f32 %v1533_v7, %v1259_v2  ;;  %v1262_v10 = vadd.f32 %v2566_v4, %v2454_v0  ;;  %v1553_v4 = vpop.permute.xlu0 %1552  ;;  %v1670_v7 = vld [vmem:[%s3182_s26 + $0x90] sm:$0xff] }
 0x143   : > { %v2455_v13 = vpop.f32.mrb[32].mxu0 }
 0x144   : > { %v1635_v16 = vmul.f32 %v1538_v11, %v1262_v10  ;;  %v2567_v17 = vpop.f32.mrb[32].mxu1  ;;  %v2456_v19 = vpop.f32.mrb[33].mxu0  ;;  %v1698_v20 = vadd.f32 %v1666_v8, %v1634_v9 }
 0x145   : > { %v2457_v21 = vadd.f32 %v2456_v19, %v2455_v13  ;;  %v2568_v22 = vpop.f32.mrb[33].mxu1  ;;  %v2458_v23 = vpop.f32.mrb[34].mxu0  ;;  %v1671_v13 = vld [vmem:[%s3182_s26 + $0x98] sm:$0xff] }
 0x146   : > { %v2569_v25 = vadd.f32 %v2568_v22, %v2567_v17  ;;  %v2570_v26 = vpop.f32.mrb[34].mxu1  ;;  %v2459_v27 = vpop.f32.mrb[35].mxu0  ;;  %v3275_v28 = vsel %vm1718_vm0, %v1698_v20, -inf  ;;  %v1699_v29 = vadd.f32 %v1667_v15, %v1635_v16 }
 0x147   : > { %v2460_v30 = vadd.f32 %v2459_v27, %v2458_v23  ;;  %v2571_v31 = vpop.f32.mrb[35].mxu1  ;;  %1779 = vmax.xlane.f32.xlu1 %v3275_v28  ;;  %v1558_v10 = vpop.permute.xlu1 %1557 }
 0x148   : > { %v1267_v32 = vadd.f32 %v2569_v25, %v2457_v21  ;;  %v2572_v34 = vadd.f32 %v2571_v31, %v2570_v26  ;;  %v3280_v36 = vsel %vm1718_vm0, %v1699_v29, -inf }
 0x149   : > { %1781 = vmax.xlane.f32.xlu0 %v3280_v36 }
 0x14a   : > { %v1636_v39 = vmul.f32 %v1543_v37, %v1267_v32  ;;  %v1270_v42 = vadd.f32 %v2572_v34, %v2460_v30 }
 0x14b   : > { %v2461_v45 = vpop.f32.mrb[36].mxu0 }
 0x14c   : > { %v1637_v47 = vmul.f32 %v1548_v43, %v1270_v42  ;;  %v2573_v48 = vpop.f32.mrb[36].mxu1  ;;  %v2462_v49 = vpop.f32.mrb[37].mxu0  ;;  %v1700_v51 = vadd.f32 %v1668_v38, %v1636_v39  ;;  %v1672_v39 = vld [vmem:[%s3182_s26 + $0xa0] sm:$0xff] }
 0x14d   : > { %v2463_v52 = vadd.f32 %v2462_v49, %v2461_v45  ;;  %v2574_v53 = vpop.f32.mrb[37].mxu1  ;;  %v2464_v54 = vpop.f32.mrb[38].mxu0 }
 0x14e   : > { %v2575_v55 = vadd.f32 %v2574_v53, %v2573_v48  ;;  %v2576_v56 = vpop.f32.mrb[38].mxu1  ;;  %v2465_v58 = vpop.f32.mrb[39].mxu0  ;;  %v3287_v59 = vsel %vm1718_vm0, %v1700_v51, -inf  ;;  %v1701_v60 = vadd.f32 %v1669_v46, %v1637_v47  ;;  %v1673_v47 = vld [vmem:[%s3182_s26 + $0xa8] sm:$0xff] }
 0x14f   : > { %v2466_v61 = vadd.f32 %v2465_v58, %v2464_v54  ;;  %v2577_v63 = vpop.f32.mrb[39].mxu1  ;;  %1783 = vmax.xlane.f32.xlu1 %v3287_v59  ;;  %v1563_v38 = vpop.permute.xlu0 %1562 }
 0x150   : > { %v1275_v0 = vadd.f32 %v2575_v55, %v2463_v52  ;;  %v2578_v1 = vadd.f32 %v2577_v63, %v2576_v56  ;;  %v3292_v2 = vsel %vm1718_vm0, %v1701_v60, -inf  ;;  %v1568_v45 = vpop.permute.xlu1 %1567 }
 0x151   : > { %1785 = vmax.xlane.f32.xlu0 %v3292_v2 }
 0x152   : > { %v1638_v8 = vmul.f32 %v1553_v4, %v1275_v0  ;;  %v1278_v9 = vadd.f32 %v2578_v1, %v2466_v61 }
 0x153   : > { %v2467_v11 = vpop.f32.mrb[40].mxu0 }
 0x154   : > { %v1639_v15 = vmul.f32 %v1558_v10, %v1278_v9  ;;  %v2579_v16 = vpop.f32.mrb[40].mxu1  ;;  %v2468_v17 = vpop.f32.mrb[41].mxu0  ;;  %v1702_v19 = vadd.f32 %v1670_v7, %v1638_v8  ;;  %v1674_v10 = vld [vmem:[%s3182_s26 + $0xb0] sm:$0xff] }
 0x155   : > { %v2469_v20 = vadd.f32 %v2468_v17, %v2467_v11  ;;  %v2580_v21 = vpop.f32.mrb[41].mxu1  ;;  %v2470_v22 = vpop.f32.mrb[42].mxu0  ;;  %v1675_v17 = vld [vmem:[%s3182_s26 + $0xb8] sm:$0xff] }
 0x156   : > { %v2581_v23 = vadd.f32 %v2580_v21, %v2579_v16  ;;  %v2582_v25 = vpop.f32.mrb[42].mxu1  ;;  %v2471_v26 = vpop.f32.mrb[43].mxu0  ;;  %v3299_v27 = vsel %vm1718_vm0, %v1702_v19, -inf  ;;  %v1703_v29 = vadd.f32 %v1671_v13, %v1639_v15 }
 0x157   : > { %v2472_v30 = vadd.f32 %v2471_v26, %v2470_v22  ;;  %v2583_v31 = vpop.f32.mrb[43].mxu1  ;;  %1787 = vmax.xlane.f32.xlu1 %v3299_v27  ;;  %v1573_v9 = vpop.permute.xlu0 %1572 }
 0x158   : > { %v1283_v32 = vadd.f32 %v2581_v23, %v2469_v20  ;;  %v2584_v34 = vadd.f32 %v2583_v31, %v2582_v25  ;;  %v3304_v37 = vsel %vm1718_vm0, %v1703_v29, -inf  ;;  %v1578_v15 = vpop.permute.xlu1 %1577 }
 0x159   : > { %1789 = vmax.xlane.f32.xlu0 %v3304_v37 }
 0x15a   : > { %v1640_v42 = vmul.f32 %v1563_v38, %v1283_v32  ;;  %v1286_v43 = vadd.f32 %v2584_v34, %v2472_v30 }
 0x15b   : > { %v2473_v46 = vpop.f32.mrb[44].mxu0 }
 0x15c   : > { %v1641_v48 = vmul.f32 %v1568_v45, %v1286_v43  ;;  %v2585_v49 = vpop.f32.mrb[44].mxu1  ;;  %v2474_v51 = vpop.f32.mrb[45].mxu0  ;;  %v1704_v52 = vadd.f32 %v1672_v39, %v1640_v42 }
 0x15d   : > { %v2475_v53 = vadd.f32 %v2474_v51, %v2473_v46  ;;  %v2586_v54 = vpop.f32.mrb[45].mxu1  ;;  %v2476_v55 = vpop.f32.mrb[46].mxu0 }
 0x15e   : > { %v2587_v56 = vadd.f32 %v2586_v54, %v2585_v49  ;;  %v2588_v58 = vpop.f32.mrb[46].mxu1  ;;  %v2477_v60 = vpop.f32.mrb[47].mxu0  ;;  %v3311_v61 = vsel %vm1718_vm0, %v1704_v52, -inf  ;;  %v1705_v63 = vadd.f32 %v1673_v47, %v1641_v48  ;;  %v1676_v47 = vld [vmem:[%s3182_s26 + $0xc0] sm:$0xff] }
 0x15f   : > { %3700 = vst [vmem:[#allocation3_spill] sm:$0xff] %v3311_v61  ;;  %v2478_v0 = vadd.f32 %v2477_v60, %v2476_v55  ;;  %v2589_v1 = vpop.f32.mrb[47].mxu1  ;;  %1791 = vmax.xlane.f32.xlu1 %v3311_v61  ;;  %v1583_v46 = vpop.permute.xlu0 %1582 }
 0x160   : > { %v1291_v4 = vadd.f32 %v2587_v56, %v2475_v53  ;;  %v2590_v7 = vadd.f32 %v2589_v1, %v2588_v58  ;;  %v3316_v8 = vsel %vm1718_vm0, %v1705_v63, -inf  ;;  %v1588_v51 = vpop.permute.xlu1 %1587  ;;  %v1677_v53 = vld [vmem:[%s3182_s26 + $0xc8] sm:$0xff] }
 0x161   : > { %1793 = vmax.xlane.f32.xlu0 %v3316_v8 }
 0x162   : > { %v1642_v11 = vmul.f32 %v1573_v9, %v1291_v4  ;;  %v1294_v13 = vadd.f32 %v2590_v7, %v2478_v0 }
 0x163   : > { %v2479_v16 = vpop.f32.mrb[48].mxu0 }
 0x164   : > { %v1643_v19 = vmul.f32 %v1578_v15, %v1294_v13  ;;  %v2591_v20 = vpop.f32.mrb[48].mxu1  ;;  %v2480_v21 = vpop.f32.mrb[49].mxu0  ;;  %v1706_v22 = vadd.f32 %v1674_v10, %v1642_v11 }
 0x165   : > { %v2481_v23 = vadd.f32 %v2480_v21, %v2479_v16  ;;  %v2592_v25 = vpop.f32.mrb[49].mxu1  ;;  %v2482_v26 = vpop.f32.mrb[50].mxu0 }
 0x166   : > { %v2593_v29 = vadd.f32 %v2592_v25, %v2591_v20  ;;  %v2594_v30 = vpop.f32.mrb[50].mxu1  ;;  %v2483_v31 = vpop.f32.mrb[51].mxu0  ;;  %v3323_v32 = vsel %vm1718_vm0, %v1706_v22, -inf  ;;  %v1707_v34 = vadd.f32 %v1675_v17, %v1643_v19  ;;  %v1678_v20 = vld [vmem:[%s3182_s26 + $0xd0] sm:$0xff] }
 0x167   : > { %3701 = vst [vmem:[#allocation4_spill] sm:$0xff] %v3323_v32  ;;  %v2484_v38 = vadd.f32 %v2483_v31, %v2482_v26  ;;  %v2595_v39 = vpop.f32.mrb[51].mxu1  ;;  %1795 = vmax.xlane.f32.xlu1 %v3323_v32  ;;  %v1593_v19 = vpop.permute.xlu0 %1592  ;;  %v1679_v26 = vld [vmem:[%s3182_s26 + $0xd8] sm:$0xff] }
 0x168   : > { %v1299_v42 = vadd.f32 %v2593_v29, %v2481_v23  ;;  %v2596_v43 = vadd.f32 %v2595_v39, %v2594_v30  ;;  %v3328_v45 = vsel %vm1718_vm0, %v1707_v34, -inf  ;;  %v1598_v23 = vpop.permute.xlu1 %1597 }
 0x169   : > { %1797 = vmax.xlane.f32.xlu0 %v3328_v45 }
 0x16a   : > { %v1644_v48 = vmul.f32 %v1583_v46, %v1299_v42  ;;  %v1302_v49 = vadd.f32 %v2596_v43, %v2484_v38 }
 0x16b   : > { %v2485_v52 = vpop.f32.mrb[52].mxu0 }
 0x16c   : > { %v1645_v54 = vmul.f32 %v1588_v51, %v1302_v49  ;;  %v2597_v55 = vpop.f32.mrb[52].mxu1  ;;  %v2486_v56 = vpop.f32.mrb[53].mxu0  ;;  %v1708_v58 = vadd.f32 %v1676_v47, %v1644_v48 }
 0x16d   : > { %v2487_v60 = vadd.f32 %v2486_v56, %v2485_v52  ;;  %v2598_v63 = vpop.f32.mrb[53].mxu1  ;;  %v2488_v0 = vpop.f32.mrb[54].mxu0 }
 0x16e   : > { %v2599_v1 = vadd.f32 %v2598_v63, %v2597_v55  ;;  %v2600_v4 = vpop.f32.mrb[54].mxu1  ;;  %v2489_v7 = vpop.f32.mrb[55].mxu0  ;;  %v3335_v9 = vsel %vm1718_vm0, %v1708_v58, -inf  ;;  %v1709_v10 = vadd.f32 %v1677_v53, %v1645_v54  ;;  %v1680_v58 = vld [vmem:[%s3182_s26 + $0xe0] sm:$0xff] }
 0x16f   : > { %3702 = vst [vmem:[#allocation5_spill] sm:$0xff] %v3335_v9  ;;  %v2490_v11 = vadd.f32 %v2489_v7, %v2488_v0  ;;  %v2601_v13 = vpop.f32.mrb[55].mxu1  ;;  %1799 = vmax.xlane.f32.xlu1 %v3335_v9  ;;  %v1603_v56 = vpop.permute.xlu0 %1602 }
 0x170   : > { %v1307_v15 = vadd.f32 %v2599_v1, %v2487_v60  ;;  %v2602_v16 = vadd.f32 %v2601_v13, %v2600_v4  ;;  %v3340_v17 = vsel %vm1718_vm0, %v1709_v10, -inf  ;;  %v1608_v0 = vpop.permute.xlu1 %1607  ;;  %v1681_v4 = vld [vmem:[%s3182_s26 + $0xe8] sm:$0xff] }
 0x171   : > { %1801 = vmax.xlane.f32.xlu0 %v3340_v17 }
 0x172   : > { %v1646_v21 = vmul.f32 %v1593_v19, %v1307_v15  ;;  %v1310_v22 = vadd.f32 %v2602_v16, %v2490_v11 }
 0x173   : > { %v2491_v25 = vpop.f32.mrb[56].mxu0 }
 0x174   : > { %v1647_v29 = vmul.f32 %v1598_v23, %v1310_v22  ;;  %v2603_v30 = vpop.f32.mrb[56].mxu1  ;;  %v2492_v31 = vpop.f32.mrb[57].mxu0  ;;  %v1710_v34 = vadd.f32 %v1678_v20, %v1646_v21 }
 0x175   : > { %v2493_v38 = vadd.f32 %v2492_v31, %v2491_v25  ;;  %v2604_v39 = vpop.f32.mrb[57].mxu1  ;;  %v2494_v42 = vpop.f32.mrb[58].mxu0 }
 0x176   : > { %v2605_v43 = vadd.f32 %v2604_v39, %v2603_v30  ;;  %v2606_v46 = vpop.f32.mrb[58].mxu1  ;;  %v2495_v47 = vpop.f32.mrb[59].mxu0  ;;  %v3347_v48 = vsel %vm1718_vm0, %v1710_v34, -inf  ;;  %v1711_v49 = vadd.f32 %v1679_v26, %v1647_v29  ;;  %v1682_v39 = vld [vmem:[%s3182_s26 + $0xf0] sm:$0xff] }
 0x177   : > { %3703 = vst [vmem:[#allocation6_spill] sm:$0xff] %v3347_v48  ;;  %v2496_v51 = vadd.f32 %v2495_v47, %v2494_v42  ;;  %v2607_v52 = vpop.f32.mrb[59].mxu1  ;;  %1803 = vmax.xlane.f32.xlu1 %v3347_v48  ;;  %v1683_v47 = vld [vmem:[%s3182_s26 + $0xf8] sm:$0xff] }
 0x178   : > { %v1315_v53 = vadd.f32 %v2605_v43, %v2493_v38  ;;  %v2608_v54 = vadd.f32 %v2607_v52, %v2606_v46  ;;  %v3352_v55 = vsel %vm1718_vm0, %v1711_v49, -inf  ;;  %v1613_v38 = vpop.permute.xlu0 %1612  ;;  %v1618_v46 = vpop.permute.xlu1 %1617 }
 0x179   : > { %1805 = vmax.xlane.f32.xlu0 %v3352_v55 }
 0x17a   : > { %v1648_v60 = vmul.f32 %v1603_v56, %v1315_v53  ;;  %v1318_v63 = vadd.f32 %v2608_v54, %v2496_v51 }
 0x17b   : > { %v2497_v1 = vpop.f32.mrb[60].mxu0 }
 0x17c   : > { %v1649_v7 = vmul.f32 %v1608_v0, %v1318_v63  ;;  %v2609_v10 = vpop.f32.mrb[60].mxu1  ;;  %v2498_v11 = vpop.f32.mrb[61].mxu0  ;;  %v1712_v13 = vadd.f32 %v1680_v58, %v1648_v60 }
 0x17d   : > { %v2499_v15 = vadd.f32 %v2498_v11, %v2497_v1  ;;  %v2610_v16 = vpop.f32.mrb[61].mxu1  ;;  %v2500_v19 = vpop.f32.mrb[62].mxu0 }
 0x17e   : > { %v2611_v20 = vadd.f32 %v2610_v16, %v2609_v10  ;;  %v2612_v21 = vpop.f32.mrb[62].mxu1  ;;  %v2501_v22 = vpop.f32.mrb[63].mxu0  ;;  %v3359_v23 = vsel %vm1718_vm0, %v1712_v13, -inf  ;;  %v1713_v25 = vadd.f32 %v1681_v4, %v1649_v7 }
 0x17f   : > { %3704 = vst [vmem:[#allocation7_spill] sm:$0xff] %v3359_v23  ;;  %v2502_v26 = vadd.f32 %v2501_v22, %v2500_v19  ;;  %v2613_v29 = vpop.f32.mrb[63].mxu1  ;;  %1807 = vmax.xlane.f32.xlu1 %v3359_v23 }
 0x180   : > { %v1323_v30 = vadd.f32 %v2611_v20, %v2499_v15  ;;  %v2614_v31 = vadd.f32 %v2613_v29, %v2612_v21  ;;  %v3364_v34 = vsel %vm1718_vm0, %v1713_v25, -inf }
 0x181   : > { %3705 = vst [vmem:[#allocation8_spill] sm:$0xff] %v3364_v34  ;;  %1809 = vmax.xlane.f32.xlu0 %v3364_v34 }
 0x182   : > { %v1650_v42 = vmul.f32 %v1613_v38, %v1323_v30  ;;  %v1326_v43 = vadd.f32 %v2614_v31, %v2502_v26 }
 0x184   : > { %v1651_v49 = vmul.f32 %v1618_v46, %v1326_v43  ;;  %v1714_v51 = vadd.f32 %v1682_v39, %v1650_v42 }
 0x186   : > { %v3371_v52 = vsel %vm1718_vm0, %v1714_v51, -inf  ;;  %v1715_v53 = vadd.f32 %v1683_v47, %v1651_v49 }
 0x187   : > { %3706 = vst [vmem:[#allocation9_spill] sm:$0xff] %v3371_v52  ;;  %1811 = vmax.xlane.f32.xlu1 %v3371_v52 }
 0x188   : > { %v3376_v54 = vsel %vm1718_vm0, %v1715_v53, -inf }
 0x189   : > { %3707 = vst [vmem:[#allocation10_spill] sm:$0xff] %v3376_v54  ;;  %1813 = vmax.xlane.f32.xlu0 %v3376_v54 }
 0x19c   : > { %v3379_v56 = vpop.xlane.xlu0 %1751 }
 0x19d   : > { %v1815_v58 = vsub.f32 %v3191_v35, %v3379_v56 }
 0x19e   : > { %v3383_v60 = vpop.xlane.xlu1 %1753 }
 0x19f   : > { %v1847_v63 = vmul.f32 1.442695, %v1815_v58  ;;  %v1816_v0 = vsub.f32 %v3196_v40, %v3383_v60 }
 0x1a1   : > { %2770 = vpow2.f32 %v1847_v63  ;;  %v1849_v1 = vmul.f32 1.442695, %v1816_v0 }
 0x1a3   : > { %2772 = vpow2.f32 %v1849_v1 }
 0x1a4   : > { %v3387_v4 = vpop.xlane.xlu0 %1755 }
 0x1a5   : > { %v1817_v7 = vsub.f32 %v3203_v57, %v3387_v4 }
 0x1a7   : > { %v1851_v10 = vmul.f32 1.442695, %v1817_v7 }
 0x1a8   : > { %v3391_v11 = vpop.xlane.xlu0 %1757 }
 0x1a9   : > { %2774 = vpow2.f32 %v1851_v10  ;;  %v1818_v13 = vsub.f32 %v3209_v3, %v3391_v11 }
 0x1ab   : > { %v2771_v15 = vpop.eup %2770  ;;  %v1853_v16 = vmul.f32 1.442695, %v1818_v13 }
 0x1ac   : > { %v3395_v19 = vpop.xlane.xlu1 %1759  ;;  %v1911_v20 = vsel %vm1718_vm0, %v2771_v15, 0.0 }
 0x1ad   : > { %v2773_v21 = vpop.eup %2772  ;;  %2776 = vpow2.f32 %v1853_v16  ;;  %v1819_v22 = vsub.f32 %v3215_v18, %v3395_v19  ;;  %1943 = vadd.xlane.f32.xlu1 %v1911_v20 }
 0x1ae   : > { %v3401_v25 = vpop.xlane.xlu0 %1761  ;;  %v1912_v26 = vsel %vm1718_vm0, %v2773_v21, 0.0 }
 0x1af   : > { %v1855_v29 = vmul.f32 1.442695, %v1819_v22  ;;  %v1820_v30 = vsub.f32 %v3220_v24, %v3401_v25  ;;  %1945 = vadd.xlane.f32.xlu0 %v1912_v26 }
 0x1b1   : > { %2778 = vpow2.f32 %v1855_v29  ;;  %v1857_v31 = vmul.f32 1.442695, %v1820_v30 }
 0x1b3   : > { %v2775_v38 = vpop.eup %2774  ;;  %2780 = vpow2.f32 %v1857_v31 }
 0x1b4   : > { %v3407_v39 = vpop.xlane.xlu1 %1763  ;;  %v1913_v42 = vsel %vm1718_vm0, %v2775_v38, 0.0 }
 0x1b5   : > { %v1821_v43 = vsub.f32 %v3227_v44, %v3407_v39  ;;  %1947 = vadd.xlane.f32.xlu1 %v1913_v42 }
 0x1b6   : > { %v3413_v46 = vpop.xlane.xlu0 %1765 }
 0x1b7   : > { %v2777_v47 = vpop.eup %2776  ;;  %v1859_v49 = vmul.f32 1.442695, %v1821_v43  ;;  %v1822_v51 = vsub.f32 %v3232_v50, %v3413_v46 }
 0x1b8   : > { %v1914_v53 = vsel %vm1718_vm0, %v2777_v47, 0.0 }
 0x1b9   : > { %2782 = vpow2.f32 %v1859_v49  ;;  %v1861_v58 = vmul.f32 1.442695, %v1822_v51  ;;  %1949 = vadd.xlane.f32.xlu0 %v1914_v53 }
 0x1bb   : > { %v2779_v63 = vpop.eup %2778  ;;  %2784 = vpow2.f32 %v1861_v58 }
 0x1bc   : > { %v3419_v0 = vpop.xlane.xlu1 %1767  ;;  %v1915_v1 = vsel %vm1718_vm0, %v2779_v63, 0.0 }
 0x1bd   : > { %v2781_v7 = vpop.eup %2780  ;;  %v1823_v10 = vsub.f32 %v3239_v6, %v3419_v0  ;;  %1951 = vadd.xlane.f32.xlu1 %v1915_v1 }
 0x1be   : > { %v3425_v13 = vpop.xlane.xlu0 %1769  ;;  %v1916_v15 = vsel %vm1718_vm0, %v2781_v7, 0.0 }
 0x1bf   : > { %v1863_v16 = vmul.f32 1.442695, %v1823_v10  ;;  %v1824_v20 = vsub.f32 %v3244_v12, %v3425_v13  ;;  %1953 = vadd.xlane.f32.xlu0 %v1916_v15 }
 0x1c1   : > { %2786 = vpow2.f32 %v1863_v16  ;;  %v1865_v21 = vmul.f32 1.442695, %v1824_v20 }
 0x1c3   : > { %v2783_v22 = vpop.eup %2782  ;;  %2788 = vpow2.f32 %v1865_v21 }
 0x1c4   : > { %v3431_v26 = vpop.xlane.xlu1 %1771  ;;  %v1917_v29 = vsel %vm1718_vm0, %v2783_v22, 0.0 }
 0x1c5   : > { %v2785_v30 = vpop.eup %2784  ;;  %v1825_v31 = vsub.f32 %v3251_v33, %v3431_v26  ;;  %1955 = vadd.xlane.f32.xlu1 %v1917_v29 }
 0x1c6   : > { %v3437_v38 = vpop.xlane.xlu0 %1773  ;;  %v1918_v42 = vsel %vm1718_vm0, %v2785_v30, 0.0 }
 0x1c7   : > { %v1867_v43 = vmul.f32 1.442695, %v1825_v31  ;;  %v1826_v47 = vsub.f32 %v3256_v41, %v3437_v38  ;;  %1957 = vadd.xlane.f32.xlu0 %v1918_v42 }
 0x1c9   : > { %2790 = vpow2.f32 %v1867_v43  ;;  %v1869_v49 = vmul.f32 1.442695, %v1826_v47 }
 0x1cb   : > { %v2787_v51 = vpop.eup %2786  ;;  %2792 = vpow2.f32 %v1869_v49 }
 0x1cc   : > { %v3443_v53 = vpop.xlane.xlu1 %1775  ;;  %v1919_v58 = vsel %vm1718_vm0, %v2787_v51, 0.0 }
 0x1cd   : > { %v2789_v63 = vpop.eup %2788  ;;  %v1827_v1 = vsub.f32 %v3263_v62, %v3443_v53  ;;  %1959 = vadd.xlane.f32.xlu1 %v1919_v58 }
 0x1ce   : > { %v3449_v7 = vpop.xlane.xlu0 %1777  ;;  %v1920_v10 = vsel %vm1718_vm0, %v2789_v63, 0.0 }
 0x1cf   : > { %v1871_v15 = vmul.f32 1.442695, %v1827_v1  ;;  %v1828_v16 = vsub.f32 %v3268_v5, %v3449_v7  ;;  %1961 = vadd.xlane.f32.xlu0 %v1920_v10 }
 0x1d1   : > { %2794 = vpow2.f32 %v1871_v15  ;;  %v1873_v20 = vmul.f32 1.442695, %v1828_v16 }
 0x1d3   : > { %v2791_v21 = vpop.eup %2790  ;;  %2796 = vpow2.f32 %v1873_v20 }
 0x1d4   : > { %v3455_v22 = vpop.xlane.xlu1 %1779  ;;  %v1921_v29 = vsel %vm1718_vm0, %v2791_v21, 0.0 }
 0x1d5   : > { %v2793_v30 = vpop.eup %2792  ;;  %v1829_v31 = vsub.f32 %v3275_v28, %v3455_v22  ;;  %1963 = vadd.xlane.f32.xlu1 %v1921_v29 }
 0x1d6   : > { %v3461_v42 = vpop.xlane.xlu0 %1781  ;;  %v1922_v43 = vsel %vm1718_vm0, %v2793_v30, 0.0 }
 0x1d7   : > { %v1875_v47 = vmul.f32 1.442695, %v1829_v31  ;;  %v1830_v49 = vsub.f32 %v3280_v36, %v3461_v42  ;;  %1965 = vadd.xlane.f32.xlu0 %v1922_v43 }
 0x1d9   : > { %2798 = vpow2.f32 %v1875_v47  ;;  %v1877_v51 = vmul.f32 1.442695, %v1830_v49 }
 0x1db   : > { %v2795_v58 = vpop.eup %2794  ;;  %2800 = vpow2.f32 %v1877_v51 }
 0x1dc   : > { %v3467_v63 = vpop.xlane.xlu1 %1783  ;;  %v1923_v1 = vsel %vm1718_vm0, %v2795_v58, 0.0 }
 0x1dd   : > { %v2797_v10 = vpop.eup %2796  ;;  %v1831_v15 = vsub.f32 %v3287_v59, %v3467_v63  ;;  %1967 = vadd.xlane.f32.xlu1 %v1923_v1 }
 0x1de   : > { %v3473_v16 = vpop.xlane.xlu0 %1785  ;;  %v1924_v20 = vsel %vm1718_vm0, %v2797_v10, 0.0 }
 0x1df   : > { %v1879_v21 = vmul.f32 1.442695, %v1831_v15  ;;  %v1832_v29 = vsub.f32 %v3292_v2, %v3473_v16  ;;  %1969 = vadd.xlane.f32.xlu0 %v1924_v20 }
 0x1e1   : > { %2802 = vpow2.f32 %v1879_v21  ;;  %v1881_v30 = vmul.f32 1.442695, %v1832_v29 }
 0x1e3   : > { %v2799_v31 = vpop.eup %2798  ;;  %2804 = vpow2.f32 %v1881_v30 }
 0x1e4   : > { %v3479_v43 = vpop.xlane.xlu1 %1787  ;;  %v1925_v47 = vsel %vm1718_vm0, %v2799_v31, 0.0 }
 0x1e5   : > { %v2801_v49 = vpop.eup %2800  ;;  %v1833_v51 = vsub.f32 %v3299_v27, %v3479_v43  ;;  %1971 = vadd.xlane.f32.xlu1 %v1925_v47 }
 0x1e6   : > { %v3485_v58 = vpop.xlane.xlu0 %1789  ;;  %v1926_v1 = vsel %vm1718_vm0, %v2801_v49, 0.0 }
 0x1e7   : > { %v1883_v10 = vmul.f32 1.442695, %v1833_v51  ;;  %v1834_v15 = vsub.f32 %v3304_v37, %v3485_v58  ;;  %1973 = vadd.xlane.f32.xlu0 %v1926_v1 }
 0x1e9   : > { %2806 = vpow2.f32 %v1883_v10  ;;  %v1885_v20 = vmul.f32 1.442695, %v1834_v15 }
 0x1eb   : > { %v2803_v21 = vpop.eup %2802  ;;  %2808 = vpow2.f32 %v1885_v20 }
 0x1ec   : > { %v3491_v29 = vpop.xlane.xlu1 %1791  ;;  %v1927_v30 = vsel %vm1718_vm0, %v2803_v21, 0.0 }
 0x1ed   : > { %3708 = vst [vmem:[#allocation11_spill] sm:$0xff] %v3491_v29  ;;  %v2805_v31 = vpop.eup %2804  ;;  %v1835_v47 = vsub.f32 %v3311_v61, %v3491_v29  ;;  %1975 = vadd.xlane.f32.xlu1 %v1927_v30 }
 0x1ee   : > { %v3497_v49 = vpop.xlane.xlu0 %1793  ;;  %v1928_v51 = vsel %vm1718_vm0, %v2805_v31, 0.0 }
 0x1ef   : > { %v1887_v1 = vmul.f32 1.442695, %v1835_v47  ;;  %v1836_v10 = vsub.f32 %v3316_v8, %v3497_v49  ;;  %1977 = vadd.xlane.f32.xlu0 %v1928_v51 }
 0x1f1   : > { %2810 = vpow2.f32 %v1887_v1  ;;  %v1889_v15 = vmul.f32 1.442695, %v1836_v10 }
 0x1f3   : > { %v2807_v20 = vpop.eup %2806  ;;  %2812 = vpow2.f32 %v1889_v15 }
 0x1f4   : > { %v3503_v21 = vpop.xlane.xlu1 %1795  ;;  %v1929_v61 = vsel %vm1718_vm0, %v2807_v20, 0.0 }
 0x1f5   : > { %3709 = vst [vmem:[#allocation12_spill] sm:$0xff] %v3503_v21  ;;  %v2809_v30 = vpop.eup %2808  ;;  %v1837_v29 = vsub.f32 %v3323_v32, %v3503_v21  ;;  %1979 = vadd.xlane.f32.xlu1 %v1929_v61 }
 0x1f6   : > { %v3509_v31 = vpop.xlane.xlu0 %1797  ;;  %v1930_v47 = vsel %vm1718_vm0, %v2809_v30, 0.0 }
 0x1f7   : > { %v1891_v51 = vmul.f32 1.442695, %v1837_v29  ;;  %v1838_v1 = vsub.f32 %v3328_v45, %v3509_v31  ;;  %1981 = vadd.xlane.f32.xlu0 %v1930_v47 }
 0x1f9   : > { %2814 = vpow2.f32 %v1891_v51  ;;  %v1893_v10 = vmul.f32 1.442695, %v1838_v1 }
 0x1fb   : > { %v2811_v15 = vpop.eup %2810  ;;  %2816 = vpow2.f32 %v1893_v10 }
 0x1fc   : > { %v3515_v20 = vpop.xlane.xlu1 %1799  ;;  %v1931_v32 = vsel %vm1718_vm0, %v2811_v15, 0.0 }
 0x1fd   : > { %3710 = vst [vmem:[#allocation13_spill] sm:$0xff] %v3515_v20  ;;  %v2813_v61 = vpop.eup %2812  ;;  %v1839_v21 = vsub.f32 %v3335_v9, %v3515_v20  ;;  %1983 = vadd.xlane.f32.xlu1 %v1931_v32 }
 0x1fe   : > { %v3521_v30 = vpop.xlane.xlu0 %1801  ;;  %v1932_v29 = vsel %vm1718_vm0, %v2813_v61, 0.0 }
 0x1ff   : > { %v1895_v47 = vmul.f32 1.442695, %v1839_v21  ;;  %v1840_v51 = vsub.f32 %v3340_v17, %v3521_v30  ;;  %1985 = vadd.xlane.f32.xlu0 %v1932_v29 }
 0x201   : > { %2818 = vpow2.f32 %v1895_v47  ;;  %v1897_v1 = vmul.f32 1.442695, %v1840_v51 }
 0x203   : > { %v2815_v10 = vpop.eup %2814  ;;  %2820 = vpow2.f32 %v1897_v1 }
 0x204   : > { %v3527_v15 = vpop.xlane.xlu1 %1803  ;;  %v1933_v9 = vsel %vm1718_vm0, %v2815_v10, 0.0 }
 0x205   : > { %3711 = vst [vmem:[#allocation14_spill] sm:$0xff] %v3527_v15  ;;  %v2817_v32 = vpop.eup %2816  ;;  %v1841_v20 = vsub.f32 %v3347_v48, %v3527_v15  ;;  %1987 = vadd.xlane.f32.xlu1 %v1933_v9 }
 0x206   : > { %v3533_v61 = vpop.xlane.xlu0 %1805  ;;  %v1934_v21 = vsel %vm1718_vm0, %v2817_v32, 0.0 }
 0x207   : > { %v1899_v29 = vmul.f32 1.442695, %v1841_v20  ;;  %v1842_v47 = vsub.f32 %v3352_v55, %v3533_v61  ;;  %1989 = vadd.xlane.f32.xlu0 %v1934_v21 }
 0x209   : > { %2822 = vpow2.f32 %v1899_v29  ;;  %v1901_v51 = vmul.f32 1.442695, %v1842_v47 }
 0x20b   : > { %v2819_v1 = vpop.eup %2818  ;;  %2824 = vpow2.f32 %v1901_v51 }
 0x20c   : > { %v3539_v10 = vpop.xlane.xlu1 %1807  ;;  %v1935_v48 = vsel %vm1718_vm0, %v2819_v1, 0.0 }
 0x20d   : > { %3712 = vst [vmem:[#allocation15_spill] sm:$0xff] %v3539_v10  ;;  %v2821_v9 = vpop.eup %2820  ;;  %v1843_v15 = vsub.f32 %v3359_v23, %v3539_v10  ;;  %1991 = vadd.xlane.f32.xlu1 %v1935_v48 }
 0x20e   : > { %v3545_v32 = vpop.xlane.xlu0 %1809  ;;  %v1936_v20 = vsel %vm1718_vm0, %v2821_v9, 0.0 }
 0x20f   : > { %v1903_v21 = vmul.f32 1.442695, %v1843_v15  ;;  %v1844_v29 = vsub.f32 %v3364_v34, %v3545_v32  ;;  %1993 = vadd.xlane.f32.xlu0 %v1936_v20 }
 0x211   : > { %2826 = vpow2.f32 %v1903_v21  ;;  %v1905_v47 = vmul.f32 1.442695, %v1844_v29 }
 0x213   : > { %v2823_v51 = vpop.eup %2822  ;;  %2828 = vpow2.f32 %v1905_v47 }
 0x214   : > { %v3551_v1 = vpop.xlane.xlu1 %1811  ;;  %v1937_v23 = vsel %vm1718_vm0, %v2823_v51, 0.0 }
 0x215   : > { %v2825_v48 = vpop.eup %2824  ;;  %v1845_v10 = vsub.f32 %v3371_v52, %v3551_v1  ;;  %1995 = vadd.xlane.f32.xlu1 %v1937_v23 }
 0x216   : > { %v3557_v9 = vpop.xlane.xlu0 %1813  ;;  %v1938_v15 = vsel %vm1718_vm0, %v2825_v48, 0.0 }
 0x217   : > { %v1907_v20 = vmul.f32 1.442695, %v1845_v10  ;;  %v1846_v21 = vsub.f32 %v3376_v54, %v3557_v9  ;;  %1997 = vadd.xlane.f32.xlu0 %v1938_v15 }
 0x219   : > { %2830 = vpow2.f32 %v1907_v20  ;;  %v1909_v29 = vmul.f32 1.442695, %v1846_v21 }
 0x21b   : > { %v2827_v47 = vpop.eup %2826  ;;  %2832 = vpow2.f32 %v1909_v29 }
 0x21c   : > { %v1939_v51 = vsel %vm1718_vm0, %v2827_v47, 0.0 }
 0x21d   : > { %v2829_v34 = vpop.eup %2828  ;;  %1999 = vadd.xlane.f32.xlu1 %v1939_v51 }
 0x21e   : > { %v1940_v23 = vsel %vm1718_vm0, %v2829_v34, 0.0 }
 0x21f   : > { %2001 = vadd.xlane.f32.xlu0 %v1940_v23 }
 0x223   : > { %v2831_v52 = vpop.eup %2830 }
 0x224   : > { %v1941_v10 = vsel %vm1718_vm0, %v2831_v52, 0.0 }
 0x225   : > { %v2833_v48 = vpop.eup %2832  ;;  %2003 = vadd.xlane.f32.xlu1 %v1941_v10 }
 0x226   : > { %v1942_v15 = vsel %vm1718_vm0, %v2833_v48, 0.0 }
 0x227   : > { %2005 = vadd.xlane.f32.xlu0 %v1942_v15 }
 0x23a   : > { %v1944_v20 = vpop.xlane.xlu1 %1943 }
 0x23b   : > { %2834 = vlog2.f32 %v1944_v20 }
 0x23c   : > { %v1946_v21 = vpop.xlane.xlu0 %1945 }
 0x23d   : > { %2836 = vlog2.f32 %v1946_v21 }
 0x242   : > { %v1948_v29 = vpop.xlane.xlu1 %1947 }
 0x243   : > { %2838 = vlog2.f32 %v1948_v29 }
 0x245   : > { %v2835_v47 = vpop.eup %2834 }
 0x246   : > { %v2008_v34 = vmul.f32 0.6931472, %v2835_v47  ;;  %v1950_v51 = vpop.xlane.xlu0 %1949 }
 0x247   : > { %v2837_v23 = vpop.eup %2836  ;;  %2840 = vlog2.f32 %v1950_v51 }
 0x248   : > { %v2071_v52 = vadd.f32 %v2008_v34, %v3379_v56  ;;  %v2010_v54 = vmul.f32 0.6931472, %v2837_v23 }
 0x24a   : > { %v2103_v14 = vsub.f32 %v3191_v35, %v2071_v52  ;;  %v2072_v10 = vadd.f32 %v2010_v54, %v3383_v60  ;;  %v1952_v48 = vpop.xlane.xlu1 %1951 }
 0x24b   : > { %2842 = vlog2.f32 %v1952_v48 }
 0x24c   : > { %2135 = vst [vmem:[%s3576_s30] sm:$0xff] %v2103_v14  ;;  %v2104_v15 = vsub.f32 %v3196_v40, %v2072_v10  ;;  %v1954_v20 = vpop.xlane.xlu0 %1953 }
 0x24d   : > { %v2839_v56 = vpop.eup %2838  ;;  %2844 = vlog2.f32 %v1954_v20 }
 0x24e   : > { %2136 = vst [vmem:[%s3576_s30 + $0x8] sm:$0xff] %v2104_v15  ;;  %v2012_v21 = vmul.f32 0.6931472, %v2839_v56 }
 0x250   : > { %v2073_v29 = vadd.f32 %v2012_v21, %v3387_v4 }
 0x251   : > { %v2841_v47 = vpop.eup %2840 }
 0x252   : > { %v2105_v34 = vsub.f32 %v3203_v57, %v2073_v29  ;;  %v2014_v35 = vmul.f32 0.6931472, %v2841_v47  ;;  %v1956_v51 = vpop.xlane.xlu1 %1955 }
 0x253   : > { %2846 = vlog2.f32 %v1956_v51 }
 0x254   : > { %2137 = vst [vmem:[%s3576_s30 + $0x10] sm:$0xff] %v2105_v34  ;;  %v2074_v54 = vadd.f32 %v2014_v35, %v3391_v11  ;;  %v1958_v60 = vpop.xlane.xlu0 %1957 }
 0x255   : > { %v2843_v40 = vpop.eup %2842  ;;  %2848 = vlog2.f32 %v1958_v60 }
 0x256   : > { %v2106_v23 = vsub.f32 %v3209_v3, %v2074_v54  ;;  %v2016_v52 = vmul.f32 0.6931472, %v2843_v40 }
 0x257   : > { %v2845_v14 = vpop.eup %2844 }
 0x258   : > { %2138 = vst [vmem:[%s3576_s30 + $0x18] sm:$0xff] %v2106_v23  ;;  %v2075_v4 = vadd.f32 %v2016_v52, %v3395_v19  ;;  %v2018_v10 = vmul.f32 0.6931472, %v2845_v14 }
 0x25a   : > { %v2107_v57 = vsub.f32 %v3215_v18, %v2075_v4  ;;  %v2076_v48 = vadd.f32 %v2018_v10, %v3401_v25  ;;  %v1960_v15 = vpop.xlane.xlu1 %1959 }
 0x25b   : > { %2850 = vlog2.f32 %v1960_v15 }
 0x25c   : > { %2139 = vst [vmem:[%s3576_s30 + $0x20] sm:$0xff] %v2107_v57  ;;  %v2108_v11 = vsub.f32 %v3220_v24, %v2076_v48  ;;  %v1962_v20 = vpop.xlane.xlu0 %1961 }
 0x25d   : > { %v2847_v56 = vpop.eup %2846  ;;  %2852 = vlog2.f32 %v1962_v20 }
 0x25e   : > { %2140 = vst [vmem:[%s3576_s30 + $0x28] sm:$0xff] %v2108_v11  ;;  %v2020_v3 = vmul.f32 0.6931472, %v2847_v56 }
 0x25f   : > { %v2849_v21 = vpop.eup %2848 }
 0x260   : > { %v2077_v19 = vadd.f32 %v2020_v3, %v3407_v39  ;;  %v2022_v29 = vmul.f32 0.6931472, %v2849_v21 }
 0x262   : > { %v2109_v18 = vsub.f32 %v3227_v44, %v2077_v19  ;;  %v2078_v25 = vadd.f32 %v2022_v29, %v3413_v46  ;;  %v1964_v47 = vpop.xlane.xlu1 %1963 }
 0x263   : > { %2854 = vlog2.f32 %v1964_v47 }
 0x264   : > { %2141 = vst [vmem:[%s3576_s30 + $0x30] sm:$0xff] %v2109_v18  ;;  %v2110_v24 = vsub.f32 %v3232_v50, %v2078_v25  ;;  %v1966_v34 = vpop.xlane.xlu0 %1965 }
 0x265   : > { %v2851_v35 = vpop.eup %2850  ;;  %2856 = vlog2.f32 %v1966_v34 }
 0x266   : > { %2142 = vst [vmem:[%s3576_s30 + $0x38] sm:$0xff] %v2110_v24  ;;  %v2024_v51 = vmul.f32 0.6931472, %v2851_v35 }
 0x267   : > { %v2853_v54 = vpop.eup %2852 }
 0x268   : > { %v2079_v39 = vadd.f32 %v2024_v51, %v3419_v0  ;;  %v2026_v60 = vmul.f32 0.6931472, %v2853_v54 }
 0x26a   : > { %v2111_v44 = vsub.f32 %v3239_v6, %v2079_v39  ;;  %v2080_v46 = vadd.f32 %v2026_v60, %v3425_v13  ;;  %v1968_v40 = vpop.xlane.xlu1 %1967 }
 0x26b   : > { %2858 = vlog2.f32 %v1968_v40 }
 0x26c   : > { %2143 = vst [vmem:[%s3576_s30 + $0x40] sm:$0xff] %v2111_v44  ;;  %v2112_v50 = vsub.f32 %v3244_v12, %v2080_v46  ;;  %v1970_v23 = vpop.xlane.xlu0 %1969 }
 0x26d   : > { %v2855_v52 = vpop.eup %2854  ;;  %2860 = vlog2.f32 %v1970_v23 }
 0x26e   : > { %2144 = vst [vmem:[%s3576_s30 + $0x48] sm:$0xff] %v2112_v50  ;;  %v2028_v14 = vmul.f32 0.6931472, %v2855_v52 }
 0x26f   : > { %v2857_v4 = vpop.eup %2856 }
 0x270   : > { %v2081_v0 = vadd.f32 %v2028_v14, %v3431_v26  ;;  %v2030_v10 = vmul.f32 0.6931472, %v2857_v4 }
 0x272   : > { %v2113_v6 = vsub.f32 %v3251_v33, %v2081_v0  ;;  %v2082_v13 = vadd.f32 %v2030_v10, %v3437_v38  ;;  %v1972_v57 = vpop.xlane.xlu1 %1971  ;;  %v3713_v10 = vld [vmem:[#allocation11_spill] sm:$0xff] }
 0x273   : > { %2862 = vlog2.f32 %v1972_v57 }
 0x274   : > { %2145 = vst [vmem:[%s3576_s30 + $0x50] sm:$0xff] %v2113_v6  ;;  %v2114_v12 = vsub.f32 %v3256_v41, %v2082_v13  ;;  %v1974_v48 = vpop.xlane.xlu0 %1973  ;;  %v3714_v13 = vld [vmem:[#allocation3_spill] sm:$0xff] }
 0x275   : > { %v2859_v15 = vpop.eup %2858  ;;  %2864 = vlog2.f32 %v1974_v48 }
 0x276   : > { %2146 = vst [vmem:[%s3576_s30 + $0x58] sm:$0xff] %v2114_v12  ;;  %v2032_v11 = vmul.f32 0.6931472, %v2859_v15 }
 0x277   : > { %v2861_v20 = vpop.eup %2860 }
 0x278   : > { %v2083_v26 = vadd.f32 %v2032_v11, %v3443_v53  ;;  %v2034_v56 = vmul.f32 0.6931472, %v2861_v20  ;;  %v3715_v20 = vld [vmem:[#allocation12_spill] sm:$0xff] }
 0x27a   : > { %v2115_v33 = vsub.f32 %v3263_v62, %v2083_v26  ;;  %v2084_v38 = vadd.f32 %v2034_v56, %v3449_v7  ;;  %v1976_v3 = vpop.xlane.xlu1 %1975 }
 0x27b   : > { %2866 = vlog2.f32 %v1976_v3 }
 0x27c   : > { %2147 = vst [vmem:[%s3576_s30 + $0x60] sm:$0xff] %v2115_v33  ;;  %v2116_v41 = vsub.f32 %v3268_v5, %v2084_v38  ;;  %v1978_v21 = vpop.xlane.xlu0 %1977  ;;  %v3716_v33 = vld [vmem:[#allocation4_spill] sm:$0xff] }
 0x27d   : > { %v2863_v19 = vpop.eup %2862  ;;  %2868 = vlog2.f32 %v1978_v21 }
 0x27e   : > { %2148 = vst [vmem:[%s3576_s30 + $0x68] sm:$0xff] %v2116_v41  ;;  %v2036_v29 = vmul.f32 0.6931472, %v2863_v19 }
 0x27f   : > { %v2865_v18 = vpop.eup %2864 }
 0x280   : > { %v2085_v53 = vadd.f32 %v2036_v29, %v3455_v22  ;;  %v2038_v25 = vmul.f32 0.6931472, %v2865_v18  ;;  %v3717_v18 = vld [vmem:[#allocation13_spill] sm:$0xff] }
 0x282   : > { %v2117_v62 = vsub.f32 %v3275_v28, %v2085_v53  ;;  %v2086_v7 = vadd.f32 %v2038_v25, %v3461_v42  ;;  %v1980_v47 = vpop.xlane.xlu1 %1979 }
 0x283   : > { %2870 = vlog2.f32 %v1980_v47 }
 0x284   : > { %2149 = vst [vmem:[%s3576_s30 + $0x70] sm:$0xff] %v2117_v62  ;;  %v2118_v5 = vsub.f32 %v3280_v36, %v2086_v7  ;;  %v1982_v24 = vpop.xlane.xlu0 %1981  ;;  %v3718_v62 = vld [vmem:[#allocation5_spill] sm:$0xff] }
 0x285   : > { %v2867_v34 = vpop.eup %2866  ;;  %2872 = vlog2.f32 %v1982_v24 }
 0x286   : > { %2150 = vst [vmem:[%s3576_s30 + $0x78] sm:$0xff] %v2118_v5  ;;  %v2040_v35 = vmul.f32 0.6931472, %v2867_v34 }
 0x287   : > { %v2869_v51 = vpop.eup %2868 }
 0x288   : > { %v2087_v22 = vadd.f32 %v2040_v35, %v3467_v63  ;;  %v2042_v54 = vmul.f32 0.6931472, %v2869_v51  ;;  %v3719_v51 = vld [vmem:[#allocation14_spill] sm:$0xff] }
 0x28a   : > { %v2119_v28 = vsub.f32 %v3287_v59, %v2087_v22  ;;  %v2088_v42 = vadd.f32 %v2042_v54, %v3473_v16  ;;  %v1984_v39 = vpop.xlane.xlu1 %1983 }
 0x28b   : > { %2874 = vlog2.f32 %v1984_v39 }
 0x28c   : > { %2151 = vst [vmem:[%s3576_s30 + $0x80] sm:$0xff] %v2119_v28  ;;  %v2120_v36 = vsub.f32 %v3292_v2, %v2088_v42  ;;  %v1986_v60 = vpop.xlane.xlu0 %1985  ;;  %v3720_v28 = vld [vmem:[#allocation6_spill] sm:$0xff] }
 0x28d   : > { %v2871_v44 = vpop.eup %2870  ;;  %2876 = vlog2.f32 %v1986_v60 }
 0x28e   : > { %2152 = vst [vmem:[%s3576_s30 + $0x88] sm:$0xff] %v2120_v36  ;;  %v2044_v46 = vmul.f32 0.6931472, %v2871_v44 }
 0x28f   : > { %v2873_v40 = vpop.eup %2872 }
 0x290   : > { %v2089_v63 = vadd.f32 %v2044_v46, %v3479_v43  ;;  %v2046_v50 = vmul.f32 0.6931472, %v2873_v40  ;;  %v3721_v40 = vld [vmem:[#allocation15_spill] sm:$0xff] }
 0x292   : > { %v2121_v59 = vsub.f32 %v3299_v27, %v2089_v63  ;;  %v2090_v16 = vadd.f32 %v2046_v50, %v3485_v58  ;;  %v1988_v23 = vpop.xlane.xlu1 %1987 }
 0x293   : > { %2878 = vlog2.f32 %v1988_v23  ;;  %v3723_v23 = vld [vmem:[#allocation8_spill] sm:$0xff] }
 0x294   : > { %2153 = vst [vmem:[%s3576_s30 + $0x90] sm:$0xff] %v2121_v59  ;;  %v2122_v2 = vsub.f32 %v3304_v37, %v2090_v16  ;;  %v1990_v52 = vpop.xlane.xlu0 %1989  ;;  %v3722_v59 = vld [vmem:[#allocation7_spill] sm:$0xff] }
 0x295   : > { %v2875_v14 = vpop.eup %2874  ;;  %2880 = vlog2.f32 %v1990_v52 }
 0x296   : > { %2154 = vst [vmem:[%s3576_s30 + $0x98] sm:$0xff] %v2122_v2  ;;  %v2048_v4 = vmul.f32 0.6931472, %v2875_v14 }
 0x297   : > { %v2877_v0 = vpop.eup %2876 }
 0x298   : > { %v2091_v43 = vadd.f32 %v2048_v4, %v3713_v10  ;;  %v2050_v6 = vmul.f32 0.6931472, %v2877_v0  ;;  %v3724_v10 = vld [vmem:[#allocation9_spill] sm:$0xff] }
 0x29a   : > { %v2123_v27 = vsub.f32 %v3714_v13, %v2091_v43  ;;  %v2092_v58 = vadd.f32 %v2050_v6, %v3497_v49  ;;  %v1992_v57 = vpop.xlane.xlu1 %1991  ;;  %v3725_v13 = vld [vmem:[#allocation10_spill] sm:$0xff] }
 0x29b   : > { %2882 = vlog2.f32 %v1992_v57 }
 0x29c   : > { %2155 = vst [vmem:[%s3576_s30 + $0xa0] sm:$0xff] %v2123_v27  ;;  %v2124_v37 = vsub.f32 %v3316_v8, %v2092_v58  ;;  %v1994_v12 = vpop.xlane.xlu0 %1993 }
 0x29d   : > { %v2879_v48 = vpop.eup %2878  ;;  %2884 = vlog2.f32 %v1994_v12 }
 0x29e   : > { %2156 = vst [vmem:[%s3576_s30 + $0xa8] sm:$0xff] %v2124_v37  ;;  %v2052_v15 = vmul.f32 0.6931472, %v2879_v48 }
 0x29f   : > { %v2881_v11 = vpop.eup %2880 }
 0x2a0   : > { %v2093_v26 = vadd.f32 %v2052_v15, %v3715_v20  ;;  %v2054_v56 = vmul.f32 0.6931472, %v2881_v11 }
 0x2a2   : > { %v2125_v38 = vsub.f32 %v3716_v33, %v2093_v26  ;;  %v2094_v49 = vadd.f32 %v2054_v56, %v3509_v31  ;;  %v1996_v3 = vpop.xlane.xlu1 %1995 }
 0x2a3   : > { %2886 = vlog2.f32 %v1996_v3 }
 0x2a4   : > { %2157 = vst [vmem:[%s3576_s30 + $0xb0] sm:$0xff] %v2125_v38  ;;  %v2126_v8 = vsub.f32 %v3328_v45, %v2094_v49  ;;  %v1998_v41 = vpop.xlane.xlu0 %1997 }
 0x2a5   : > { %v2883_v21 = vpop.eup %2882  ;;  %2888 = vlog2.f32 %v1998_v41 }
 0x2a6   : > { %2158 = vst [vmem:[%s3576_s30 + $0xb8] sm:$0xff] %v2126_v8  ;;  %v2056_v19 = vmul.f32 0.6931472, %v2883_v21 }
 0x2a7   : > { %v2885_v29 = vpop.eup %2884 }
 0x2a8   : > { %v2095_v53 = vadd.f32 %v2056_v19, %v3717_v18  ;;  %v2058_v25 = vmul.f32 0.6931472, %v2885_v29 }
 0x2aa   : > { %v2127_v7 = vsub.f32 %v3718_v62, %v2095_v53  ;;  %v2096_v31 = vadd.f32 %v2058_v25, %v3521_v30  ;;  %v2000_v47 = vpop.xlane.xlu1 %1999 }
 0x2ab   : > { %2890 = vlog2.f32 %v2000_v47 }
 0x2ac   : > { %2159 = vst [vmem:[%s3576_s30 + $0xc0] sm:$0xff] %v2127_v7  ;;  %v2128_v45 = vsub.f32 %v3340_v17, %v2096_v31  ;;  %v2002_v5 = vpop.xlane.xlu0 %2001 }
 0x2ad   : > { %v2887_v24 = vpop.eup %2886  ;;  %2892 = vlog2.f32 %v2002_v5 }
 0x2ae   : > { %2160 = vst [vmem:[%s3576_s30 + $0xc8] sm:$0xff] %v2128_v45  ;;  %v2060_v34 = vmul.f32 0.6931472, %v2887_v24 }
 0x2af   : > { %v2889_v35 = vpop.eup %2888 }
 0x2b0   : > { %v2097_v22 = vadd.f32 %v2060_v34, %v3719_v51  ;;  %v2062_v54 = vmul.f32 0.6931472, %v2889_v35 }
 0x2b2   : > { %v2129_v42 = vsub.f32 %v3720_v28, %v2097_v22  ;;  %v2098_v30 = vadd.f32 %v2062_v54, %v3533_v61  ;;  %v2004_v39 = vpop.xlane.xlu1 %2003 }
 0x2b3   : > { %2894 = vlog2.f32 %v2004_v39 }
 0x2b4   : > { %2161 = vst [vmem:[%s3576_s30 + $0xd0] sm:$0xff] %v2129_v42  ;;  %v2130_v17 = vsub.f32 %v3352_v55, %v2098_v30  ;;  %v2006_v36 = vpop.xlane.xlu0 %2005 }
 0x2b5   : > { %v2891_v60 = vpop.eup %2890  ;;  %2896 = vlog2.f32 %v2006_v36 }
 0x2b6   : > { %2162 = vst [vmem:[%s3576_s30 + $0xd8] sm:$0xff] %v2130_v17  ;;  %v2064_v44 = vmul.f32 0.6931472, %v2891_v60 }
 0x2b7   : > { %v2893_v46 = vpop.eup %2892 }
 0x2b8   : > { %v2099_v63 = vadd.f32 %v2064_v44, %v3721_v40  ;;  %v2066_v50 = vmul.f32 0.6931472, %v2893_v46 }
 0x2ba   : > { %v2131_v16 = vsub.f32 %v3722_v59, %v2099_v63  ;;  %v2100_v61 = vadd.f32 %v2066_v50, %v3545_v32 }
 0x2bc   : > { %2163 = vst [vmem:[%s3576_s30 + $0xe0] sm:$0xff] %v2131_v16  ;;  %v2132_v2 = vsub.f32 %v3723_v23, %v2100_v61 }
 0x2bd   : > { %v2895_v52 = vpop.eup %2894 }
 0x2be   : > { %2164 = vst [vmem:[%s3576_s30 + $0xe8] sm:$0xff] %v2132_v2  ;;  %v2068_v55 = vmul.f32 0.6931472, %v2895_v52 }
 0x2bf   : > { %v2897_v14 = vpop.eup %2896 }
 0x2c0   : > { %v2101_v4 = vadd.f32 %v2068_v55, %v3551_v1  ;;  %v2070_v0 = vmul.f32 0.6931472, %v2897_v14 }
 0x2c2   : > { %v2133_v43 = vsub.f32 %v3724_v10, %v2101_v4  ;;  %v2102_v6 = vadd.f32 %v2070_v0, %v3557_v9 }
 0x2c4   : > { %2165 = vst [vmem:[%s3576_s30 + $0xf0] sm:$0xff] %v2133_v43  ;;  %v2134_v27 = vsub.f32 %v3725_v13, %v2102_v6 }
 0x2c6   : > { %2166 = vst [vmem:[%s3576_s30 + $0xf8] sm:$0xff] %v2134_v27 }
 0x2c7 PF: > { %s14_s17 = sadd.s32 1, %s2920_s17   ;;  %s3726_s15 = smov %s2916_s16 }
 0x2c8   : > { %p11_p5 = scmp.ge.s32.totalorder %s14_s17, 4   ;;  %s3727_s16 = smov %s3729_s18 }
 0x2ca   :  { %13 = sbr.rel (!%p11_p5) target bundleno = 2 (0x2), region = 83 }

// kernel: sage_conv_net.2
= control target key start
LH: loop header
LB: loop body
LE: loop exit
PB: predicated region body
PF: predicated region fallthrough
CT: control target
= control target key end

     0   :  { %s3580_s27 = smov 0   ;;  %s3582_s28 = smov 0   ;;  %s4002_s0 = inlined_call_operand.vmem [shape: bf16[512,512], index: 0, kind: input, shape index: {}]   ;;  %s4003_s1 = inlined_call_operand.vmem [shape: bf16[512,128], index: 1, kind: input, shape index: {}]   ;;  %s4004_s2 = inlined_call_operand.vmem [shape: f32[512,128], index: 2, kind: input, shape index: {}]   ;;  %s4005_s3 = inlined_call_operand.vmem [shape: f32[512,1], index: 3, kind: input, shape index: {}]   ;;  %s4006_s4 = inlined_call_operand.vmem [shape: bf16[128,128], index: 4, kind: input, shape index: {}]   ;;  %s4007_s5 = inlined_call_operand.vmem [shape: bf16[128,128], index: 5, kind: input, shape index: {}]   ;;  %s4008_s6 = inlined_call_operand.vmem [shape: f32[1,128], index: 6, kind: input, shape index: {}]   ;;  %s4009_s7 = inlined_call_operand.vmem [shape: bf16[512,128], index: 7, kind: output, shape index: {0}]   ;;  %s4010_s8 = inlined_call_operand.vmem [shape: f32[512,128], index: 8, kind: output, shape index: {1}]  }
   0x1   :  { %s3584_s29 = smov 0  }
   0x2 LB: > { %s31_s30 = sadd.s32 1, %s3528_s28  ;;  %p2684_p0 = scmp.ge.s32.totalorder %s3532_s29, 1  ;;  %s3532_s29 = sphi %s3584_s29, %s19_s29   ;;  %s3528_s28 = sphi %s3582_s28, %s4012_s28   ;;  %s3524_s27 = sphi %s3580_s27, %s4011_s27  }
   0x3   : > { %p33_p1 = scmp.ge.s32.totalorder %s31_s30, 2  ;;  %p319_p2 = scmp.lt.s32.totalorder %s3532_s29, 3 }
   0x5   : > { %s4014_s30 = smov (%p33_p1, %s31_s30), 0  ;;  %p320_p3 = pnand %p2684_p0, %p319_p2 }
   0x6   : > { %v3366_v0 = vld [vmem:[%s4003_s1 + $0x40] sm:$0xff] (!%p320_p3)   ;;  %v3534_v4 = vmov (!%p320_p3), 0   ;;  %v3370_v5 = vld [vmem:[%s4003_s1 + $0x48] sm:$0xff] (!%p320_p3)   ;;  %v3374_v9 = vld [vmem:[%s4003_s1 + $0x50] sm:$0xff] (!%p320_p3)   ;;  %s2685_s23 = sshll.u32 (!%p320_p3), %s3524_s27, 5 }
   0x7   : > { %323 = sbr.rel (%p320_p3) target bundleno = 606 (0x25e), region = 48  ;;  %v3367_v1 = vld [vmem:[%s4003_s1 + $0xc0] sm:$0xff] (!%p320_p3)   ;;  %2971 = vmatprep.subr.bf16.mxu0 (!%p320_p3), %v3366_v0  ;;  %3364 = vset.pattern.permute.xlu0 (!%p320_p3), %v3534_v4  ;;  %v3371_v6 = vld [vmem:[%s4003_s1 + $0xc8] sm:$0xff] (!%p320_p3)   ;;  %v3375_v10 = vld [vmem:[%s4003_s1 + $0xd0] sm:$0xff] (!%p320_p3)   ;;  %p380_p4 = scmp.lt.s32.totalorder (!%p320_p3), %s2685_s23, 63 }
   0x8   : > { %v3368_v2 = vld [vmem:[%s4003_s1] sm:$0xff] (!%p320_p3)   ;;  %3083 = vmatprep.subr.bf16.mxu1 (!%p320_p3), %v3367_v1  ;;  %3365 = vset.pattern.permute.xlu1 (!%p320_p3), %v3534_v4  ;;  %v3372_v7 = vld [vmem:[%s4003_s1 + $0x8] sm:$0xff] (!%p320_p3)   ;;  %v3376_v11 = vld [vmem:[%s4003_s1 + $0x10] sm:$0xff] (!%p320_p3)  }
   0x9   : > { %v3369_v3 = vld [vmem:[%s4003_s1 + $0x80] sm:$0xff] (!%p320_p3)   ;;  %2972 = vmatpush3.bf16.msra.mxu0 (!%p320_p3), %v3368_v2  ;;  %v3373_v8 = vld [vmem:[%s4003_s1 + $0x88] sm:$0xff] (!%p320_p3)   ;;  %v3377_v12 = vld [vmem:[%s4003_s1 + $0x90] sm:$0xff] (!%p320_p3)  }
   0xa   : > { %3084 = vmatpush3.bf16.msra.mxu1 (!%p320_p3), %v3369_v3  ;;  %2973 = vmatprep.subr.bf16.mxu0 (!%p320_p3), %v3370_v5  ;;  %v3378_v13 = vld [vmem:[%s4003_s1 + $0x58] sm:$0xff] (!%p320_p3)   ;;  %v3382_v17 = vld [vmem:[%s4003_s1 + $0x60] sm:$0xff] (!%p320_p3)   ;;  %v3386_v21 = vld [vmem:[%s4003_s1 + $0x68] sm:$0xff] (!%p320_p3)  }
   0xb   : > { %3085 = vmatprep.subr.bf16.mxu1 (!%p320_p3), %v3371_v6  ;;  %v3379_v14 = vld [vmem:[%s4003_s1 + $0xd8] sm:$0xff] (!%p320_p3)   ;;  %v3383_v18 = vld [vmem:[%s4003_s1 + $0xe0] sm:$0xff] (!%p320_p3)   ;;  %v3387_v22 = vld [vmem:[%s4003_s1 + $0xe8] sm:$0xff] (!%p320_p3)  }
   0xc   : > { %v3380_v15 = vld [vmem:[%s4003_s1 + $0x18] sm:$0xff] (!%p320_p3)   ;;  %v3384_v19 = vld [vmem:[%s4003_s1 + $0x20] sm:$0xff] (!%p320_p3)   ;;  %v3388_v23 = vld [vmem:[%s4003_s1 + $0x28] sm:$0xff] (!%p320_p3)  }
   0xd   : > { %2974 = vmatpush3.bf16.msra.mxu0 (!%p320_p3), %v3372_v7  ;;  %v3381_v16 = vld [vmem:[%s4003_s1 + $0x98] sm:$0xff] (!%p320_p3)   ;;  %v3385_v20 = vld [vmem:[%s4003_s1 + $0xa0] sm:$0xff] (!%p320_p3)   ;;  %v3389_v24 = vld [vmem:[%s4003_s1 + $0xa8] sm:$0xff] (!%p320_p3)  }
   0xe   : > { %3086 = vmatpush3.bf16.msra.mxu1 %v3373_v8  ;;  %2975 = vmatprep.subr.bf16.mxu0 %v3374_v9  ;;  %s4016_s23 = smov (!%p380_p4, %s2685_s23), 63  ;;  %v3390_v25 = vld [vmem:[%s4003_s1 + $0x70] sm:$0xff]   ;;  %v3394_v29 = vld [vmem:[%s4003_s1 + $0x78] sm:$0xff]  }
   0xf   : > { %3087 = vmatprep.subr.bf16.mxu1 %v3375_v10  ;;  %v3391_v26 = vld [vmem:[%s4003_s1 + $0xf0] sm:$0xff]   ;;  %s2843_s10 = sshll.u32 %s4016_s23, 4  ;;  %v3395_v30 = vld [vmem:[%s4003_s1 + $0xf8] sm:$0xff]   ;;  %s3721_s24 = sshll.u32 %s4016_s23, 3 }
  0x10   : > { %v3392_v27 = vld [vmem:[%s4003_s1 + $0x30] sm:$0xff]   ;;  %s3697_s18 = scalar_lea.vmem %s4002_s0, %s2843_s10  ;;  %v3396_v31 = vld [vmem:[%s4003_s1 + $0x38] sm:$0xff]   ;;  %s3730_s9 = scalar_lea.vmem %s4005_s3, %s3721_s24 }
  0x11   : > { %2976 = vmatpush3.bf16.msra.mxu0 %v3376_v11  ;;  %v3393_v28 = vld [vmem:[%s4003_s1 + $0xb0] sm:$0xff]   ;;  %v3397_v32 = vld [vmem:[%s4003_s1 + $0xb8] sm:$0xff]   ;;  %v1550_v51 = vld [vmem:[%s3730_s9] sm:$0xff]  ;;  %s3862_s13 = scalar_lea.vmem %s4004_s2, %s3721_s24  ;;  %s3906_s16 = scalar_lea.vmem %s4010_s8, %s3721_s24 }
  0x12   : > { %3088 = vmatpush3.bf16.msra.mxu1 %v3377_v12  ;;  %2977 = vmatprep.subr.bf16.mxu0 %v3378_v13  ;;  %v3398_v33 = vld [vmem:[%s3697_s18] ss:$16 sps:$4 sm:$0xff]   ;;  %v3400_v34 = vld [vmem:[%s3697_s18 + $0x4] ss:$16 sps:$4 sm:$0xff]   ;;  %v3401_v35 = vld [vmem:[%s3697_s18 + $0x8] ss:$16 sps:$4 sm:$0xff]  }
  0x13   : > { %3089 = vmatprep.subr.bf16.mxu1 %v3379_v14  ;;  %v3403_v36 = vld [vmem:[%s3697_s18 + $0xc] ss:$16 sps:$4 sm:$0xff]   ;;  %1161 = vmatprep.mubr.bf16.mxu0 %v3400_v34  ;;  %v3404_v37 = vld [vmem:[%s3697_s18 + $0x24] ss:$16 sps:$4 sm:$0xff]   ;;  %v3408_v39 = vld [vmem:[%s3697_s18 + $0x20] ss:$16 sps:$4 sm:$0xff]  }
  0x14   : > { %1322 = vmatprep.mubr.bf16.mxu1 %v3403_v36  ;;  %v3406_v38 = vld [vmem:[%s3697_s18 + $0x2c] ss:$16 sps:$4 sm:$0xff]   ;;  %v3409_v40 = vld [vmem:[%s3697_s18 + $0x28] ss:$16 sps:$4 sm:$0xff]   ;;  %v3410_v41 = vld [vmem:[%s3697_s18 + $0x44] ss:$16 sps:$4 sm:$0xff]   ;;  %1584 = vperm.xlu0 %3364, %v1550_v51  }
  0x15   : > { %2978 = vmatpush3.bf16.msra.mxu0 %v3380_v15  ;;  %v3412_v42 = vld [vmem:[%s3697_s18 + $0x4c] ss:$16 sps:$4 sm:$0xff]   ;;  %v3414_v43 = vld [vmem:[%s3697_s18 + $0x40] ss:$16 sps:$4 sm:$0xff]   ;;  %v3415_v44 = vld [vmem:[%s3697_s18 + $0x48] ss:$16 sps:$4 sm:$0xff]  }
  0x16   : > { %3090 = vmatpush3.bf16.msra.mxu1 %v3381_v16  ;;  %2979 = vmatprep.subr.bf16.mxu0 %v3382_v17  ;;  %v3416_v45 = vld [vmem:[%s3697_s18 + $0x64] ss:$16 sps:$4 sm:$0xff]   ;;  %v3418_v46 = vld [vmem:[%s3697_s18 + $0x6c] ss:$16 sps:$4 sm:$0xff]   ;;  %v3420_v47 = vld [vmem:[%s3697_s18 + $0x60] ss:$16 sps:$4 sm:$0xff]  }
  0x17   : > { %3091 = vmatprep.subr.bf16.mxu1 %v3383_v18  ;;  %v3421_v48 = vld [vmem:[%s3697_s18 + $0x68] ss:$16 sps:$4 sm:$0xff]   ;;  %v3422_v49 = vld [vmem:[%s3697_s18 + $0x84] ss:$16 sps:$4 sm:$0xff]   ;;  %v3424_v50 = vld [vmem:[%s3697_s18 + $0x8c] ss:$16 sps:$4 sm:$0xff]  }
  0x18   : > { %v3426_v52 = vld [vmem:[%s3697_s18 + $0x80] ss:$16 sps:$4 sm:$0xff]   ;;  %v3427_v53 = vld [vmem:[%s3697_s18 + $0x88] ss:$16 sps:$4 sm:$0xff]   ;;  %v3428_v56 = vld [vmem:[%s3697_s18 + $0xa4] ss:$16 sps:$4 sm:$0xff]  }
  0x19   : > { %2980 = vmatpush3.bf16.msra.mxu0 %v3384_v19  ;;  %v1552_v54 = vld [vmem:[%s3730_s9 + $0x10] sm:$0xff]  ;;  %v1551_v55 = vld [vmem:[%s3730_s9 + $0x8] sm:$0xff]  ;;  %v1553_v58 = vld [vmem:[%s3730_s9 + $0x18] sm:$0xff] }
  0x1a   : > { %3092 = vmatpush3.bf16.msra.mxu1 %v3385_v20  ;;  %2981 = vmatprep.subr.bf16.mxu0 %v3386_v21  ;;  %v3430_v57 = vld [vmem:[%s3697_s18 + $0xac] ss:$16 sps:$4 sm:$0xff]   ;;  %v1554_v59 = vld [vmem:[%s3730_s9 + $0x20] sm:$0xff]  ;;  %v3433_v62 = vld [vmem:[%s3697_s18 + $0xa8] ss:$16 sps:$4 sm:$0xff]  }
  0x1b   : > { %3093 = vmatprep.subr.bf16.mxu1 %v3387_v22  ;;  %1594 = vperm.xlu1 %3365, %v1552_v54   ;;  %v1555_v60 = vld [vmem:[%s3730_s9 + $0x28] sm:$0xff]  ;;  %v3432_v61 = vld [vmem:[%s3697_s18 + $0xa0] ss:$16 sps:$4 sm:$0xff]   ;;  %v3434_v0 = vld [vmem:[%s3697_s18 + $0xc4] ss:$16 sps:$4 sm:$0xff]  }
  0x1c   : > { %1589 = vperm.xlu0 %3364, %v1551_v55   ;;  %v1556_v63 = vld [vmem:[%s3730_s9 + $0x30] sm:$0xff]  ;;  %v3436_v1 = vld [vmem:[%s3697_s18 + $0xcc] ss:$16 sps:$4 sm:$0xff]   ;;  %v1558_v3 = vld [vmem:[%s3730_s9 + $0x40] sm:$0xff] }
  0x1d   : > { %2982 = vmatpush3.bf16.msra.mxu0 %v3388_v23  ;;  %v1557_v2 = vld [vmem:[%s3730_s9 + $0x38] sm:$0xff]  ;;  %v1559_v4 = vld [vmem:[%s3730_s9 + $0x48] sm:$0xff]  ;;  %v3438_v5 = vld [vmem:[%s3697_s18 + $0xc0] ss:$16 sps:$4 sm:$0xff]  }
  0x1e   : > { %3094 = vmatpush3.bf16.msra.mxu1 %v3389_v24  ;;  %2983 = vmatprep.subr.bf16.mxu0 %v3390_v25  ;;  %v1560_v6 = vld [vmem:[%s3730_s9 + $0x50] sm:$0xff]  ;;  %v3439_v7 = vld [vmem:[%s3697_s18 + $0xc8] ss:$16 sps:$4 sm:$0xff]   ;;  %v3442_v9 = vld [vmem:[%s3697_s18 + $0xec] ss:$16 sps:$4 sm:$0xff]  }
  0x1f   : > { %3095 = vmatprep.subr.bf16.mxu1 %v3391_v26  ;;  %1599 = vperm.xlu1 %3365, %v1553_v58   ;;  %v3440_v8 = vld [vmem:[%s3697_s18 + $0xe4] ss:$16 sps:$4 sm:$0xff]   ;;  %v1561_v10 = vld [vmem:[%s3730_s9 + $0x58] sm:$0xff]  ;;  %v1563_v12 = vld [vmem:[%s3730_s9 + $0x68] sm:$0xff] }
  0x20   : > { %1604 = vperm.xlu0 %3364, %v1554_v59   ;;  %v1562_v11 = vld [vmem:[%s3730_s9 + $0x60] sm:$0xff]  ;;  %v1564_v14 = vld [vmem:[%s3730_s9 + $0x70] sm:$0xff]  ;;  %v3445_v16 = vld [vmem:[%s3697_s18 + $0xe8] ss:$16 sps:$4 sm:$0xff]  }
  0x21   : > { %2984 = vmatpush3.bf16.msra.mxu0 %v3392_v27  ;;  %v3444_v13 = vld [vmem:[%s3697_s18 + $0xe0] ss:$16 sps:$4 sm:$0xff]   ;;  %v3446_v17 = vld [vmem:[%s3697_s18 + $0x104] ss:$16 sps:$4 sm:$0xff]   ;;  %v3448_v19 = vld [vmem:[%s3697_s18 + $0x10c] ss:$16 sps:$4 sm:$0xff]  }
  0x22   : > { %3096 = vmatpush3.bf16.msra.mxu1 %v3393_v28  ;;  %2985 = vmatprep.subr.bf16.mxu0 %v3394_v29  ;;  %v3494_v15 = vld [vmem:[%s4006_s4] sm:$0xff]   ;;  %v3496_v20 = vld [vmem:[%s4006_s4 + $0x8] sm:$0xff]   ;;  %v1565_v22 = vld [vmem:[%s3730_s9 + $0x78] sm:$0xff] }
  0x23   : > { %3097 = vmatprep.subr.bf16.mxu1 %v3395_v30  ;;  %1609 = vperm.xlu1 %3365, %v1555_v60   ;;  %v3495_v18 = vld [vmem:[%s4007_s5] sm:$0xff]   ;;  %v3497_v21 = vld [vmem:[%s4007_s5 + $0x8] sm:$0xff]   ;;  %v3498_v24 = vld [vmem:[%s4006_s4 + $0x10] sm:$0xff]  }
  0x24   : > { %1614 = vperm.xlu0 %3364, %v1556_v63   ;;  %v1566_v23 = vld [vmem:[%s3730_s9 + $0x80] sm:$0xff]  ;;  %v1567_v25 = vld [vmem:[%s3730_s9 + $0x88] sm:$0xff]  ;;  %v3499_v26 = vld [vmem:[%s4007_s5 + $0x10] sm:$0xff]  }
  0x25   : > { %2986 = vmatpush3.bf16.msra.mxu0 %v3396_v31  ;;  %v3450_v27 = vld [vmem:[%s3697_s18 + $0x100] ss:$16 sps:$4 sm:$0xff]   ;;  %v3451_v29 = vld [vmem:[%s3697_s18 + $0x108] ss:$16 sps:$4 sm:$0xff]   ;;  %v3452_v30 = vld [vmem:[%s3697_s18 + $0x124] ss:$16 sps:$4 sm:$0xff]  }
  0x26   : > { %3098 = vmatpush3.bf16.msra.mxu1 %v3397_v32  ;;  %3243 = vmatprep.subr.bf16.mxu0 %v3494_v15  ;;  %v1568_v28 = vld [vmem:[%s3730_s9 + $0x90] sm:$0xff]  ;;  %v3454_v31 = vld [vmem:[%s3697_s18 + $0x12c] ss:$16 sps:$4 sm:$0xff]   ;;  %v1570_v34 = vld [vmem:[%s3730_s9 + $0xa0] sm:$0xff] }
  0x27   : > { %1619 = vperm.xlu1 %3365, %v1557_v2   ;;  %3291 = vmatprep.subr.bf16.mxu1 %v3495_v18  ;;  %v1569_v32 = vld [vmem:[%s3730_s9 + $0x98] sm:$0xff]  ;;  %v1571_v36 = vld [vmem:[%s3730_s9 + $0xa8] sm:$0xff]  ;;  %v1578_v51 = vld [vmem:[%s3730_s9 + $0xe0] sm:$0xff] }
  0x28   : > { %1162 = vmatmul.mubr.bf16.vlgmr.msra.gmra.mrb[0].mxu0 %v3398_v33  ;;  %1624 = vperm.xlu0 %3364, %v1558_v3   ;;  %v3500_v33 = vld [vmem:[%s4006_s4 + $0x18] sm:$0xff]   ;;  %v1580_v54 = vld [vmem:[%s3730_s9 + $0xf0] sm:$0xff]  ;;  %v3502_v59 = vld [vmem:[%s4006_s4 + $0x20] sm:$0xff]  }
  0x29   : > { %1323 = vmatmul.mubr.bf16.vlgmr.msra.gmra.mrb[0].mxu1 %v3401_v35  ;;  %1169 = vmatprep.mubr.bf16.mxu0 %v3404_v37  ;;  %v3501_v35 = vld [vmem:[%s4007_s5 + $0x18] sm:$0xff]   ;;  %v3456_v37 = vld [vmem:[%s3697_s18 + $0x120] ss:$16 sps:$4 sm:$0xff]   ;;  %v3476_v63 = vld [vmem:[%s3697_s18 + $0x1a4] ss:$16 sps:$4 sm:$0xff]  }
  0x2a   : > { %1330 = vmatprep.mubr.bf16.mxu1 %v3406_v38  ;;  %3244 = vmatpush3.bf16.msra.mxu0 %v3494_v15  ;;  %v1572_v38 = vld [vmem:[%s3730_s9 + $0xb0] sm:$0xff]  ;;  %v3469_v55 = vld [vmem:[%s3697_s18 + $0x168] ss:$16 sps:$4 sm:$0xff]   ;;  %v3503_v60 = vld [vmem:[%s4007_s5 + $0x20] sm:$0xff]  }
  0x2b   : > { %1629 = vperm.xlu1 %3365, %v1559_v4   ;;  %3292 = vmatpush3.bf16.msra.mxu1 %v3495_v18  ;;  %v1581_v58 = vld [vmem:[%s3730_s9 + $0xf8] sm:$0xff]  ;;  %v3505_v2 = vld [vmem:[%s4007_s5 + $0x28] sm:$0xff]   ;;  %v3506_v3 = vld [vmem:[%s4006_s4 + $0x30] sm:$0xff]  }
  0x2c   : > { %1634 = vperm.xlu0 %3364, %v1560_v6   ;;  %3245 = vmatprep.subr.bf16.mxu0 %v3496_v20  ;;  %v3507_v4 = vld [vmem:[%s4007_s5 + $0x30] sm:$0xff]   ;;  %v3481_v6 = vld [vmem:[%s3697_s18 + $0x1a8] ss:$16 sps:$4 sm:$0xff]  }
  0x2d   : > { %3293 = vmatprep.subr.bf16.mxu1 %v3497_v21  ;;  %v3492_v15 = vld [vmem:[%s3697_s18 + $0x1e0] ss:$16 sps:$4 sm:$0xff]  }
  0x2e   : > { %3246 = vmatpush3.bf16.msra.mxu0 %v3496_v20 }
  0x2f   : > { %1639 = vperm.xlu1 %3365, %v1561_v10   ;;  %3294 = vmatpush3.bf16.msra.mxu1 %v3497_v21  ;;  %v3509_v10 = vld [vmem:[%s4007_s5 + $0x38] sm:$0xff]  }
  0x30   : > { %1170 = vmatmul.mubr.bf16.gmra.mrb[4].mxu0 %v3408_v39  ;;  %1644 = vperm.xlu0 %3364, %v1562_v11   ;;  %v3457_v39 = vld [vmem:[%s3697_s18 + $0x128] ss:$16 sps:$4 sm:$0xff]   ;;  %v3486_v11 = vld [vmem:[%s3697_s18 + $0x1c0] ss:$16 sps:$4 sm:$0xff]  }
  0x31   : > { %1331 = vmatmul.mubr.bf16.gmra.mrb[4].mxu1 %v3409_v40  ;;  %1177 = vmatprep.mubr.bf16.mxu0 %v3410_v41  ;;  %v3458_v40 = vld [vmem:[%s3697_s18 + $0x144] ss:$16 sps:$4 sm:$0xff]   ;;  %v3460_v41 = vld [vmem:[%s3697_s18 + $0x14c] ss:$16 sps:$4 sm:$0xff]  }
  0x32   : > { %1338 = vmatprep.mubr.bf16.mxu1 %v3412_v42  ;;  %3247 = vmatprep.subr.bf16.mxu0 %v3498_v24  ;;  %v1573_v42 = vld [vmem:[%s3730_s9 + $0xb8] sm:$0xff] }
  0x33   : > { %1649 = vperm.xlu1 %3365, %v1563_v12   ;;  %3295 = vmatprep.subr.bf16.mxu1 %v3499_v26  ;;  %v3487_v12 = vld [vmem:[%s3697_s18 + $0x1c8] ss:$16 sps:$4 sm:$0xff]  }
  0x34   : > { %1654 = vperm.xlu0 %3364, %v1564_v14   ;;  %3248 = vmatpush3.bf16.msra.mxu0 %v3498_v24  ;;  %v3490_v14 = vld [vmem:[%s3697_s18 + $0x1ec] ss:$16 sps:$4 sm:$0xff]  }
  0x35   : > { %3296 = vmatpush3.bf16.msra.mxu1 %v3499_v26  ;;  %3249 = vmatprep.subr.bf16.mxu0 %v3500_v33 }
  0x36   : > { %3297 = vmatprep.subr.bf16.mxu1 %v3501_v35 }
  0x37   : > { %1659 = vperm.xlu1 %3365, %v1565_v22  }
  0x38   : > { %1178 = vmatmul.mubr.bf16.gmra.mrb[8].mxu0 %v3414_v43  ;;  %1664 = vperm.xlu0 %3364, %v1566_v23   ;;  %v1574_v43 = vld [vmem:[%s3730_s9 + $0xc0] sm:$0xff] }
  0x39   : > { %1339 = vmatmul.mubr.bf16.gmra.mrb[8].mxu1 %v3415_v44  ;;  %1185 = vmatprep.mubr.bf16.mxu0 %v3416_v45  ;;  %v1575_v44 = vld [vmem:[%s3730_s9 + $0xc8] sm:$0xff]  ;;  %v3462_v45 = vld [vmem:[%s3697_s18 + $0x140] ss:$16 sps:$4 sm:$0xff]  }
  0x3a   : > { %1346 = vmatprep.mubr.bf16.mxu1 %v3418_v46  ;;  %3250 = vmatpush3.bf16.msra.mxu0 %v3500_v33  ;;  %v1576_v46 = vld [vmem:[%s3730_s9 + $0xd0] sm:$0xff] }
  0x3b   : > { %1669 = vperm.xlu1 %3365, %v1567_v25   ;;  %3298 = vmatpush3.bf16.msra.mxu1 %v3501_v35 }
  0x3c   : > { %1674 = vperm.xlu0 %3364, %v1568_v28   ;;  %3251 = vmatprep.subr.bf16.mxu0 %v3502_v59 }
  0x3d   : > { %3299 = vmatprep.subr.bf16.mxu1 %v3503_v60 }
  0x3e   : > { %3252 = vmatpush3.bf16.msra.mxu0 %v3502_v59 }
  0x3f   : > { %1679 = vperm.xlu1 %3365, %v1569_v32   ;;  %3300 = vmatpush3.bf16.msra.mxu1 %v3503_v60  ;;  %v1777_v60 = vld [vmem:[%s3862_s13 + $0x18] sm:$0xff] }
  0x40   : > { %1186 = vmatmul.mubr.bf16.gmra.mrb[12].mxu0 %v3420_v47  ;;  %1684 = vperm.xlu0 %3364, %v1570_v34   ;;  %v3463_v47 = vld [vmem:[%s3697_s18 + $0x148] ss:$16 sps:$4 sm:$0xff]  }
  0x41   : > { %1347 = vmatmul.mubr.bf16.gmra.mrb[12].mxu1 %v3421_v48  ;;  %1193 = vmatprep.mubr.bf16.mxu0 %v3422_v49  ;;  %v3464_v48 = vld [vmem:[%s3697_s18 + $0x164] ss:$16 sps:$4 sm:$0xff]   ;;  %v3466_v49 = vld [vmem:[%s3697_s18 + $0x16c] ss:$16 sps:$4 sm:$0xff]  }
  0x42   : > { %1354 = vmatprep.mubr.bf16.mxu1 %v3424_v50  ;;  %v1577_v50 = vld [vmem:[%s3730_s9 + $0xd8] sm:$0xff]  ;;  %3301 = vmatprep.subr.bf16.mxu1 %v3505_v2 }
  0x43   : > { %1689 = vperm.xlu1 %3365, %v1571_v36   ;;  %3302 = vmatpush3.bf16.msra.mxu1 %v3505_v2  ;;  %v1775_v36 = vld [vmem:[%s3862_s13 + $0x8] sm:$0xff] }
  0x44   : > { %1694 = vperm.xlu0 %3364, %v1572_v38   ;;  %3303 = vmatprep.subr.bf16.mxu1 %v3507_v4 }
  0x47   : > { %1699 = vperm.xlu1 %3365, %v1573_v42   ;;  %3304 = vmatpush3.bf16.msra.mxu1 %v3507_v4 }
  0x48   : > { %1194 = vmatmul.mubr.bf16.gmra.mrb[16].mxu0 %v3426_v52  ;;  %1704 = vperm.xlu0 %3364, %v1574_v43   ;;  %v1579_v52 = vld [vmem:[%s3730_s9 + $0xe8] sm:$0xff]  ;;  %s2693_s9 = sshll.u32 %s4016_s23, 2 }
  0x49   : > { %1355 = vmatmul.mubr.bf16.gmra.mrb[16].mxu1 %v3427_v53  ;;  %1201 = vmatprep.mubr.bf16.mxu0 %v3428_v56  ;;  %v3468_v53 = vld [vmem:[%s3697_s18 + $0x160] ss:$16 sps:$4 sm:$0xff]   ;;  %v3470_v56 = vld [vmem:[%s3697_s18 + $0x184] ss:$16 sps:$4 sm:$0xff]   ;;  %s3913_s23 = scalar_lea.vmem %s4009_s7, %s2693_s9 }
  0x4a   : > { %1362 = vmatprep.mubr.bf16.mxu1 %v3430_v57  ;;  %v3472_v57 = vld [vmem:[%s3697_s18 + $0x18c] ss:$16 sps:$4 sm:$0xff]   ;;  %3305 = vmatprep.subr.bf16.mxu1 %v3509_v10 }
  0x4b   : > { %1709 = vperm.xlu1 %3365, %v1575_v44   ;;  %3306 = vmatpush3.bf16.msra.mxu1 %v3509_v10 }
  0x4c   : > { %1714 = vperm.xlu0 %3364, %v1576_v46  }
  0x4f   : > { %1719 = vperm.xlu1 %3365, %v1577_v50  }
  0x50   : > { %1202 = vmatmul.mubr.bf16.gmra.mrb[20].mxu0 %v3432_v61  ;;  %1724 = vperm.xlu0 %3364, %v1578_v51   ;;  %v3474_v61 = vld [vmem:[%s3697_s18 + $0x180] ss:$16 sps:$4 sm:$0xff]  }
  0x51   : > { %1363 = vmatmul.mubr.bf16.gmra.mrb[20].mxu1 %v3433_v62  ;;  %1209 = vmatprep.mubr.bf16.mxu0 %v3434_v0  ;;  %v3475_v62 = vld [vmem:[%s3697_s18 + $0x188] ss:$16 sps:$4 sm:$0xff]   ;;  %v3478_v0 = vld [vmem:[%s3697_s18 + $0x1ac] ss:$16 sps:$4 sm:$0xff]  }
  0x52   : > { %1370 = vmatprep.mubr.bf16.mxu1 %v3436_v1  ;;  %v3504_v1 = vld [vmem:[%s4006_s4 + $0x28] sm:$0xff]  }
  0x53   : > { %1729 = vperm.xlu1 %3365, %v1579_v52   ;;  %3253 = vmatprep.subr.bf16.mxu0 %v3504_v1 }
  0x54   : > { %1734 = vperm.xlu0 %3364, %v1580_v54   ;;  %3254 = vmatpush3.bf16.msra.mxu0 %v3504_v1 }
  0x55   : > { %3255 = vmatprep.subr.bf16.mxu0 %v3506_v3 }
  0x57   : > { %1739 = vperm.xlu1 %3365, %v1581_v58  }
  0x58   : > { %1210 = vmatmul.mubr.bf16.gmra.mrb[24].mxu0 %v3438_v5  ;;  %v3480_v5 = vld [vmem:[%s3697_s18 + $0x1a0] ss:$16 sps:$4 sm:$0xff]  }
  0x59   : > { %1371 = vmatmul.mubr.bf16.gmra.mrb[24].mxu1 %v3439_v7  ;;  %1217 = vmatprep.mubr.bf16.mxu0 %v3440_v8  ;;  %v3482_v7 = vld [vmem:[%s3697_s18 + $0x1c4] ss:$16 sps:$4 sm:$0xff]   ;;  %v3484_v8 = vld [vmem:[%s3697_s18 + $0x1cc] ss:$16 sps:$4 sm:$0xff]  }
  0x5a   : > { %1378 = vmatprep.mubr.bf16.mxu1 %v3442_v9  ;;  %v3508_v9 = vld [vmem:[%s4006_s4 + $0x38] sm:$0xff]   ;;  %3256 = vmatpush3.bf16.msra.mxu0 %v3506_v3 }
  0x5b   : > { %3257 = vmatprep.subr.bf16.mxu0 %v3508_v9 }
  0x5e   : > { %3258 = vmatpush3.bf16.msra.mxu0 %v3508_v9 }
  0x60   : > { %1218 = vmatmul.mubr.bf16.gmra.mrb[28].mxu0 %v3444_v13  ;;  %v3488_v13 = vld [vmem:[%s3697_s18 + $0x1e4] ss:$16 sps:$4 sm:$0xff]  }
  0x61   : > { %1379 = vmatmul.mubr.bf16.gmra.mrb[28].mxu1 %v3445_v16  ;;  %1225 = vmatprep.mubr.bf16.mxu0 %v3446_v17  ;;  %v3493_v16 = vld [vmem:[%s3697_s18 + $0x1e8] ss:$16 sps:$4 sm:$0xff]  }
  0x62   : > { %1386 = vmatprep.mubr.bf16.mxu1 %v3448_v19 }
  0x68   : > { %1226 = vmatmul.mubr.bf16.gmra.mrb[32].mxu0 %v3450_v27 }
  0x69   : > { %1387 = vmatmul.mubr.bf16.gmra.mrb[32].mxu1 %v3451_v29  ;;  %1233 = vmatprep.mubr.bf16.mxu0 %v3452_v30 }
  0x6a   : > { %1394 = vmatprep.mubr.bf16.mxu1 %v3454_v31  ;;  %v1774_v31 = vld [vmem:[%s3862_s13] sm:$0xff] }
  0x70   : > { %1234 = vmatmul.mubr.bf16.gmra.mrb[36].mxu0 %v3456_v37 }
  0x71   : > { %1395 = vmatmul.mubr.bf16.gmra.mrb[36].mxu1 %v3457_v39  ;;  %1241 = vmatprep.mubr.bf16.mxu0 %v3458_v40 }
  0x72   : > { %1402 = vmatprep.mubr.bf16.mxu1 %v3460_v41 }
  0x78   : > { %1242 = vmatmul.mubr.bf16.gmra.mrb[40].mxu0 %v3462_v45 }
  0x79   : > { %1403 = vmatmul.mubr.bf16.gmra.mrb[40].mxu1 %v3463_v47  ;;  %1249 = vmatprep.mubr.bf16.mxu0 %v3464_v48 }
  0x7a   : > { %1410 = vmatprep.mubr.bf16.mxu1 %v3466_v49 }
  0x80   : > { %1250 = vmatmul.mubr.bf16.gmra.mrb[44].mxu0 %v3468_v53 }
  0x81   : > { %1411 = vmatmul.mubr.bf16.gmra.mrb[44].mxu1 %v3469_v55  ;;  %1257 = vmatprep.mubr.bf16.mxu0 %v3470_v56  ;;  %v1776_v55 = vld [vmem:[%s3862_s13 + $0x10] sm:$0xff] }
  0x82   : > { %1418 = vmatprep.mubr.bf16.mxu1 %v3472_v57 }
  0x88   : > { %1258 = vmatmul.mubr.bf16.gmra.mrb[48].mxu0 %v3474_v61 }
  0x89   : > { %1419 = vmatmul.mubr.bf16.gmra.mrb[48].mxu1 %v3475_v62  ;;  %1265 = vmatprep.mubr.bf16.mxu0 %v3476_v63 }
  0x8a   : > { %1426 = vmatprep.mubr.bf16.mxu1 %v3478_v0 }
  0x90   : > { %1266 = vmatmul.mubr.bf16.gmra.mrb[52].mxu0 %v3480_v5 }
  0x91   : > { %1427 = vmatmul.mubr.bf16.gmra.mrb[52].mxu1 %v3481_v6  ;;  %1273 = vmatprep.mubr.bf16.mxu0 %v3482_v7 }
  0x92   : > { %1434 = vmatprep.mubr.bf16.mxu1 %v3484_v8 }
  0x93   : > { %v1585_v18 = vpop.permute.xlu0 %1584 }
  0x98   : > { %1274 = vmatmul.mubr.bf16.gmra.mrb[56].mxu0 %v3486_v11 }
  0x99   : > { %1435 = vmatmul.mubr.bf16.gmra.mrb[56].mxu1 %v3487_v12  ;;  %1281 = vmatprep.mubr.bf16.mxu0 %v3488_v13 }
  0x9a   : > { %1442 = vmatprep.mubr.bf16.mxu1 %v3490_v14  ;;  %v1595_v35 = vpop.permute.xlu1 %1594 }
  0x9b   : > { %v1590_v32 = vpop.permute.xlu0 %1589 }
  0x9e   : > { %v1600_v59 = vpop.permute.xlu1 %1599 }
  0xa0   : > { %1282 = vmatmul.mubr.bf16.gmra.mrb[60].mxu0 %v3492_v15  ;;  %v1605_v15 = vpop.permute.xlu0 %1604 }
  0xa1   : > { %1443 = vmatmul.mubr.bf16.gmra.mrb[60].mxu1 %v3493_v16  ;;  %v1778_v16 = vld [vmem:[%s3862_s13 + $0x20] sm:$0xff] }
  0xfb   : > { %v2987_v17 = vpop.f32.mrb[0].mxu0 }
  0xfc   : > { %v3099_v19 = vpop.f32.mrb[0].mxu1  ;;  %v2988_v20 = vpop.f32.mrb[1].mxu0 }
  0xfd   : > { %v2989_v21 = vadd.f32 %v2988_v20, %v2987_v17  ;;  %v3100_v22 = vpop.f32.mrb[1].mxu1  ;;  %v2990_v23 = vpop.f32.mrb[2].mxu0 }
  0xfe   : > { %v3101_v24 = vadd.f32 %v3100_v22, %v3099_v19  ;;  %v3102_v25 = vpop.f32.mrb[2].mxu1  ;;  %v2991_v26 = vpop.f32.mrb[3].mxu0  ;;  %v1779_v22 = vld [vmem:[%s3862_s13 + $0x28] sm:$0xff] }
  0xff   : > { %v2992_v27 = vadd.f32 %v2991_v26, %v2990_v23  ;;  %v3103_v28 = vpop.f32.mrb[3].mxu1  ;;  %v1610_v20 = vpop.permute.xlu1 %1609 }
 0x100   : > { %v1325_v29 = vadd.f32 %v3101_v24, %v2989_v21  ;;  %v3104_v30 = vadd.f32 %v3103_v28, %v3102_v25 }
 0x102   : > { %v1742_v33 = vmul.f32 %v1585_v18, %v1325_v29  ;;  %v1328_v34 = vadd.f32 %v3104_v30, %v2992_v27 }
 0x103   : > { %v2993_v37 = vpop.f32.mrb[4].mxu0 }
 0x104   : > { %v1806_v38 = vadd.f32 %v1774_v31, %v1742_v33  ;;  %v1743_v39 = vmul.f32 %v1590_v32, %v1328_v34  ;;  %v3105_v40 = vpop.f32.mrb[4].mxu1  ;;  %v2994_v41 = vpop.f32.mrb[5].mxu0 }
 0x105   : > { %v2995_v42 = vadd.f32 %v2994_v41, %v2993_v37  ;;  %v3106_v43 = vpop.f32.mrb[5].mxu1  ;;  %v2996_v44 = vpop.f32.mrb[6].mxu0  ;;  %v1780_v41 = vld [vmem:[%s3862_s13 + $0x30] sm:$0xff] }
 0x106   : > { %v1807_v45 = vadd.f32 %v1775_v36, %v1743_v39  ;;  %v3107_v46 = vadd.f32 %v3106_v43, %v3105_v40  ;;  %v3108_v47 = vpop.f32.mrb[6].mxu1  ;;  %v2997_v48 = vpop.f32.mrb[7].mxu0  ;;  %v1838_v51 = vmax.f32 %v1806_v38, 0.0 }
 0x107   : > { %v2998_v49 = vadd.f32 %v2997_v48, %v2996_v44  ;;  %v3109_v50 = vpop.f32.mrb[7].mxu1  ;;  %v1615_v40 = vpop.permute.xlu0 %1614 }
 0x108   : > { %v1839_v52 = vmax.f32 %v1807_v45, 0.0  ;;  %v1333_v53 = vadd.f32 %v3107_v46, %v2995_v42  ;;  %v3110_v54 = vadd.f32 %v3109_v50, %v3108_v47  ;;  %v1620_v45 = vpop.permute.xlu1 %1619  ;;  %v1781_v47 = vld [vmem:[%s3862_s13 + $0x38] sm:$0xff] }
 0x10a   : > { %v1744_v56 = vmul.f32 %v1595_v35, %v1333_v53  ;;  %v1336_v57 = vadd.f32 %v3110_v54, %v2998_v49  ;;  %v1870_v58 = vpack.c.bf16 %v1839_v52, %v1838_v51 }
 0x10b   : > { %v2999_v61 = vpop.f32.mrb[8].mxu0 }
 0x10c   : > { %v1808_v62 = vadd.f32 %v1776_v55, %v1744_v56  ;;  %v1745_v63 = vmul.f32 %v1600_v59, %v1336_v57  ;;  %v3111_v0 = vpop.f32.mrb[8].mxu1  ;;  %3259 = vmatprep.mubr.bf16.mxu0 %v1870_v58  ;;  %3307 = vmatprep.mubr.bf16.mxu1 %v1870_v58  ;;  %v3000_v1 = vpop.f32.mrb[9].mxu0 }
 0x10d   : > { %v3001_v2 = vadd.f32 %v3000_v1, %v2999_v61  ;;  %v3112_v3 = vpop.f32.mrb[9].mxu1  ;;  %v3002_v4 = vpop.f32.mrb[10].mxu0 }
 0x10e   : > { %v1809_v5 = vadd.f32 %v1777_v60, %v1745_v63  ;;  %v3113_v6 = vadd.f32 %v3112_v3, %v3111_v0  ;;  %v3114_v7 = vpop.f32.mrb[10].mxu1  ;;  %v3003_v8 = vpop.f32.mrb[11].mxu0  ;;  %v1840_v11 = vmax.f32 %v1808_v62, 0.0 }
 0x10f   : > { %v3004_v9 = vadd.f32 %v3003_v8, %v3002_v4  ;;  %v3115_v10 = vpop.f32.mrb[11].mxu1  ;;  %v1625_v1 = vpop.permute.xlu0 %1624  ;;  %v1783_v8 = vld [vmem:[%s3862_s13 + $0x48] sm:$0xff] }
 0x110   : > { %v1841_v12 = vmax.f32 %v1809_v5, 0.0  ;;  %v1341_v13 = vadd.f32 %v3113_v6, %v3001_v2  ;;  %v3116_v14 = vadd.f32 %v3115_v10, %v3114_v7  ;;  %v1782_v2 = vld [vmem:[%s3862_s13 + $0x40] sm:$0xff]  ;;  %v1630_v6 = vpop.permute.xlu1 %1629 }
 0x112   : > { %v1871_v17 = vpack.c.bf16 %v1841_v12, %v1840_v11  ;;  %v1746_v18 = vmul.f32 %v1605_v15, %v1341_v13  ;;  %v1344_v19 = vadd.f32 %v3116_v14, %v3004_v9 }
 0x113   : > { %v3005_v21 = vpop.f32.mrb[12].mxu0 }
 0x114   : > { %v1747_v23 = vmul.f32 %v1610_v20, %v1344_v19  ;;  %v3117_v24 = vpop.f32.mrb[12].mxu1  ;;  %3260 = vmatmul.mubr.bf16.vlgmr.msra.gmra.mrb[64].mxu0 %v1871_v17  ;;  %3308 = vmatmul.mubr.bf16.vlgmr.msra.gmra.mrb[64].mxu1 %v1871_v17  ;;  %v3006_v25 = vpop.f32.mrb[13].mxu0  ;;  %v1810_v26 = vadd.f32 %v1778_v16, %v1746_v18 }
 0x115   : > { %v3007_v27 = vadd.f32 %v3006_v25, %v3005_v21  ;;  %v3118_v28 = vpop.f32.mrb[13].mxu1  ;;  %v3008_v29 = vpop.f32.mrb[14].mxu0 }
 0x116   : > { %v3119_v30 = vadd.f32 %v3118_v28, %v3117_v24  ;;  %v3120_v31 = vpop.f32.mrb[14].mxu1  ;;  %v3009_v32 = vpop.f32.mrb[15].mxu0  ;;  %v1811_v33 = vadd.f32 %v1779_v22, %v1747_v23  ;;  %v1842_v38 = vmax.f32 %v1810_v26, 0.0 }
 0x117   : > { %v3010_v34 = vadd.f32 %v3009_v32, %v3008_v29  ;;  %v3121_v35 = vpop.f32.mrb[15].mxu1  ;;  %v1635_v26 = vpop.permute.xlu0 %1634 }
 0x118   : > { %v1349_v36 = vadd.f32 %v3119_v30, %v3007_v27  ;;  %v3122_v37 = vadd.f32 %v3121_v35, %v3120_v31  ;;  %v1843_v39 = vmax.f32 %v1811_v33, 0.0  ;;  %v1784_v27 = vld [vmem:[%s3862_s13 + $0x50] sm:$0xff]  ;;  %v1640_v31 = vpop.permute.xlu1 %1639  ;;  %v1785_v33 = vld [vmem:[%s3862_s13 + $0x58] sm:$0xff] }
 0x11a   : > { %v1748_v42 = vmul.f32 %v1615_v40, %v1349_v36  ;;  %v1352_v43 = vadd.f32 %v3122_v37, %v3010_v34  ;;  %v1872_v44 = vpack.c.bf16 %v1843_v39, %v1842_v38 }
 0x11b   : > { %v3011_v46 = vpop.f32.mrb[16].mxu0 }
 0x11c   : > { %v1749_v48 = vmul.f32 %v1620_v45, %v1352_v43  ;;  %v3123_v49 = vpop.f32.mrb[16].mxu1  ;;  %3263 = vmatprep.mubr.bf16.mxu0 %v1872_v44  ;;  %3311 = vmatprep.mubr.bf16.mxu1 %v1872_v44  ;;  %v3012_v50 = vpop.f32.mrb[17].mxu0  ;;  %v1812_v51 = vadd.f32 %v1780_v41, %v1748_v42 }
 0x11d   : > { %v3013_v52 = vadd.f32 %v3012_v50, %v3011_v46  ;;  %v3124_v53 = vpop.f32.mrb[17].mxu1  ;;  %v3014_v54 = vpop.f32.mrb[18].mxu0 }
 0x11e   : > { %v3125_v55 = vadd.f32 %v3124_v53, %v3123_v49  ;;  %v3126_v56 = vpop.f32.mrb[18].mxu1  ;;  %v3015_v57 = vpop.f32.mrb[19].mxu0  ;;  %v1813_v58 = vadd.f32 %v1781_v47, %v1749_v48  ;;  %v1844_v63 = vmax.f32 %v1812_v51, 0.0 }
 0x11f   : > { %v3016_v59 = vadd.f32 %v3015_v57, %v3014_v54  ;;  %v3127_v60 = vpop.f32.mrb[19].mxu1  ;;  %v1645_v51 = vpop.permute.xlu0 %1644 }
 0x120   : > { %v1357_v61 = vadd.f32 %v3125_v55, %v3013_v52  ;;  %v3128_v62 = vadd.f32 %v3127_v60, %v3126_v56  ;;  %v1845_v0 = vmax.f32 %v1813_v58, 0.0  ;;  %v1786_v52 = vld [vmem:[%s3862_s13 + $0x60] sm:$0xff]  ;;  %v1650_v56 = vpop.permute.xlu1 %1649  ;;  %v1787_v58 = vld [vmem:[%s3862_s13 + $0x68] sm:$0xff] }
 0x122   : > { %v1750_v3 = vmul.f32 %v1625_v1, %v1357_v61  ;;  %v1360_v4 = vadd.f32 %v3128_v62, %v3016_v59  ;;  %v1873_v5 = vpack.c.bf16 %v1845_v0, %v1844_v63 }
 0x123   : > { %v3017_v7 = vpop.f32.mrb[20].mxu0 }
 0x124   : > { %v1751_v9 = vmul.f32 %v1630_v6, %v1360_v4  ;;  %v3129_v10 = vpop.f32.mrb[20].mxu1  ;;  %3264 = vmatmul.mubr.bf16.gmra.mrb[68].mxu0 %v1873_v5  ;;  %3312 = vmatmul.mubr.bf16.gmra.mrb[68].mxu1 %v1873_v5  ;;  %v3018_v11 = vpop.f32.mrb[21].mxu0  ;;  %v1814_v12 = vadd.f32 %v1782_v2, %v1750_v3 }
 0x125   : > { %v3019_v13 = vadd.f32 %v3018_v11, %v3017_v7  ;;  %v3130_v14 = vpop.f32.mrb[21].mxu1  ;;  %v3020_v15 = vpop.f32.mrb[22].mxu0 }
 0x126   : > { %v3131_v16 = vadd.f32 %v3130_v14, %v3129_v10  ;;  %v3132_v17 = vpop.f32.mrb[22].mxu1  ;;  %v3021_v18 = vpop.f32.mrb[23].mxu0  ;;  %v1815_v19 = vadd.f32 %v1783_v8, %v1751_v9  ;;  %v1846_v24 = vmax.f32 %v1814_v12, 0.0 }
 0x127   : > { %v3022_v20 = vadd.f32 %v3021_v18, %v3020_v15  ;;  %v3133_v21 = vpop.f32.mrb[23].mxu1  ;;  %v1655_v12 = vpop.permute.xlu0 %1654 }
 0x128   : > { %v1365_v22 = vadd.f32 %v3131_v16, %v3019_v13  ;;  %v3134_v23 = vadd.f32 %v3133_v21, %v3132_v17  ;;  %v1847_v25 = vmax.f32 %v1815_v19, 0.0  ;;  %v1788_v13 = vld [vmem:[%s3862_s13 + $0x70] sm:$0xff]  ;;  %v1660_v17 = vpop.permute.xlu1 %1659  ;;  %v1789_v19 = vld [vmem:[%s3862_s13 + $0x78] sm:$0xff] }
 0x12a   : > { %v1752_v28 = vmul.f32 %v1635_v26, %v1365_v22  ;;  %v1368_v29 = vadd.f32 %v3134_v23, %v3022_v20  ;;  %v1874_v30 = vpack.c.bf16 %v1847_v25, %v1846_v24 }
 0x12b   : > { %v3023_v32 = vpop.f32.mrb[24].mxu0 }
 0x12c   : > { %v1753_v34 = vmul.f32 %v1640_v31, %v1368_v29  ;;  %v3135_v35 = vpop.f32.mrb[24].mxu1  ;;  %3267 = vmatprep.mubr.bf16.mxu0 %v1874_v30  ;;  %3315 = vmatprep.mubr.bf16.mxu1 %v1874_v30  ;;  %v3024_v36 = vpop.f32.mrb[25].mxu0  ;;  %v1816_v37 = vadd.f32 %v1784_v27, %v1752_v28 }
 0x12d   : > { %v3025_v38 = vadd.f32 %v3024_v36, %v3023_v32  ;;  %v3136_v39 = vpop.f32.mrb[25].mxu1  ;;  %v3026_v40 = vpop.f32.mrb[26].mxu0 }
 0x12e   : > { %v3137_v41 = vadd.f32 %v3136_v39, %v3135_v35  ;;  %v3138_v42 = vpop.f32.mrb[26].mxu1  ;;  %v3027_v43 = vpop.f32.mrb[27].mxu0  ;;  %v1817_v44 = vadd.f32 %v1785_v33, %v1753_v34  ;;  %v1848_v49 = vmax.f32 %v1816_v37, 0.0 }
 0x12f   : > { %v3028_v45 = vadd.f32 %v3027_v43, %v3026_v40  ;;  %v3139_v46 = vpop.f32.mrb[27].mxu1  ;;  %v1665_v37 = vpop.permute.xlu0 %1664 }
 0x130   : > { %v1373_v47 = vadd.f32 %v3137_v41, %v3025_v38  ;;  %v3140_v48 = vadd.f32 %v3139_v46, %v3138_v42  ;;  %v1849_v50 = vmax.f32 %v1817_v44, 0.0  ;;  %v1790_v38 = vld [vmem:[%s3862_s13 + $0x80] sm:$0xff]  ;;  %v1670_v42 = vpop.permute.xlu1 %1669  ;;  %v1791_v44 = vld [vmem:[%s3862_s13 + $0x88] sm:$0xff] }
 0x132   : > { %v1754_v53 = vmul.f32 %v1645_v51, %v1373_v47  ;;  %v1376_v54 = vadd.f32 %v3140_v48, %v3028_v45  ;;  %v1875_v55 = vpack.c.bf16 %v1849_v50, %v1848_v49 }
 0x133   : > { %v3029_v57 = vpop.f32.mrb[28].mxu0 }
 0x134   : > { %v1755_v59 = vmul.f32 %v1650_v56, %v1376_v54  ;;  %v3141_v60 = vpop.f32.mrb[28].mxu1  ;;  %3268 = vmatmul.mubr.bf16.gmra.mrb[72].mxu0 %v1875_v55  ;;  %3316 = vmatmul.mubr.bf16.gmra.mrb[72].mxu1 %v1875_v55  ;;  %v3030_v61 = vpop.f32.mrb[29].mxu0  ;;  %v1818_v62 = vadd.f32 %v1786_v52, %v1754_v53 }
 0x135   : > { %v3031_v63 = vadd.f32 %v3030_v61, %v3029_v57  ;;  %v3142_v0 = vpop.f32.mrb[29].mxu1  ;;  %v3032_v1 = vpop.f32.mrb[30].mxu0 }
 0x136   : > { %v3143_v2 = vadd.f32 %v3142_v0, %v3141_v60  ;;  %v3144_v3 = vpop.f32.mrb[30].mxu1  ;;  %v3033_v4 = vpop.f32.mrb[31].mxu0  ;;  %v1819_v5 = vadd.f32 %v1787_v58, %v1755_v59  ;;  %v1850_v10 = vmax.f32 %v1818_v62, 0.0 }
 0x137   : > { %v3034_v6 = vadd.f32 %v3033_v4, %v3032_v1  ;;  %v3145_v7 = vpop.f32.mrb[31].mxu1  ;;  %v1675_v62 = vpop.permute.xlu0 %1674 }
 0x138   : > { %v1381_v8 = vadd.f32 %v3143_v2, %v3031_v63  ;;  %v3146_v9 = vadd.f32 %v3145_v7, %v3144_v3  ;;  %v1851_v11 = vmax.f32 %v1819_v5, 0.0  ;;  %v1792_v63 = vld [vmem:[%s3862_s13 + $0x90] sm:$0xff]  ;;  %v1680_v3 = vpop.permute.xlu1 %1679  ;;  %v1793_v5 = vld [vmem:[%s3862_s13 + $0x98] sm:$0xff] }
 0x13a   : > { %v1756_v14 = vmul.f32 %v1655_v12, %v1381_v8  ;;  %v1384_v15 = vadd.f32 %v3146_v9, %v3034_v6  ;;  %v1876_v16 = vpack.c.bf16 %v1851_v11, %v1850_v10 }
 0x13b   : > { %v3035_v18 = vpop.f32.mrb[32].mxu0 }
 0x13c   : > { %v1757_v20 = vmul.f32 %v1660_v17, %v1384_v15  ;;  %v3147_v21 = vpop.f32.mrb[32].mxu1  ;;  %3271 = vmatprep.mubr.bf16.mxu0 %v1876_v16  ;;  %3319 = vmatprep.mubr.bf16.mxu1 %v1876_v16  ;;  %v3036_v22 = vpop.f32.mrb[33].mxu0  ;;  %v1820_v23 = vadd.f32 %v1788_v13, %v1756_v14 }
 0x13d   : > { %v3037_v24 = vadd.f32 %v3036_v22, %v3035_v18  ;;  %v3148_v25 = vpop.f32.mrb[33].mxu1  ;;  %v3038_v26 = vpop.f32.mrb[34].mxu0 }
 0x13e   : > { %v3149_v27 = vadd.f32 %v3148_v25, %v3147_v21  ;;  %v3150_v28 = vpop.f32.mrb[34].mxu1  ;;  %v3039_v29 = vpop.f32.mrb[35].mxu0  ;;  %v1821_v30 = vadd.f32 %v1789_v19, %v1757_v20  ;;  %v1852_v35 = vmax.f32 %v1820_v23, 0.0 }
 0x13f   : > { %v3040_v31 = vadd.f32 %v3039_v29, %v3038_v26  ;;  %v3151_v32 = vpop.f32.mrb[35].mxu1  ;;  %v1685_v23 = vpop.permute.xlu0 %1684 }
 0x140   : > { %v1389_v33 = vadd.f32 %v3149_v27, %v3037_v24  ;;  %v3152_v34 = vadd.f32 %v3151_v32, %v3150_v28  ;;  %v1853_v36 = vmax.f32 %v1821_v30, 0.0  ;;  %v1794_v24 = vld [vmem:[%s3862_s13 + $0xa0] sm:$0xff]  ;;  %v1690_v28 = vpop.permute.xlu1 %1689  ;;  %v1795_v30 = vld [vmem:[%s3862_s13 + $0xa8] sm:$0xff] }
 0x142   : > { %v1758_v39 = vmul.f32 %v1665_v37, %v1389_v33  ;;  %v1392_v40 = vadd.f32 %v3152_v34, %v3040_v31  ;;  %v1877_v41 = vpack.c.bf16 %v1853_v36, %v1852_v35 }
 0x143   : > { %v3041_v43 = vpop.f32.mrb[36].mxu0 }
 0x144   : > { %v1759_v45 = vmul.f32 %v1670_v42, %v1392_v40  ;;  %v3153_v46 = vpop.f32.mrb[36].mxu1  ;;  %3272 = vmatmul.mubr.bf16.gmra.mrb[76].mxu0 %v1877_v41  ;;  %3320 = vmatmul.mubr.bf16.gmra.mrb[76].mxu1 %v1877_v41  ;;  %v3042_v47 = vpop.f32.mrb[37].mxu0  ;;  %v1822_v48 = vadd.f32 %v1790_v38, %v1758_v39 }
 0x145   : > { %v3043_v49 = vadd.f32 %v3042_v47, %v3041_v43  ;;  %v3154_v50 = vpop.f32.mrb[37].mxu1  ;;  %v3044_v51 = vpop.f32.mrb[38].mxu0 }
 0x146   : > { %v3155_v52 = vadd.f32 %v3154_v50, %v3153_v46  ;;  %v3156_v53 = vpop.f32.mrb[38].mxu1  ;;  %v3045_v54 = vpop.f32.mrb[39].mxu0  ;;  %v1823_v55 = vadd.f32 %v1791_v44, %v1759_v45  ;;  %v1854_v60 = vmax.f32 %v1822_v48, 0.0 }
 0x147   : > { %v3046_v56 = vadd.f32 %v3045_v54, %v3044_v51  ;;  %v3157_v57 = vpop.f32.mrb[39].mxu1  ;;  %v1695_v48 = vpop.permute.xlu0 %1694 }
 0x148   : > { %v1397_v58 = vadd.f32 %v3155_v52, %v3043_v49  ;;  %v3158_v59 = vadd.f32 %v3157_v57, %v3156_v53  ;;  %v1855_v61 = vmax.f32 %v1823_v55, 0.0  ;;  %v1796_v49 = vld [vmem:[%s3862_s13 + $0xb0] sm:$0xff]  ;;  %v1700_v53 = vpop.permute.xlu1 %1699  ;;  %v1797_v55 = vld [vmem:[%s3862_s13 + $0xb8] sm:$0xff] }
 0x14a   : > { %v1760_v0 = vmul.f32 %v1675_v62, %v1397_v58  ;;  %v1400_v1 = vadd.f32 %v3158_v59, %v3046_v56  ;;  %v1878_v2 = vpack.c.bf16 %v1855_v61, %v1854_v60 }
 0x14b   : > { %v3047_v4 = vpop.f32.mrb[40].mxu0 }
 0x14c   : > { %v1761_v6 = vmul.f32 %v1680_v3, %v1400_v1  ;;  %v3159_v7 = vpop.f32.mrb[40].mxu1  ;;  %3275 = vmatprep.mubr.bf16.mxu0 %v1878_v2  ;;  %3323 = vmatprep.mubr.bf16.mxu1 %v1878_v2  ;;  %v3048_v8 = vpop.f32.mrb[41].mxu0  ;;  %v1824_v9 = vadd.f32 %v1792_v63, %v1760_v0 }
 0x14d   : > { %v3049_v10 = vadd.f32 %v3048_v8, %v3047_v4  ;;  %v3160_v11 = vpop.f32.mrb[41].mxu1  ;;  %v3050_v12 = vpop.f32.mrb[42].mxu0 }
 0x14e   : > { %v3161_v13 = vadd.f32 %v3160_v11, %v3159_v7  ;;  %v3162_v14 = vpop.f32.mrb[42].mxu1  ;;  %v3051_v15 = vpop.f32.mrb[43].mxu0  ;;  %v1825_v16 = vadd.f32 %v1793_v5, %v1761_v6  ;;  %v1856_v21 = vmax.f32 %v1824_v9, 0.0 }
 0x14f   : > { %v3052_v17 = vadd.f32 %v3051_v15, %v3050_v12  ;;  %v3163_v18 = vpop.f32.mrb[43].mxu1  ;;  %v1705_v9 = vpop.permute.xlu0 %1704 }
 0x150   : > { %v1405_v19 = vadd.f32 %v3161_v13, %v3049_v10  ;;  %v3164_v20 = vadd.f32 %v3163_v18, %v3162_v14  ;;  %v1857_v22 = vmax.f32 %v1825_v16, 0.0  ;;  %v1798_v10 = vld [vmem:[%s3862_s13 + $0xc0] sm:$0xff]  ;;  %v1710_v14 = vpop.permute.xlu1 %1709  ;;  %v1799_v16 = vld [vmem:[%s3862_s13 + $0xc8] sm:$0xff] }
 0x152   : > { %v1762_v25 = vmul.f32 %v1685_v23, %v1405_v19  ;;  %v1408_v26 = vadd.f32 %v3164_v20, %v3052_v17  ;;  %v1879_v27 = vpack.c.bf16 %v1857_v22, %v1856_v21 }
 0x153   : > { %v3053_v29 = vpop.f32.mrb[44].mxu0 }
 0x154   : > { %v1763_v31 = vmul.f32 %v1690_v28, %v1408_v26  ;;  %v3165_v32 = vpop.f32.mrb[44].mxu1  ;;  %3276 = vmatmul.mubr.bf16.gmra.mrb[80].mxu0 %v1879_v27  ;;  %3324 = vmatmul.mubr.bf16.gmra.mrb[80].mxu1 %v1879_v27  ;;  %v3054_v33 = vpop.f32.mrb[45].mxu0  ;;  %v1826_v34 = vadd.f32 %v1794_v24, %v1762_v25 }
 0x155   : > { %v3055_v35 = vadd.f32 %v3054_v33, %v3053_v29  ;;  %v3166_v36 = vpop.f32.mrb[45].mxu1  ;;  %v3056_v37 = vpop.f32.mrb[46].mxu0 }
 0x156   : > { %v3167_v38 = vadd.f32 %v3166_v36, %v3165_v32  ;;  %v3168_v39 = vpop.f32.mrb[46].mxu1  ;;  %v3057_v40 = vpop.f32.mrb[47].mxu0  ;;  %v1827_v41 = vadd.f32 %v1795_v30, %v1763_v31  ;;  %v1858_v46 = vmax.f32 %v1826_v34, 0.0 }
 0x157   : > { %v3058_v42 = vadd.f32 %v3057_v40, %v3056_v37  ;;  %v3169_v43 = vpop.f32.mrb[47].mxu1  ;;  %v1715_v34 = vpop.permute.xlu0 %1714 }
 0x158   : > { %v1413_v44 = vadd.f32 %v3167_v38, %v3055_v35  ;;  %v3170_v45 = vadd.f32 %v3169_v43, %v3168_v39  ;;  %v1859_v47 = vmax.f32 %v1827_v41, 0.0  ;;  %v1800_v35 = vld [vmem:[%s3862_s13 + $0xd0] sm:$0xff]  ;;  %v1720_v39 = vpop.permute.xlu1 %1719  ;;  %v1801_v41 = vld [vmem:[%s3862_s13 + $0xd8] sm:$0xff] }
 0x15a   : > { %v1764_v50 = vmul.f32 %v1695_v48, %v1413_v44  ;;  %v1416_v51 = vadd.f32 %v3170_v45, %v3058_v42  ;;  %v1880_v52 = vpack.c.bf16 %v1859_v47, %v1858_v46 }
 0x15b   : > { %v3059_v54 = vpop.f32.mrb[48].mxu0 }
 0x15c   : > { %v1765_v56 = vmul.f32 %v1700_v53, %v1416_v51  ;;  %v3171_v57 = vpop.f32.mrb[48].mxu1  ;;  %3279 = vmatprep.mubr.bf16.mxu0 %v1880_v52  ;;  %3327 = vmatprep.mubr.bf16.mxu1 %v1880_v52  ;;  %v3060_v58 = vpop.f32.mrb[49].mxu0  ;;  %v1828_v59 = vadd.f32 %v1796_v49, %v1764_v50 }
 0x15d   : > { %v3061_v60 = vadd.f32 %v3060_v58, %v3059_v54  ;;  %v3172_v61 = vpop.f32.mrb[49].mxu1  ;;  %v3062_v62 = vpop.f32.mrb[50].mxu0 }
 0x15e   : > { %v3173_v63 = vadd.f32 %v3172_v61, %v3171_v57  ;;  %v3174_v0 = vpop.f32.mrb[50].mxu1  ;;  %v3063_v1 = vpop.f32.mrb[51].mxu0  ;;  %v1829_v2 = vadd.f32 %v1797_v55, %v1765_v56  ;;  %v1860_v7 = vmax.f32 %v1828_v59, 0.0 }
 0x15f   : > { %v3064_v3 = vadd.f32 %v3063_v1, %v3062_v62  ;;  %v3175_v4 = vpop.f32.mrb[51].mxu1  ;;  %v1725_v59 = vpop.permute.xlu0 %1724 }
 0x160   : > { %v1421_v5 = vadd.f32 %v3173_v63, %v3061_v60  ;;  %v3176_v6 = vadd.f32 %v3175_v4, %v3174_v0  ;;  %v1861_v8 = vmax.f32 %v1829_v2, 0.0  ;;  %v1802_v60 = vld [vmem:[%s3862_s13 + $0xe0] sm:$0xff]  ;;  %v1730_v0 = vpop.permute.xlu1 %1729  ;;  %v1803_v2 = vld [vmem:[%s3862_s13 + $0xe8] sm:$0xff] }
 0x162   : > { %v1766_v11 = vmul.f32 %v1705_v9, %v1421_v5  ;;  %v1424_v12 = vadd.f32 %v3176_v6, %v3064_v3  ;;  %v1881_v13 = vpack.c.bf16 %v1861_v8, %v1860_v7 }
 0x163   : > { %v3065_v15 = vpop.f32.mrb[52].mxu0 }
 0x164   : > { %v1767_v17 = vmul.f32 %v1710_v14, %v1424_v12  ;;  %v3177_v18 = vpop.f32.mrb[52].mxu1  ;;  %3280 = vmatmul.mubr.bf16.gmra.mrb[84].mxu0 %v1881_v13  ;;  %3328 = vmatmul.mubr.bf16.gmra.mrb[84].mxu1 %v1881_v13  ;;  %v3066_v19 = vpop.f32.mrb[53].mxu0  ;;  %v1830_v20 = vadd.f32 %v1798_v10, %v1766_v11 }
 0x165   : > { %v3067_v21 = vadd.f32 %v3066_v19, %v3065_v15  ;;  %v3178_v22 = vpop.f32.mrb[53].mxu1  ;;  %v3068_v23 = vpop.f32.mrb[54].mxu0 }
 0x166   : > { %v3179_v24 = vadd.f32 %v3178_v22, %v3177_v18  ;;  %v3180_v25 = vpop.f32.mrb[54].mxu1  ;;  %v3069_v26 = vpop.f32.mrb[55].mxu0  ;;  %v1831_v27 = vadd.f32 %v1799_v16, %v1767_v17  ;;  %v1862_v32 = vmax.f32 %v1830_v20, 0.0 }
 0x167   : > { %v3070_v28 = vadd.f32 %v3069_v26, %v3068_v23  ;;  %v3181_v29 = vpop.f32.mrb[55].mxu1  ;;  %v1735_v20 = vpop.permute.xlu0 %1734  ;;  %v1805_v26 = vld [vmem:[%s3862_s13 + $0xf8] sm:$0xff] }
 0x168   : > { %v1429_v30 = vadd.f32 %v3179_v24, %v3067_v21  ;;  %v3182_v31 = vadd.f32 %v3181_v29, %v3180_v25  ;;  %v1863_v33 = vmax.f32 %v1831_v27, 0.0  ;;  %v1804_v21 = vld [vmem:[%s3862_s13 + $0xf0] sm:$0xff]  ;;  %v1740_v25 = vpop.permute.xlu1 %1739 }
 0x16a   : > { %v1768_v36 = vmul.f32 %v1715_v34, %v1429_v30  ;;  %v1432_v37 = vadd.f32 %v3182_v31, %v3070_v28  ;;  %v1882_v38 = vpack.c.bf16 %v1863_v33, %v1862_v32  ;;  %v3899_v33 = vld [vmem:[%s4008_s6] ss:$0 sm:$0xff] }
 0x16b   : > { %v3071_v40 = vpop.f32.mrb[56].mxu0 }
 0x16c   : > { %v1769_v42 = vmul.f32 %v1720_v39, %v1432_v37  ;;  %v3183_v43 = vpop.f32.mrb[56].mxu1  ;;  %3283 = vmatprep.mubr.bf16.mxu0 %v1882_v38  ;;  %3331 = vmatprep.mubr.bf16.mxu1 %v1882_v38  ;;  %v3072_v44 = vpop.f32.mrb[57].mxu0  ;;  %v1832_v45 = vadd.f32 %v1800_v35, %v1768_v36 }
 0x16d   : > { %v3073_v46 = vadd.f32 %v3072_v44, %v3071_v40  ;;  %v3184_v47 = vpop.f32.mrb[57].mxu1  ;;  %v3074_v48 = vpop.f32.mrb[58].mxu0 }
 0x16e   : > { %v3185_v49 = vadd.f32 %v3184_v47, %v3183_v43  ;;  %v3186_v50 = vpop.f32.mrb[58].mxu1  ;;  %v3075_v51 = vpop.f32.mrb[59].mxu0  ;;  %v1833_v52 = vadd.f32 %v1801_v41, %v1769_v42  ;;  %v1864_v57 = vmax.f32 %v1832_v45, 0.0 }
 0x16f   : > { %v3076_v53 = vadd.f32 %v3075_v51, %v3074_v48  ;;  %v3187_v54 = vpop.f32.mrb[59].mxu1 }
 0x170   : > { %v1437_v55 = vadd.f32 %v3185_v49, %v3073_v46  ;;  %v3188_v56 = vadd.f32 %v3187_v54, %v3186_v50  ;;  %v1865_v58 = vmax.f32 %v1833_v52, 0.0 }
 0x172   : > { %v1770_v61 = vmul.f32 %v1725_v59, %v1437_v55  ;;  %v1440_v62 = vadd.f32 %v3188_v56, %v3076_v53  ;;  %v1883_v63 = vpack.c.bf16 %v1865_v58, %v1864_v57 }
 0x173   : > { %v3077_v1 = vpop.f32.mrb[60].mxu0 }
 0x174   : > { %v1771_v3 = vmul.f32 %v1730_v0, %v1440_v62  ;;  %v3189_v4 = vpop.f32.mrb[60].mxu1  ;;  %3284 = vmatmul.mubr.bf16.gmra.mrb[88].mxu0 %v1883_v63  ;;  %3332 = vmatmul.mubr.bf16.gmra.mrb[88].mxu1 %v1883_v63  ;;  %v3078_v5 = vpop.f32.mrb[61].mxu0  ;;  %v1834_v6 = vadd.f32 %v1802_v60, %v1770_v61 }
 0x175   : > { %v3079_v7 = vadd.f32 %v3078_v5, %v3077_v1  ;;  %v3190_v8 = vpop.f32.mrb[61].mxu1  ;;  %v3080_v9 = vpop.f32.mrb[62].mxu0 }
 0x176   : > { %v3191_v10 = vadd.f32 %v3190_v8, %v3189_v4  ;;  %v3192_v11 = vpop.f32.mrb[62].mxu1  ;;  %v3081_v12 = vpop.f32.mrb[63].mxu0  ;;  %v1835_v13 = vadd.f32 %v1803_v2, %v1771_v3  ;;  %v1866_v18 = vmax.f32 %v1834_v6, 0.0 }
 0x177   : > { %v3082_v14 = vadd.f32 %v3081_v12, %v3080_v9  ;;  %v3193_v15 = vpop.f32.mrb[63].mxu1 }
 0x178   : > { %v1445_v16 = vadd.f32 %v3191_v10, %v3079_v7  ;;  %v3194_v17 = vadd.f32 %v3193_v15, %v3192_v11  ;;  %v1867_v19 = vmax.f32 %v1835_v13, 0.0 }
 0x17a   : > { %v1772_v22 = vmul.f32 %v1735_v20, %v1445_v16  ;;  %v1448_v23 = vadd.f32 %v3194_v17, %v3082_v14  ;;  %v1884_v24 = vpack.c.bf16 %v1867_v19, %v1866_v18 }
 0x17c   : > { %v1773_v27 = vmul.f32 %v1740_v25, %v1448_v23  ;;  %3287 = vmatprep.mubr.bf16.mxu0 %v1884_v24  ;;  %3335 = vmatprep.mubr.bf16.mxu1 %v1884_v24  ;;  %v1836_v28 = vadd.f32 %v1804_v21, %v1772_v22 }
 0x17e   : > { %v1837_v29 = vadd.f32 %v1805_v26, %v1773_v27  ;;  %v1868_v30 = vmax.f32 %v1836_v28, 0.0 }
 0x180   : > { %v1869_v31 = vmax.f32 %v1837_v29, 0.0 }
 0x182   : > { %v1885_v32 = vpack.c.bf16 %v1869_v31, %v1868_v30 }
 0x184   : > { %3288 = vmatmul.mubr.bf16.gmra.mrb[92].mxu0 %v1885_v32  ;;  %3336 = vmatmul.mubr.bf16.gmra.mrb[92].mxu1 %v1885_v32 }
 0x1e7   : > { %v3261_v34 = vpop.f32.mrb[64].mxu0  ;;  %v3309_v35 = vpop.f32.mrb[64].mxu1 }
 0x1e8   : > { %v2385_v36 = vadd.f32 %v3309_v35, %v3899_v33  ;;  %v1984_v37 = vpop.f32.mrb[65].mxu0  ;;  %v2376_v38 = vpop.f32.mrb[65].mxu1 }
 0x1e9   : > { %v2377_v39 = vadd.f32 %v3899_v33, %v2376_v38  ;;  %v3262_v40 = vpop.f32.mrb[66].mxu0  ;;  %v3310_v41 = vpop.f32.mrb[66].mxu1 }
 0x1ea   : > { %2505 = vst [vmem:[%s3906_s16 + $0x10] sm:$0xff] %v2385_v36  ;;  %v2884_v42 = vpack.c.bf16 %v3262_v40, %v3261_v34  ;;  %v2388_v43 = vadd.f32 %v3310_v41, %v3899_v33  ;;  %v1987_v44 = vpop.f32.mrb[67].mxu0  ;;  %v2379_v45 = vpop.f32.mrb[67].mxu1 }
 0x1eb   : > { %2503 = vst [vmem:[%s3906_s16] sm:$0xff] %v2377_v39  ;;  %v2879_v46 = vpack.c.bf16 %v1987_v44, %v1984_v37  ;;  %v2380_v47 = vadd.f32 %v3899_v33, %v2379_v45 }
 0x1ec   : > { %2956 = vst [vmem:[%s3913_s23 + $0x8] sm:$0xff] %v2884_v42   ;;  %2506 = vst [vmem:[%s3906_s16 + $0x18] sm:$0xff] %v2388_v43 }
 0x1ed   : > { %2880 = vst [vmem:[%s3913_s23] sm:$0xff] %v2879_v46   ;;  %2504 = vst [vmem:[%s3906_s16 + $0x8] sm:$0xff] %v2380_v47 }
 0x1f7   : > { %v3265_v48 = vpop.f32.mrb[68].mxu0  ;;  %v3313_v49 = vpop.f32.mrb[68].mxu1 }
 0x1f8   : > { %v2401_v50 = vadd.f32 %v3313_v49, %v3899_v33  ;;  %v2000_v51 = vpop.f32.mrb[69].mxu0  ;;  %v2392_v52 = vpop.f32.mrb[69].mxu1 }
 0x1f9   : > { %v2393_v53 = vadd.f32 %v3899_v33, %v2392_v52  ;;  %v3266_v54 = vpop.f32.mrb[70].mxu0  ;;  %v3314_v55 = vpop.f32.mrb[70].mxu1 }
 0x1fa   : > { %2509 = vst [vmem:[%s3906_s16 + $0x30] sm:$0xff] %v2401_v50  ;;  %v2894_v56 = vpack.c.bf16 %v3266_v54, %v3265_v48  ;;  %v2404_v57 = vadd.f32 %v3314_v55, %v3899_v33  ;;  %v2003_v58 = vpop.f32.mrb[71].mxu0  ;;  %v2395_v59 = vpop.f32.mrb[71].mxu1 }
 0x1fb   : > { %2507 = vst [vmem:[%s3906_s16 + $0x20] sm:$0xff] %v2393_v53  ;;  %v2889_v60 = vpack.c.bf16 %v2003_v58, %v2000_v51  ;;  %v2396_v61 = vadd.f32 %v3899_v33, %v2395_v59 }
 0x1fc   : > { %2958 = vst [vmem:[%s3913_s23 + $0x18] sm:$0xff] %v2894_v56   ;;  %2510 = vst [vmem:[%s3906_s16 + $0x38] sm:$0xff] %v2404_v57 }
 0x1fd   : > { %2957 = vst [vmem:[%s3913_s23 + $0x10] sm:$0xff] %v2889_v60   ;;  %2508 = vst [vmem:[%s3906_s16 + $0x28] sm:$0xff] %v2396_v61 }
 0x207   : > { %v3269_v62 = vpop.f32.mrb[72].mxu0  ;;  %v3317_v63 = vpop.f32.mrb[72].mxu1 }
 0x208   : > { %v2417_v0 = vadd.f32 %v3317_v63, %v3899_v33  ;;  %v2016_v1 = vpop.f32.mrb[73].mxu0  ;;  %v2408_v2 = vpop.f32.mrb[73].mxu1 }
 0x209   : > { %v2409_v3 = vadd.f32 %v3899_v33, %v2408_v2  ;;  %v3270_v4 = vpop.f32.mrb[74].mxu0  ;;  %v3318_v5 = vpop.f32.mrb[74].mxu1 }
 0x20a   : > { %2513 = vst [vmem:[%s3906_s16 + $0x50] sm:$0xff] %v2417_v0  ;;  %v2904_v6 = vpack.c.bf16 %v3270_v4, %v3269_v62  ;;  %v2420_v7 = vadd.f32 %v3318_v5, %v3899_v33  ;;  %v2019_v8 = vpop.f32.mrb[75].mxu0  ;;  %v2411_v9 = vpop.f32.mrb[75].mxu1 }
 0x20b   : > { %2511 = vst [vmem:[%s3906_s16 + $0x40] sm:$0xff] %v2409_v3  ;;  %v2899_v10 = vpack.c.bf16 %v2019_v8, %v2016_v1  ;;  %v2412_v11 = vadd.f32 %v3899_v33, %v2411_v9 }
 0x20c   : > { %2960 = vst [vmem:[%s3913_s23 + $0x28] sm:$0xff] %v2904_v6   ;;  %2514 = vst [vmem:[%s3906_s16 + $0x58] sm:$0xff] %v2420_v7 }
 0x20d   : > { %2959 = vst [vmem:[%s3913_s23 + $0x20] sm:$0xff] %v2899_v10   ;;  %2512 = vst [vmem:[%s3906_s16 + $0x48] sm:$0xff] %v2412_v11 }
 0x217   : > { %v3273_v12 = vpop.f32.mrb[76].mxu0  ;;  %v3321_v13 = vpop.f32.mrb[76].mxu1 }
 0x218   : > { %v2433_v14 = vadd.f32 %v3321_v13, %v3899_v33  ;;  %v2032_v15 = vpop.f32.mrb[77].mxu0  ;;  %v2424_v16 = vpop.f32.mrb[77].mxu1 }
 0x219   : > { %v2425_v17 = vadd.f32 %v3899_v33, %v2424_v16  ;;  %v3274_v18 = vpop.f32.mrb[78].mxu0  ;;  %v3322_v19 = vpop.f32.mrb[78].mxu1 }
 0x21a   : > { %2517 = vst [vmem:[%s3906_s16 + $0x70] sm:$0xff] %v2433_v14  ;;  %v2914_v20 = vpack.c.bf16 %v3274_v18, %v3273_v12  ;;  %v2436_v21 = vadd.f32 %v3322_v19, %v3899_v33  ;;  %v2035_v22 = vpop.f32.mrb[79].mxu0  ;;  %v2427_v23 = vpop.f32.mrb[79].mxu1 }
 0x21b   : > { %2515 = vst [vmem:[%s3906_s16 + $0x60] sm:$0xff] %v2425_v17  ;;  %v2909_v24 = vpack.c.bf16 %v2035_v22, %v2032_v15  ;;  %v2428_v25 = vadd.f32 %v3899_v33, %v2427_v23 }
 0x21c   : > { %2962 = vst [vmem:[%s3913_s23 + $0x38] sm:$0xff] %v2914_v20   ;;  %2518 = vst [vmem:[%s3906_s16 + $0x78] sm:$0xff] %v2436_v21 }
 0x21d   : > { %2961 = vst [vmem:[%s3913_s23 + $0x30] sm:$0xff] %v2909_v24   ;;  %2516 = vst [vmem:[%s3906_s16 + $0x68] sm:$0xff] %v2428_v25 }
 0x227   : > { %v3277_v26 = vpop.f32.mrb[80].mxu0  ;;  %v3325_v27 = vpop.f32.mrb[80].mxu1 }
 0x228   : > { %v2449_v28 = vadd.f32 %v3325_v27, %v3899_v33  ;;  %v2048_v29 = vpop.f32.mrb[81].mxu0  ;;  %v2440_v30 = vpop.f32.mrb[81].mxu1 }
 0x229   : > { %v2441_v31 = vadd.f32 %v3899_v33, %v2440_v30  ;;  %v3278_v32 = vpop.f32.mrb[82].mxu0  ;;  %v3326_v34 = vpop.f32.mrb[82].mxu1 }
 0x22a   : > { %2521 = vst [vmem:[%s3906_s16 + $0x90] sm:$0xff] %v2449_v28  ;;  %v2924_v35 = vpack.c.bf16 %v3278_v32, %v3277_v26  ;;  %v2452_v36 = vadd.f32 %v3326_v34, %v3899_v33  ;;  %v2051_v37 = vpop.f32.mrb[83].mxu0  ;;  %v2443_v38 = vpop.f32.mrb[83].mxu1 }
 0x22b   : > { %2519 = vst [vmem:[%s3906_s16 + $0x80] sm:$0xff] %v2441_v31  ;;  %v2919_v39 = vpack.c.bf16 %v2051_v37, %v2048_v29  ;;  %v2444_v40 = vadd.f32 %v3899_v33, %v2443_v38 }
 0x22c   : > { %2964 = vst [vmem:[%s3913_s23 + $0x48] sm:$0xff] %v2924_v35   ;;  %2522 = vst [vmem:[%s3906_s16 + $0x98] sm:$0xff] %v2452_v36 }
 0x22d   : > { %2963 = vst [vmem:[%s3913_s23 + $0x40] sm:$0xff] %v2919_v39   ;;  %2520 = vst [vmem:[%s3906_s16 + $0x88] sm:$0xff] %v2444_v40 }
 0x237   : > { %v3281_v41 = vpop.f32.mrb[84].mxu0  ;;  %v3329_v42 = vpop.f32.mrb[84].mxu1 }
 0x238   : > { %v2465_v43 = vadd.f32 %v3329_v42, %v3899_v33  ;;  %v2064_v44 = vpop.f32.mrb[85].mxu0  ;;  %v2456_v45 = vpop.f32.mrb[85].mxu1 }
 0x239   : > { %v2457_v46 = vadd.f32 %v3899_v33, %v2456_v45  ;;  %v3282_v47 = vpop.f32.mrb[86].mxu0  ;;  %v3330_v48 = vpop.f32.mrb[86].mxu1 }
 0x23a   : > { %2525 = vst [vmem:[%s3906_s16 + $0xb0] sm:$0xff] %v2465_v43  ;;  %v2934_v49 = vpack.c.bf16 %v3282_v47, %v3281_v41  ;;  %v2468_v50 = vadd.f32 %v3330_v48, %v3899_v33  ;;  %v2067_v51 = vpop.f32.mrb[87].mxu0  ;;  %v2459_v52 = vpop.f32.mrb[87].mxu1 }
 0x23b   : > { %2523 = vst [vmem:[%s3906_s16 + $0xa0] sm:$0xff] %v2457_v46  ;;  %v2929_v53 = vpack.c.bf16 %v2067_v51, %v2064_v44  ;;  %v2460_v54 = vadd.f32 %v3899_v33, %v2459_v52 }
 0x23c   : > { %2966 = vst [vmem:[%s3913_s23 + $0x58] sm:$0xff] %v2934_v49   ;;  %2526 = vst [vmem:[%s3906_s16 + $0xb8] sm:$0xff] %v2468_v50 }
 0x23d   : > { %2965 = vst [vmem:[%s3913_s23 + $0x50] sm:$0xff] %v2929_v53   ;;  %2524 = vst [vmem:[%s3906_s16 + $0xa8] sm:$0xff] %v2460_v54 }
 0x247   : > { %v3285_v55 = vpop.f32.mrb[88].mxu0  ;;  %v3333_v56 = vpop.f32.mrb[88].mxu1 }
 0x248   : > { %v2481_v57 = vadd.f32 %v3333_v56, %v3899_v33  ;;  %v2080_v58 = vpop.f32.mrb[89].mxu0  ;;  %v2472_v59 = vpop.f32.mrb[89].mxu1 }
 0x249   : > { %v2473_v60 = vadd.f32 %v3899_v33, %v2472_v59  ;;  %v3286_v61 = vpop.f32.mrb[90].mxu0  ;;  %v3334_v62 = vpop.f32.mrb[90].mxu1 }
 0x24a   : > { %2529 = vst [vmem:[%s3906_s16 + $0xd0] sm:$0xff] %v2481_v57  ;;  %v2944_v63 = vpack.c.bf16 %v3286_v61, %v3285_v55  ;;  %v2484_v0 = vadd.f32 %v3334_v62, %v3899_v33  ;;  %v2083_v1 = vpop.f32.mrb[91].mxu0  ;;  %v2475_v2 = vpop.f32.mrb[91].mxu1 }
 0x24b   : > { %2527 = vst [vmem:[%s3906_s16 + $0xc0] sm:$0xff] %v2473_v60  ;;  %v2939_v3 = vpack.c.bf16 %v2083_v1, %v2080_v58  ;;  %v2476_v4 = vadd.f32 %v3899_v33, %v2475_v2 }
 0x24c   : > { %2968 = vst [vmem:[%s3913_s23 + $0x68] sm:$0xff] %v2944_v63   ;;  %2530 = vst [vmem:[%s3906_s16 + $0xd8] sm:$0xff] %v2484_v0 }
 0x24d   : > { %2967 = vst [vmem:[%s3913_s23 + $0x60] sm:$0xff] %v2939_v3   ;;  %2528 = vst [vmem:[%s3906_s16 + $0xc8] sm:$0xff] %v2476_v4 }
 0x257   : > { %v3289_v5 = vpop.f32.mrb[92].mxu0  ;;  %v3337_v6 = vpop.f32.mrb[92].mxu1 }
 0x258   : > { %v2497_v7 = vadd.f32 %v3337_v6, %v3899_v33  ;;  %v2096_v8 = vpop.f32.mrb[93].mxu0  ;;  %v2488_v9 = vpop.f32.mrb[93].mxu1 }
 0x259   : > { %v2489_v10 = vadd.f32 %v3899_v33, %v2488_v9  ;;  %v3290_v11 = vpop.f32.mrb[94].mxu0  ;;  %v3338_v12 = vpop.f32.mrb[94].mxu1 }
 0x25a   : > { %2533 = vst [vmem:[%s3906_s16 + $0xf0] sm:$0xff] %v2497_v7  ;;  %v2954_v13 = vpack.c.bf16 %v3290_v11, %v3289_v5  ;;  %v2500_v14 = vadd.f32 %v3338_v12, %v3899_v33  ;;  %v2099_v15 = vpop.f32.mrb[95].mxu0  ;;  %v2491_v16 = vpop.f32.mrb[95].mxu1 }
 0x25b   : > { %2531 = vst [vmem:[%s3906_s16 + $0xe0] sm:$0xff] %v2489_v10  ;;  %v2949_v17 = vpack.c.bf16 %v2099_v15, %v2096_v8  ;;  %v2492_v18 = vadd.f32 %v3899_v33, %v2491_v16 }
 0x25c   : > { %2970 = vst [vmem:[%s3913_s23 + $0x78] sm:$0xff] %v2954_v13   ;;  %2534 = vst [vmem:[%s3906_s16 + $0xf8] sm:$0xff] %v2500_v14 }
 0x25d   : > { %2969 = vst [vmem:[%s3913_s23 + $0x70] sm:$0xff] %v2949_v17   ;;  %2532 = vst [vmem:[%s3906_s16 + $0xe8] sm:$0xff] %v2492_v18 }
 0x25e PF: > { %s19_s29 = sadd.s32 1, %s3532_s29   ;;  %s4011_s27 = smov %s3528_s28 }
 0x25f   : > { %p16_p5 = scmp.ge.s32.totalorder %s19_s29, 4   ;;  %s4012_s28 = smov %s4014_s30 }
 0x261   :  { %18 = sbr.rel (!%p16_p5) target bundleno = 2 (0x2), region = 107 }

</bundles_post_ra>
